<compile_context>
chip_gen: v5e
topology: v5e:2x2
jax: 0.10.0
libtpu: 0.0.40
codegen_flags: <defaults>
</compile_context>

<pallas_src>
import jax
import jax.numpy as jnp
from jax.experimental import pallas as pl
from jax.experimental.pallas import tpu as pltpu

# ---------------- model dimensions (fixed by the PyTorch module) ----------------
IN_CH = 1
OUT_CH = 10                      # conv out channels (valid)
KH = KW = 5
STRIDE = 2
H = W = 100                      # module assumes 100x100 input (Linear(5760) requires it)
HC = (H - KH) // STRIDE + 1      # 48
WC = (W - KW) // STRIDE + 1      # 48
HP, WP = HC // 2, WC // 2        # 24, 24 after 2x2/2 max-pool
S = HP * WP                      # 576 pooled spatial positions (lane axis)
NUM_CLASSES = 38
FEAT = OUT_CH * S                # 5760 (PyTorch flatten(1) size)

K_TAPS = IN_CH * KH * KW         # 25
K_PAD = 32                       # contraction dim padded (sublane aligned)
CO_PAD = 16                      # conv out-channels padded to one sublane tile
FEAT_PAD = CO_PAD * S            # 9216 = 72 * 128  (lane-aligned linear K)
CLS_PAD = 128                    # classes padded -> lane-dense logits store


# --------------------------------- kernels ---------------------------------------
def _conv_relu_pool_kernel(p_ref, w_ref, b_ref, o_ref):
    """Fused conv(as matmul) + bias + ReLU + 2x2 max-pool, channel-major output.

    p_ref : (NB, 4, K_PAD, S) bf16   patches grouped by pooling quadrant q=(dh,dw)
    w_ref : (CO_PAD, K_PAD)   bf16   conv weights (rows >= OUT_CH are zero)
    b_ref : (CO_PAD, 1)       f32    conv bias (rows >= OUT_CH are zero)
    o_ref : (NB, CO_PAD, S)   bf16   pooled activations, channels on sublanes, S on lanes
    """
    w = w_ref[...]
    b = b_ref[...]
    for i in range(p_ref.shape[0]):                       # static batch-block loop
        acc = jnp.dot(w, p_ref[i, 0], preferred_element_type=jnp.float32)
        for q in range(1, 4):                             # 2x2 max-pool over quadrants
            acc = jnp.maximum(
                acc, jnp.dot(w, p_ref[i, q], preferred_element_type=jnp.float32))
        # bias + ReLU commute with the max (bias constant per channel, ReLU monotone)
        o_ref[i] = jnp.maximum(acc + b, 0.0).astype(o_ref.dtype)


def _linear_kernel(x_ref, w_ref, b_ref, o_ref):
    """(NB, FEAT_PAD) @ (FEAT_PAD, CLS_PAD) + bias, f32 accumulation."""
    o_ref[...] = (
        jnp.dot(x_ref[...], w_ref[...], preferred_element_type=jnp.float32)
        + b_ref[...]
    ).astype(o_ref.dtype)


# --------------------------------- wrappers --------------------------------------
def _make_pooled_patches(x):
    """(N,1,100,100) -> (N, 4, K_PAD, S) bf16, patches grouped by pool quadrant."""
    n = x.shape[0]
    x2 = x[:, 0].astype(jnp.bfloat16)                        # Cin == 1
    taps = []
    for kh in range(KH):
        for kw in range(KW):
            taps.append(x2[:, kh:kh + STRIDE * HC:STRIDE,
                              kw:kw + STRIDE * WC:STRIDE])   # (N,48,48) = x[2oh+kh, 2ow+kw]
    taps += [jnp.zeros_like(taps[0])] * (K_PAD - K_TAPS)     # pad K during the stack
    p = jnp.stack(taps, axis=1)                              # (N, 32, 48, 48)
    p = p.reshape(n, K_PAD, HP, 2, WP, 2)                    # (N, k, ph, dh, pw, dw)
    p = p.transpose(0, 3, 5, 1, 2, 4)                        # (N, dh, dw, k, ph, pw)
    return p.reshape(n, 4, K_PAD, S)                         # (N, 4, 32, 576)


def _prep_params(w1, b1, w2, b2):
    # conv weights (10,1,5,5) -> (CO_PAD, K_PAD), channel-major LHS
    w1m = jnp.pad(w1.reshape(OUT_CH, K_TAPS),
                  ((0, CO_PAD - OUT_CH), (0, K_PAD - K_TAPS))).astype(jnp.bfloat16)
    b1m = jnp.pad(b1, (0, CO_PAD - OUT_CH)).reshape(CO_PAD, 1).astype(jnp.float32)
    # linear weight re-laid-out to the 16-channel-major feature order so that the pooled
    # output can be flattened for free (no slice / no transpose between the two kernels)
    w2m = jnp.pad(w2.T.reshape(OUT_CH, S, NUM_CLASSES),
                  ((0, CO_PAD - OUT_CH), (0, 0), (0, CLS_PAD - NUM_CLASSES)))
    w2m = w2m.reshape(FEAT_PAD, CLS_PAD).astype(jnp.bfloat16)            # (9216, 128)
    b2m = jnp.pad(b2, (0, CLS_PAD - NUM_CLASSES)).reshape(1, CLS_PAD).astype(jnp.float32)
    return w1m, b1m, w2m, b2m


def _batch_block(n, target=8):
    """Largest block <= target that divides n (batch axis never hits the (8,128) rule
    in kernel 1; kernel 2 uses its own lane-safe choice)."""
    nb = min(n, target)
    while n % nb:
        nb -= 1
    return nb


@jax.jit
def custom_1conv_forward(x, w1, b1, w2, b2):
    n = x.shape[0]
    w1m, b1m, w2m, b2m = _prep_params(w1, b1, w2, b2)
    patches = _make_pooled_patches(x)                        # (N, 4, 32, 576) bf16

    nb1 = _batch_block(n)
    bytes1 = (n * 4 * K_PAD * S * 2 + CO_PAD * K_PAD * 2 + CO_PAD * 4
              + n * CO_PAD * S * 2)
    pooled = pl.pallas_call(
        _conv_relu_pool_kernel,
        out_shape=jax.ShapeDtypeStruct((n, CO_PAD, S), jnp.bfloat16),
        grid=(n // nb1,),
        in_specs=[
            pl.BlockSpec((nb1, 4, K_PAD, S), lambda i: (i, 0, 0, 0)),
            pl.BlockSpec((CO_PAD, K_PAD), lambda i: (0, 0)),
            pl.BlockSpec((CO_PAD, 1), lambda i: (0, 0)),
        ],
        out_specs=pl.BlockSpec((nb1, CO_PAD, S), lambda i: (i, 0, 0)),
        compiler_params=pltpu.CompilerParams(
            dimension_semantics=("parallel",)),
        cost_estimate=pl.CostEstimate(
            flops=2 * n * 4 * CO_PAD * K_PAD * S,
            transcendentals=0,
            bytes_accessed=bytes1),
    )(patches, w1m, b1m)

    # Channel-major pooled output == PyTorch flatten(1) order -> free reshape, no transpose.
    feats = pooled.reshape(n, FEAT_PAD)                      # (N, 9216) bf16

    # Lane-safe batch block for the linear: 8-aligned when the grid has >1 step.
    nb2 = 8 if (n > 8 and n % 8 == 0) else n
    bytes2 = n * FEAT_PAD * 2 + FEAT_PAD * CLS_PAD * 2 + CLS_PAD * 4 + n * CLS_PAD * 4
    logits_p = pl.pallas_call(
        _linear_kernel,
        out_shape=jax.ShapeDtypeStruct((n, CLS_PAD), jnp.float32),
        grid=(n // nb2,),
        in_specs=[
            pl.BlockSpec((nb2, FEAT_PAD), lambda i: (i, 0)),
            pl.BlockSpec((FEAT_PAD, CLS_PAD), lambda i: (0, 0)),   # resident weight
            pl.BlockSpec((1, CLS_PAD), lambda i: (0, 0)),
        ],
        out_specs=pl.BlockSpec((nb2, CLS_PAD), lambda i: (i, 0)),
        compiler_params=pltpu.CompilerParams(
            dimension_semantics=("parallel",)),
        cost_estimate=pl.CostEstimate(
            flops=2 * n * FEAT_PAD * CLS_PAD,
            transcendentals=0,
            bytes_accessed=bytes2),
    )(feats, w2m, b2m)

    return logits_p[:, :NUM_CLASSES]


# ------------------------------ pure-JAX reference --------------------------------
def reference_forward(x, w1, b1, w2, b2):
    z = jax.lax.conv_general_dilated(
        x, w1, window_strides=(STRIDE, STRIDE), padding="VALID",
        dimension_numbers=("NCHW", "OIHW", "NCHW"))
    z = jnp.maximum(z + b1.reshape(1, -1, 1, 1), 0.0)
    z = jax.lax.reduce_window(
        z, -jnp.inf, jax.lax.max,
        window_dimensions=(1, 1, 2, 2), window_strides=(1, 1, 2, 2),
        padding="VALID")
    f = z.reshape(x.shape[0], -1)
    return f @ w2.T + b2


# ------------------------------------ main -----------------------------------------
if __name__ == "__main__":
    key = jax.random.PRNGKey(0)
    kx, kw1, kb1, kw2, kb2 = jax.random.split(key, 5)
    batch = 2
    x = jax.random.normal(kx, (batch, IN_CH, H, W), jnp.float32)
    w1 = jax.random.normal(kw1, (OUT_CH, IN_CH, KH, KW), jnp.float32) * 0.1
    b1 = jax.random.normal(kb1, (OUT_CH,), jnp.float32) * 0.1
    w2 = jax.random.normal(kw2, (NUM_CLASSES, FEAT), jnp.float32) * 0.02
    b2 = jax.random.normal(kb2, (NUM_CLASSES,), jnp.float32) * 0.02

    logits = custom_1conv_forward(x, w1, b1, w2, b2)
    jax.block_until_ready(logits)

    if logits.shape != (batch, NUM_CLASSES):
        raise SystemExit(f"bad output shape: {logits.shape}")

    ref = reference_forward(x, w1, b1, w2, b2)
    err = float(jnp.max(jnp.abs(logits - ref)))
    if err > 5e-2:
        raise SystemExit(f"mismatch vs pure-JAX reference: max abs err = {err}")

    print("KERNEL_OK")
</pallas_src>

<mosaic_0001>
module attributes {stable_mosaic.version = 11 : i64} {
  func.func @_conv_relu_pool_kernel(%arg0: i32, %arg1: memref<2x4x32x576xbf16, #tpu.memory_space<vmem>>, %arg2: memref<16x32xbf16, #tpu.memory_space<vmem>>, %arg3: memref<16x1xf32, #tpu.memory_space<vmem>>, %arg4: memref<2x16x576xbf16, #tpu.memory_space<vmem>>) attributes {dimension_semantics = [#tpu.dimension_semantics<parallel>], iteration_bounds = array<i64: 1>, scalar_prefetch = 0 : i64, scratch_operands = 0 : i64, tpu.core_type = #tpu.core_type<tc>, window_params = [{transform_indices = @transform_0, window_bounds = array<i64: 2, 4, 32, 576>}, {pipeline_mode = #tpu.pipeline_mode<synchronous>, transform_indices = @transform_1, window_bounds = array<i64: 16, 32>}, {pipeline_mode = #tpu.pipeline_mode<synchronous>, transform_indices = @transform_2, window_bounds = array<i64: 16, 1>}, {transform_indices = @transform_3, window_bounds = array<i64: 2, 16, 576>}]} {
    %c0 = arith.constant 0 : index
    %c0_0 = arith.constant 0 : index
    %0 = vector.load %arg2[%c0, %c0_0] : memref<16x32xbf16, #tpu.memory_space<vmem>>, vector<16x32xbf16>
    %c0_1 = arith.constant 0 : index
    %c0_2 = arith.constant 0 : index
    %1 = vector.load %arg3[%c0_1, %c0_2] : memref<16x1xf32, #tpu.memory_space<vmem>>, vector<16x1xf32>
    %c0_3 = arith.constant 0 : index
    %c0_4 = arith.constant 0 : index
    %c0_5 = arith.constant 0 : index
    %c0_6 = arith.constant 0 : index
    %2 = vector.load %arg1[%c0_3, %c0_4, %c0_5, %c0_6] : memref<2x4x32x576xbf16, #tpu.memory_space<vmem>>, vector<1x1x32x576xbf16>
    %3 = vector.shape_cast %2 : vector<1x1x32x576xbf16> to vector<32x576xbf16>
    %cst = arith.constant dense<0.000000e+00> : vector<16x576xf32>
    %4 = tpu.matmul %0, %3, %cst {dimension_numbers = #tpu.dot_dimension_numbers<[1], [0], [0], [1], [0, 0, 1, 1], [], []>} : vector<16x32xbf16>, vector<32x576xbf16>, vector<16x576xf32> -> vector<16x576xf32>
    %c0_7 = arith.constant 0 : index
    %c1 = arith.constant 1 : index
    %c0_8 = arith.constant 0 : index
    %c0_9 = arith.constant 0 : index
    %5 = vector.load %arg1[%c0_7, %c1, %c0_8, %c0_9] : memref<2x4x32x576xbf16, #tpu.memory_space<vmem>>, vector<1x1x32x576xbf16>
    %6 = vector.shape_cast %5 : vector<1x1x32x576xbf16> to vector<32x576xbf16>
    %cst_10 = arith.constant dense<0.000000e+00> : vector<16x576xf32>
    %7 = tpu.matmul %0, %6, %cst_10 {dimension_numbers = #tpu.dot_dimension_numbers<[1], [0], [0], [1], [0, 0, 1, 1], [], []>} : vector<16x32xbf16>, vector<32x576xbf16>, vector<16x576xf32> -> vector<16x576xf32>
    %8 = arith.maximumf %4, %7 : vector<16x576xf32>
    %c0_11 = arith.constant 0 : index
    %c2 = arith.constant 2 : index
    %c0_12 = arith.constant 0 : index
    %c0_13 = arith.constant 0 : index
    %9 = vector.load %arg1[%c0_11, %c2, %c0_12, %c0_13] : memref<2x4x32x576xbf16, #tpu.memory_space<vmem>>, vector<1x1x32x576xbf16>
    %10 = vector.shape_cast %9 : vector<1x1x32x576xbf16> to vector<32x576xbf16>
    %cst_14 = arith.constant dense<0.000000e+00> : vector<16x576xf32>
    %11 = tpu.matmul %0, %10, %cst_14 {dimension_numbers = #tpu.dot_dimension_numbers<[1], [0], [0], [1], [0, 0, 1, 1], [], []>} : vector<16x32xbf16>, vector<32x576xbf16>, vector<16x576xf32> -> vector<16x576xf32>
    %12 = arith.maximumf %8, %11 : vector<16x576xf32>
    %c0_15 = arith.constant 0 : index
    %c3 = arith.constant 3 : index
    %c0_16 = arith.constant 0 : index
    %c0_17 = arith.constant 0 : index
    %13 = vector.load %arg1[%c0_15, %c3, %c0_16, %c0_17] : memref<2x4x32x576xbf16, #tpu.memory_space<vmem>>, vector<1x1x32x576xbf16>
    %14 = vector.shape_cast %13 : vector<1x1x32x576xbf16> to vector<32x576xbf16>
    %cst_18 = arith.constant dense<0.000000e+00> : vector<16x576xf32>
    %15 = tpu.matmul %0, %14, %cst_18 {dimension_numbers = #tpu.dot_dimension_numbers<[1], [0], [0], [1], [0, 0, 1, 1], [], []>} : vector<16x32xbf16>, vector<32x576xbf16>, vector<16x576xf32> -> vector<16x576xf32>
    %16 = arith.maximumf %12, %15 : vector<16x576xf32>
    %17 = vector.broadcast %1 : vector<16x1xf32> to vector<16x576xf32>
    %18 = arith.addf %16, %17 : vector<16x576xf32>
    %cst_19 = arith.constant 0.000000e+00 : f32
    %19 = vector.broadcast %cst_19 : f32 to vector<16x576xf32>
    %20 = arith.maximumf %18, %19 : vector<16x576xf32>
    %21 = arith.truncf %20 : vector<16x576xf32> to vector<16x576xbf16>
    %c0_20 = arith.constant 0 : index
    %c0_21 = arith.constant 0 : index
    %c0_22 = arith.constant 0 : index
    %22 = vector.load %arg4[%c0_20, %c0_21, %c0_22] : memref<2x16x576xbf16, #tpu.memory_space<vmem>>, vector<1x16x576xbf16>
    %23 = vector.shape_cast %22 : vector<1x16x576xbf16> to vector<16x576xbf16>
    %24 = vector.shape_cast %21 : vector<16x576xbf16> to vector<1x16x576xbf16>
    tpu.vector_store %arg4[%c0_20, %c0_21, %c0_22], %24 {strides = array<i32>} : memref<2x16x576xbf16, #tpu.memory_space<vmem>>, vector<1x16x576xbf16>,
    %c1_23 = arith.constant 1 : index
    %c0_24 = arith.constant 0 : index
    %c0_25 = arith.constant 0 : index
    %c0_26 = arith.constant 0 : index
    %25 = vector.load %arg1[%c1_23, %c0_24, %c0_25, %c0_26] : memref<2x4x32x576xbf16, #tpu.memory_space<vmem>>, vector<1x1x32x576xbf16>
    %26 = vector.shape_cast %25 : vector<1x1x32x576xbf16> to vector<32x576xbf16>
    %cst_27 = arith.constant dense<0.000000e+00> : vector<16x576xf32>
    %27 = tpu.matmul %0, %26, %cst_27 {dimension_numbers = #tpu.dot_dimension_numbers<[1], [0], [0], [1], [0, 0, 1, 1], [], []>} : vector<16x32xbf16>, vector<32x576xbf16>, vector<16x576xf32> -> vector<16x576xf32>
    %c1_28 = arith.constant 1 : index
    %c1_29 = arith.constant 1 : index
    %c0_30 = arith.constant 0 : index
    %c0_31 = arith.constant 0 : index
    %28 = vector.load %arg1[%c1_28, %c1_29, %c0_30, %c0_31] : memref<2x4x32x576xbf16, #tpu.memory_space<vmem>>, vector<1x1x32x576xbf16>
    %29 = vector.shape_cast %28 : vector<1x1x32x576xbf16> to vector<32x576xbf16>
    %cst_32 = arith.constant dense<0.000000e+00> : vector<16x576xf32>
    %30 = tpu.matmul %0, %29, %cst_32 {dimension_numbers = #tpu.dot_dimension_numbers<[1], [0], [0], [1], [0, 0, 1, 1], [], []>} : vector<16x32xbf16>, vector<32x576xbf16>, vector<16x576xf32> -> vector<16x576xf32>
    %31 = arith.maximumf %27, %30 : vector<16x576xf32>
    %c1_33 = arith.constant 1 : index
    %c2_34 = arith.constant 2 : index
    %c0_35 = arith.constant 0 : index
    %c0_36 = arith.constant 0 : index
    %32 = vector.load %arg1[%c1_33, %c2_34, %c0_35, %c0_36] : memref<2x4x32x576xbf16, #tpu.memory_space<vmem>>, vector<1x1x32x576xbf16>
    %33 = vector.shape_cast %32 : vector<1x1x32x576xbf16> to vector<32x576xbf16>
    %cst_37 = arith.constant dense<0.000000e+00> : vector<16x576xf32>
    %34 = tpu.matmul %0, %33, %cst_37 {dimension_numbers = #tpu.dot_dimension_numbers<[1], [0], [0], [1], [0, 0, 1, 1], [], []>} : vector<16x32xbf16>, vector<32x576xbf16>, vector<16x576xf32> -> vector<16x576xf32>
    %35 = arith.maximumf %31, %34 : vector<16x576xf32>
    %c1_38 = arith.constant 1 : index
    %c3_39 = arith.constant 3 : index
    %c0_40 = arith.constant 0 : index
    %c0_41 = arith.constant 0 : index
    %36 = vector.load %arg1[%c1_38, %c3_39, %c0_40, %c0_41] : memref<2x4x32x576xbf16, #tpu.memory_space<vmem>>, vector<1x1x32x576xbf16>
    %37 = vector.shape_cast %36 : vector<1x1x32x576xbf16> to vector<32x576xbf16>
    %cst_42 = arith.constant dense<0.000000e+00> : vector<16x576xf32>
    %38 = tpu.matmul %0, %37, %cst_42 {dimension_numbers = #tpu.dot_dimension_numbers<[1], [0], [0], [1], [0, 0, 1, 1], [], []>} : vector<16x32xbf16>, vector<32x576xbf16>, vector<16x576xf32> -> vector<16x576xf32>
    %39 = arith.maximumf %35, %38 : vector<16x576xf32>
    %40 = vector.broadcast %1 : vector<16x1xf32> to vector<16x576xf32>
    %41 = arith.addf %39, %40 : vector<16x576xf32>
    %cst_43 = arith.constant 0.000000e+00 : f32
    %42 = vector.broadcast %cst_43 : f32 to vector<16x576xf32>
    %43 = arith.maximumf %41, %42 : vector<16x576xf32>
    %44 = arith.truncf %43 : vector<16x576xf32> to vector<16x576xbf16>
    %c1_44 = arith.constant 1 : index
    %c0_45 = arith.constant 0 : index
    %c0_46 = arith.constant 0 : index
    %45 = vector.load %arg4[%c1_44, %c0_45, %c0_46] : memref<2x16x576xbf16, #tpu.memory_space<vmem>>, vector<1x16x576xbf16>
    %46 = vector.shape_cast %45 : vector<1x16x576xbf16> to vector<16x576xbf16>
    %47 = vector.shape_cast %44 : vector<16x576xbf16> to vector<1x16x576xbf16>
    tpu.vector_store %arg4[%c1_44, %c0_45, %c0_46], %47 {strides = array<i32>} : memref<2x16x576xbf16, #tpu.memory_space<vmem>>, vector<1x16x576xbf16>,
    return
  }
  func.func @transform_0(%arg0: i32) -> (i32, i32, i32, i32) {
    %c0_i32 = arith.constant 0 : i32
    %c0_i32_0 = arith.constant 0 : i32
    %c0_i32_1 = arith.constant 0 : i32
    %c0_i32_2 = arith.constant 0 : i32
    return %arg0, %c0_i32, %c0_i32_0, %c0_i32_1 : i32, i32, i32, i32
  }
  func.func @transform_1(%arg0: i32) -> (i32, i32) {
    %c0_i32 = arith.constant 0 : i32
    %c0_i32_0 = arith.constant 0 : i32
    %c0_i32_1 = arith.constant 0 : i32
    return %c0_i32, %c0_i32_0 : i32, i32
  }
  func.func @transform_2(%arg0: i32) -> (i32, i32) {
    %c0_i32 = arith.constant 0 : i32
    %c0_i32_0 = arith.constant 0 : i32
    %c0_i32_1 = arith.constant 0 : i32
    return %c0_i32, %c0_i32_0 : i32, i32
  }
  func.func @transform_3(%arg0: i32) -> (i32, i32, i32) {
    %c0_i32 = arith.constant 0 : i32
    %c0_i32_0 = arith.constant 0 : i32
    %c0_i32_1 = arith.constant 0 : i32
    return %arg0, %c0_i32, %c0_i32_0 : i32, i32, i32
  }
}

module attributes {stable_mosaic.version = 11 : i64} {
  func.func @_linear_kernel(%arg0: i32, %arg1: memref<2x9216xbf16, #tpu.memory_space<vmem>>, %arg2: memref<9216x128xbf16, #tpu.memory_space<vmem>>, %arg3: memref<1x128xf32, #tpu.memory_space<vmem>>, %arg4: memref<2x128xf32, #tpu.memory_space<vmem>>) attributes {dimension_semantics = [#tpu.dimension_semantics<parallel>], iteration_bounds = array<i64: 1>, scalar_prefetch = 0 : i64, scratch_operands = 0 : i64, tpu.core_type = #tpu.core_type<tc>, window_params = [{transform_indices = @transform_0, window_bounds = array<i64: 2, 9216>}, {pipeline_mode = #tpu.pipeline_mode<synchronous>, transform_indices = @transform_1, window_bounds = array<i64: 9216, 128>}, {pipeline_mode = #tpu.pipeline_mode<synchronous>, transform_indices = @transform_2, window_bounds = array<i64: 1, 128>}, {transform_indices = @transform_3, window_bounds = array<i64: 2, 128>}]} {
    %c0 = arith.constant 0 : index
    %c0_0 = arith.constant 0 : index
    %0 = vector.load %arg1[%c0, %c0_0] : memref<2x9216xbf16, #tpu.memory_space<vmem>>, vector<2x9216xbf16>
    %c0_1 = arith.constant 0 : index
    %c0_2 = arith.constant 0 : index
    %1 = vector.load %arg2[%c0_1, %c0_2] : memref<9216x128xbf16, #tpu.memory_space<vmem>>, vector<9216x128xbf16>
    %cst = arith.constant dense<0.000000e+00> : vector<2x128xf32>
    %2 = tpu.matmul %0, %1, %cst {dimension_numbers = #tpu.dot_dimension_numbers<[1], [0], [0], [1], [0, 0, 1, 1], [], []>} : vector<2x9216xbf16>, vector<9216x128xbf16>, vector<2x128xf32> -> vector<2x128xf32>
    %c0_3 = arith.constant 0 : index
    %c0_4 = arith.constant 0 : index
    %3 = vector.load %arg3[%c0_3, %c0_4] : memref<1x128xf32, #tpu.memory_space<vmem>>, vector<1x128xf32>
    %4 = vector.broadcast %3 : vector<1x128xf32> to vector<2x128xf32>
    %5 = arith.addf %2, %4 : vector<2x128xf32>
    %c0_5 = arith.constant 0 : index
    %c0_6 = arith.constant 0 : index
    %6 = vector.load %arg4[%c0_5, %c0_6] : memref<2x128xf32, #tpu.memory_space<vmem>>, vector<2x128xf32>
    tpu.vector_store %arg4[%c0_5, %c0_6], %5 {strides = array<i32>} : memref<2x128xf32, #tpu.memory_space<vmem>>, vector<2x128xf32>,
    return
  }
  func.func @transform_0(%arg0: i32) -> (i32, i32) {
    %c0_i32 = arith.constant 0 : i32
    %c0_i32_0 = arith.constant 0 : i32
    return %arg0, %c0_i32 : i32, i32
  }
  func.func @transform_1(%arg0: i32) -> (i32, i32) {
    %c0_i32 = arith.constant 0 : i32
    %c0_i32_0 = arith.constant 0 : i32
    %c0_i32_1 = arith.constant 0 : i32
    return %c0_i32, %c0_i32_0 : i32, i32
  }
  func.func @transform_2(%arg0: i32) -> (i32, i32) {
    %c0_i32 = arith.constant 0 : i32
    %c0_i32_0 = arith.constant 0 : i32
    %c0_i32_1 = arith.constant 0 : i32
    return %c0_i32, %c0_i32_0 : i32, i32
  }
  func.func @transform_3(%arg0: i32) -> (i32, i32) {
    %c0_i32 = arith.constant 0 : i32
    %c0_i32_0 = arith.constant 0 : i32
    return %arg0, %c0_i32 : i32, i32
  }
}

</mosaic_0001>

<bundles_post_ra>
// kernel: custom_1conv_forward.2
= control target key start
LH: loop header
LB: loop body
LE: loop exit
PB: predicated region body
PF: predicated region fallthrough
CT: control target
= control target key end

     0   :  { %vm88_vm0 = vcmask 261120   ;;  %vm635_vm1 = vcmask 519168   ;;  %s2464_s0 = inlined_call_operand.vmem [shape: bf16[2,4,32,576], index: 0, kind: input, shape index: {}]   ;;  %s2465_s1 = inlined_call_operand.vmem [shape: bf16[16,32], index: 1, kind: input, shape index: {}]   ;;  %s2466_s2 = inlined_call_operand.vmem [shape: f32[16,1], index: 2, kind: input, shape index: {}]   ;;  %s2467_s3 = inlined_call_operand.vmem [shape: bf16[2,16,576], index: 3, kind: output, shape index: {}]  }
   0x1   :  { %v1273_v0 = vld [vmem:[%s2464_s0 + $0x28] sm:$0xf]  ;;  %v1709_v1 = vld [vmem:[%s2464_s0 + $0x38] sm:$0xf0]  ;;  %v1707_v2 = vld [vmem:[%s2464_s0 + $0x2c] sm:$0xf] }
   0x2   :  { %v1274_v3 = vor.u32 %v1709_v1, %v1273_v0  ;;  %v1275_v4 = vld [vmem:[%s2464_s0 + $0x3c] sm:$0xf0]  ;;  %v1281_v5 = vld [vmem:[%s2464_s0 + $0x30] sm:$0xf]  ;;  %v1710_v6 = vld [vmem:[%s2464_s0 + $0x40] sm:$0xf0] }
   0x3   :  { %v1278_v7 = vor.u32 %v1707_v2, %v1275_v4  ;;  %v1282_v8 = vor.u32 %v1710_v6, %v1281_v5  ;;  %v1708_v9 = vld [vmem:[%s2464_s0 + $0x34] sm:$0xf]  ;;  %v1283_v10 = vld [vmem:[%s2464_s0 + $0x44] sm:$0xf0]  ;;  %v1253_v11 = vld [vmem:[%s2464_s0] sm:$0xf] }
   0x4   :  { %98 = vmatpush.bf16.msra.mxu0 %v1274_v3  ;;  %v1286_v12 = vor.u32 %v1708_v9, %v1283_v10  ;;  %v1704_v13 = vld [vmem:[%s2464_s0 + $0x10] sm:$0xf0]  ;;  %v1702_v14 = vld [vmem:[%s2464_s0 + $0x4] sm:$0xf]  ;;  %v1255_v15 = vld [vmem:[%s2464_s0 + $0x14] sm:$0xf0] }
   0x5   :  { %112 = vmatpush.bf16.msra.mxu1 %v1278_v7  ;;  %126 = vmatpush.bf16.msra.mxu2 %v1282_v8  ;;  %v1254_v16 = vor.u32 %v1704_v13, %v1253_v11  ;;  %v1258_v17 = vor.u32 %v1702_v14, %v1255_v15  ;;  %v1261_v18 = vld [vmem:[%s2464_s0 + $0x8] sm:$0xf]  ;;  %v1705_v19 = vld [vmem:[%s2464_s0 + $0x18] sm:$0xf0]  ;;  %v1703_v20 = vld [vmem:[%s2464_s0 + $0xc] sm:$0xf] }
   0x6   :  { %140 = vmatpush.bf16.msra.mxu3 %v1286_v12  ;;  %v1262_v21 = vor.u32 %v1705_v19, %v1261_v18  ;;  %v1263_v22 = vld [vmem:[%s2464_s0 + $0x1c] sm:$0xf0]  ;;  %v1717_v24 = vld [vmem:[%s2464_s0 + $0x7c] sm:$0xf]  ;;  %v1332_v26 = vld [vmem:[%s2464_s0 + $0x8c] sm:$0xf0] }
   0x7   :  { %v1856_v23 = vld [vmem:[%s2465_s1] sm:$0xff]  ;;  %v1266_v25 = vor.u32 %v1703_v20, %v1263_v22  ;;  %v1720_v28 = vld [vmem:[%s2464_s0 + $0x90] sm:$0xf0]  ;;  %v1335_v29 = vor.u32 %v1717_v24, %v1332_v26  ;;  %v1289_v31 = vld [vmem:[%s2464_s0 + $0x38] sm:$0xf] }
   0x8   :  { %v1338_v27 = vld [vmem:[%s2464_s0 + $0x80] sm:$0xf]  ;;  %99 = vmatpush.bf16.msra.mxu0 %v1254_v16  ;;  %v1711_v32 = vld [vmem:[%s2464_s0 + $0x48] sm:$0xf0]  ;;  %v1330_v33 = vld [vmem:[%s2464_s0 + $0x78] sm:$0xf] }
   0x9   :  { %v1339_v30 = vor.u32 %v1720_v28, %v1338_v27  ;;  %113 = vmatpush.bf16.msra.mxu1 %v1258_v17  ;;  %127 = vmatpush.bf16.msra.mxu2 %v1262_v21  ;;  %v1290_v34 = vor.u32 %v1711_v32, %v1289_v31  ;;  %v1719_v35 = vld [vmem:[%s2464_s0 + $0x88] sm:$0xf0]  ;;  %v1712_v36 = vld [vmem:[%s2464_s0 + $0x54] sm:$0xf]  ;;  %v1312_v37 = vld [vmem:[%s2464_s0 + $0x64] sm:$0xf0] }
   0xa   :  { %141 = vmatpush.bf16.msra.mxu3 %v1266_v25  ;;  %v1331_v38 = vor.u32 %v1719_v35, %v1330_v33  ;;  %v1315_v39 = vor.u32 %v1712_v36, %v1312_v37  ;;  %v1318_v40 = vld [vmem:[%s2464_s0 + $0x58] sm:$0xf]  ;;  %v1715_v41 = vld [vmem:[%s2464_s0 + $0x68] sm:$0xf0]  ;;  %v1269_v42 = vld [vmem:[%s2464_s0 + $0x10] sm:$0xf] }
   0xb   :  { %1291 = vmatmul.msk.bf16.vlgmr.msra.gmra.mxu0 %vm88_vm0, %v1856_v23  ;;  %v1319_v43 = vor.u32 %v1715_v41, %v1318_v40  ;;  %v1706_v44 = vld [vmem:[%s2464_s0 + $0x20] sm:$0xf0]  ;;  %v1310_v45 = vld [vmem:[%s2464_s0 + $0x50] sm:$0xf]  ;;  %v1387_v47 = vld [vmem:[%s2464_s0 + $0xc8] sm:$0xf] }
   0xc   :  { %v1714_v46 = vld [vmem:[%s2464_s0 + $0x60] sm:$0xf0]  ;;  %1292 = vmatmul.msk.bf16.vlgmr.msra.gmra.mxu1 %vm88_vm0, %v1856_v23  ;;  %1293 = vmatmul.msk.bf16.vlgmr.msra.gmra.mxu2 %vm88_vm0, %v1856_v23  ;;  %v1729_v48 = vld [vmem:[%s2464_s0 + $0xd8] sm:$0xf0]  ;;  %v1727_v49 = vld [vmem:[%s2464_s0 + $0xcc] sm:$0xf]  ;;  %v1270_v50 = vor.u32 %v1706_v44, %v1269_v42 }
   0xd   :  { %247 = vmatpush.bf16.msrb.mxu2 %v1335_v29  ;;  %1294 = vmatmul.msk.bf16.vlgmr.msra.gmra.mxu3 %vm88_vm0, %v1856_v23  ;;  %v1388_v51 = vor.u32 %v1729_v48, %v1387_v47  ;;  %v1389_v52 = vld [vmem:[%s2464_s0 + $0xdc] sm:$0xf0]  ;;  %v1718_v53 = vld [vmem:[%s2464_s0 + $0x84] sm:$0xf]  ;;  %v1340_v54 = vld [vmem:[%s2464_s0 + $0x94] sm:$0xf0]  ;;  %v1311_v55 = vor.u32 %v1714_v46, %v1310_v45 }
   0xe   :  { %261 = vmatpush.bf16.msrb.mxu3 %v1339_v30  ;;  %154 = vmatpush.bf16.msrb.mxu0 %v1290_v34  ;;  %v1392_v56 = vor.u32 %v1727_v49, %v1389_v52  ;;  %v1343_v57 = vor.u32 %v1718_v53, %v1340_v54  ;;  %v1346_v58 = vld [vmem:[%s2464_s0 + $0x88] sm:$0xf]  ;;  %v1721_v59 = vld [vmem:[%s2464_s0 + $0x98] sm:$0xf0]  ;;  %v1367_v60 = vld [vmem:[%s2464_s0 + $0xa0] sm:$0xf] }
   0xf   :  { %233 = vmatpush.bf16.msrb.mxu1 %v1331_v38  ;;  %v1347_v61 = vor.u32 %v1721_v59, %v1346_v58  ;;  %v1724_v62 = vld [vmem:[%s2464_s0 + $0xb0] sm:$0xf0]  ;;  %v1722_v63 = vld [vmem:[%s2464_s0 + $0xa4] sm:$0xf]  ;;  %v1369_v0 = vld [vmem:[%s2464_s0 + $0xb4] sm:$0xf0] }
  0x10   :  { %v1368_v1 = vor.u32 %v1724_v62, %v1367_v60  ;;  %v1372_v2 = vor.u32 %v1722_v63, %v1369_v0  ;;  %v1713_v3 = vld [vmem:[%s2464_s0 + $0x5c] sm:$0xf]  ;;  %v1320_v4 = vld [vmem:[%s2464_s0 + $0x6c] sm:$0xf0]  ;;  %v1326_v5 = vld [vmem:[%s2464_s0 + $0x60] sm:$0xf] }
  0x11   :  { %248 = vmatpush.bf16.msrb.mxu2 %v1315_v39  ;;  %v1716_v6 = vld [vmem:[%s2464_s0 + $0x70] sm:$0xf0]  ;;  %v1323_v7 = vor.u32 %v1713_v3, %v1320_v4  ;;  %v1403_v9 = vld [vmem:[%s2464_s0 + $0xd8] sm:$0xf]  ;;  %v1731_v10 = vld [vmem:[%s2464_s0 + $0xe8] sm:$0xf0] }
  0x12   :  { %262 = vmatpush.bf16.msrb.mxu3 %v1319_v43  ;;  %155 = vmatpush.bf16.msrb.mxu0 %v1270_v50  ;;  %v1327_v8 = vor.u32 %v1716_v6, %v1326_v5  ;;  %v1444_v11 = vld [vmem:[%s2464_s0 + $0x118] sm:$0xf]  ;;  %v1739_v12 = vld [vmem:[%s2464_s0 + $0x128] sm:$0xf0]  ;;  %v1395_v13 = vld [vmem:[%s2464_s0 + $0xd0] sm:$0xf]  ;;  %v1404_v17 = vor.u32 %v1731_v10, %v1403_v9 }
  0x13   :  { %234 = vmatpush.bf16.msrb.mxu1 %v1311_v55  ;;  %v1730_v14 = vld [vmem:[%s2464_s0 + $0xe0] sm:$0xf0]  ;;  %v1728_v15 = vld [vmem:[%s2464_s0 + $0xd4] sm:$0xf]  ;;  %v1397_v16 = vld [vmem:[%s2464_s0 + $0xe4] sm:$0xf0]  ;;  %v1445_v18 = vor.u32 %v1739_v12, %v1444_v11 }
  0x14   :  { %v1396_v19 = vor.u32 %v1730_v14, %v1395_v13  ;;  %v1383_v20 = vld [vmem:[%s2464_s0 + $0xb0] sm:$0xf]  ;;  %v1726_v21 = vld [vmem:[%s2464_s0 + $0xc0] sm:$0xf0]  ;;  %v1400_v24 = vor.u32 %v1728_v15, %v1397_v16  ;;  %v1375_v26 = vld [vmem:[%s2464_s0 + $0xa8] sm:$0xf] }
  0x15   :  { %378 = vmatpush.bf16.msra.mxu2 %v1388_v51  ;;  %v1424_v22 = vld [vmem:[%s2464_s0 + $0xf0] sm:$0xf]  ;;  %v1734_v25 = vld [vmem:[%s2464_s0 + $0x100] sm:$0xf0]  ;;  %v1725_v27 = vld [vmem:[%s2464_s0 + $0xb8] sm:$0xf0]  ;;  %v1384_v30 = vor.u32 %v1726_v21, %v1383_v20 }
  0x16   :  { %392 = vmatpush.bf16.msra.mxu3 %v1392_v56  ;;  %275 = vmatpush.bf16.msra.mxu0 %v1343_v57  ;;  %v1723_v28 = vld [vmem:[%s2464_s0 + $0xac] sm:$0xf]  ;;  %v1377_v29 = vld [vmem:[%s2464_s0 + $0xbc] sm:$0xf0]  ;;  %v1425_v31 = vor.u32 %v1734_v25, %v1424_v22  ;;  %v1376_v32 = vor.u32 %v1725_v27, %v1375_v26  ;;  %v1738_v34 = vld [vmem:[%s2464_s0 + $0x124] sm:$0xf] }
  0x17   :  { %289 = vmatpush.bf16.msra.mxu1 %v1347_v61  ;;  %v1380_v33 = vor.u32 %v1723_v28, %v1377_v29  ;;  %v1454_v35 = vld [vmem:[%s2464_s0 + $0x134] sm:$0xf0]  ;;  %v1460_v36 = vld [vmem:[%s2464_s0 + $0x128] sm:$0xf]  ;;  %v1741_v37 = vld [vmem:[%s2464_s0 + $0x138] sm:$0xf0] }
  0x18   :  { %v1737_v38 = vld [vmem:[%s2464_s0 + $0x11c] sm:$0xf]  ;;  %v1446_v39 = vld [vmem:[%s2464_s0 + $0x12c] sm:$0xf0]  ;;  %v1452_v40 = vld [vmem:[%s2464_s0 + $0x120] sm:$0xf]  ;;  %v1457_v42 = vor.u32 %v1738_v34, %v1454_v35  ;;  %v1461_v43 = vor.u32 %v1741_v37, %v1460_v36 }
  0x19   :  { %379 = vmatpush.bf16.msra.mxu2 %v1368_v1  ;;  %v1740_v41 = vld [vmem:[%s2464_s0 + $0x130] sm:$0xf0]  ;;  %v1449_v44 = vor.u32 %v1737_v38, %v1446_v39  ;;  %v1733_v45 = vld [vmem:[%s2464_s0 + $0xfc] sm:$0xf]  ;;  %v1434_v46 = vld [vmem:[%s2464_s0 + $0x10c] sm:$0xf0] }
  0x1a   :  { %393 = vmatpush.bf16.msra.mxu3 %v1372_v2  ;;  %276 = vmatpush.bf16.msra.mxu0 %v1323_v7  ;;  %v1440_v47 = vld [vmem:[%s2464_s0 + $0x100] sm:$0xf]  ;;  %v1453_v48 = vor.u32 %v1740_v41, %v1452_v40  ;;  %v1736_v49 = vld [vmem:[%s2464_s0 + $0x110] sm:$0xf0]  ;;  %v1426_v51 = vld [vmem:[%s2464_s0 + $0x104] sm:$0xf0]  ;;  %v1437_v54 = vor.u32 %v1733_v45, %v1434_v46 }
  0x1b   :  { %290 = vmatpush.bf16.msra.mxu1 %v1327_v8  ;;  %1295 = vmatmul.msk.bf16.vlgmr.msrb.gmra.mxu0 %vm88_vm0, %v1856_v23  ;;  %v1732_v50 = vld [vmem:[%s2464_s0 + $0xf4] sm:$0xf]  ;;  %v1432_v52 = vld [vmem:[%s2464_s0 + $0xf8] sm:$0xf]  ;;  %v1735_v53 = vld [vmem:[%s2464_s0 + $0x108] sm:$0xf0]  ;;  %v1441_v55 = vor.u32 %v1736_v49, %v1440_v47 }
  0x1c   :  { %1348 = vmatmul.msk.bf16.vlgmr.msrb.gmra.mxu1 %vm88_vm0, %v1856_v23  ;;  %1349 = vmatmul.msk.bf16.vlgmr.msrb.gmra.mxu2 %vm88_vm0, %v1856_v23  ;;  %v1429_v56 = vor.u32 %v1732_v50, %v1426_v51  ;;  %v17_v57 = vld [vmem:[%s2466_s2] sm:$0xff]  ;;  %v1433_v58 = vor.u32 %v1735_v53, %v1432_v52  ;;  %v1784_v59 = vmov 0   ;;  %v18_v60 = vld [vmem:[%s2466_s2 + $0x8] sm:$0xff]  ;;  %v1509_v61 = vld [vmem:[%s2464_s0 + $0x170] sm:$0xf] }
  0x1d   :  { %1350 = vmatmul.msk.bf16.vlgmr.msrb.gmra.mxu3 %vm88_vm0, %v1856_v23  ;;  %434 = vmatpush.bf16.msrb.mxu2 %v1404_v17  ;;  %v1750_v62 = vld [vmem:[%s2464_s0 + $0x180] sm:$0xf0]  ;;  %v1748_v63 = vld [vmem:[%s2464_s0 + $0x174] sm:$0xf]  ;;  %v1511_v0 = vld [vmem:[%s2464_s0 + $0x184] sm:$0xf0] }
  0x1e   :  { %523 = vmatpush.bf16.msrb.mxu3 %v1445_v18  ;;  %406 = vmatpush.bf16.msrb.mxu0 %v1396_v19  ;;  %v1501_v1 = vld [vmem:[%s2464_s0 + $0x168] sm:$0xf]  ;;  %v1749_v2 = vld [vmem:[%s2464_s0 + $0x178] sm:$0xf0]  ;;  %v1747_v3 = vld [vmem:[%s2464_s0 + $0x16c] sm:$0xf]  ;;  %v1510_v5 = vor.u32 %v1750_v62, %v1509_v61  ;;  %v1514_v6 = vor.u32 %v1748_v63, %v1511_v0 }
  0x1f   :  { %420 = vmatpush.bf16.msrb.mxu1 %v1400_v24  ;;  %1783 = vset.pattern.permute.xlu0 %v1784_v59  ;;  %v1503_v4 = vld [vmem:[%s2464_s0 + $0x17c] sm:$0xf0]  ;;  %v1502_v7 = vor.u32 %v1749_v2, %v1501_v1  ;;  %v1489_v8 = vld [vmem:[%s2464_s0 + $0x148] sm:$0xf]  ;;  %v1745_v9 = vld [vmem:[%s2464_s0 + $0x158] sm:$0xf0] }
  0x20   :  { %599 = vperm.xlu0 %1783, %v17_v57   ;;  %v1743_v10 = vld [vmem:[%s2464_s0 + $0x14c] sm:$0xf]  ;;  %v1506_v11 = vor.u32 %v1747_v3, %v1503_v4  ;;  %v1491_v12 = vld [vmem:[%s2464_s0 + $0x15c] sm:$0xf0]  ;;  %v1744_v14 = vld [vmem:[%s2464_s0 + $0x150] sm:$0xf0]  ;;  %v1490_v17 = vor.u32 %v1745_v9, %v1489_v8 }
  0x21   :  { %435 = vmatpush.bf16.msrb.mxu2 %v1384_v30  ;;  %v1481_v13 = vld [vmem:[%s2464_s0 + $0x140] sm:$0xf]  ;;  %v1742_v15 = vld [vmem:[%s2464_s0 + $0x144] sm:$0xf]  ;;  %v1483_v16 = vld [vmem:[%s2464_s0 + $0x154] sm:$0xf0]  ;;  %v1494_v18 = vor.u32 %v1743_v10, %v1491_v12 }
  0x22   :  { %524 = vmatpush.bf16.msrb.mxu3 %v1425_v31  ;;  %407 = vmatpush.bf16.msrb.mxu0 %v1376_v32  ;;  %v1482_v19 = vor.u32 %v1744_v14, %v1481_v13  ;;  %v1486_v20 = vor.u32 %v1742_v15, %v1483_v16  ;;  %v1757_v21 = vld [vmem:[%s2464_s0 + $0x1bc] sm:$0xf]  ;;  %v1560_v22 = vld [vmem:[%s2464_s0 + $0x1cc] sm:$0xf0]  ;;  %v1566_v24 = vld [vmem:[%s2464_s0 + $0x1c0] sm:$0xf] }
  0x23   :  { %421 = vmatpush.bf16.msrb.mxu1 %v1380_v33  ;;  %v1760_v25 = vld [vmem:[%s2464_s0 + $0x1d0] sm:$0xf0]  ;;  %v1517_v26 = vld [vmem:[%s2464_s0 + $0x178] sm:$0xf]  ;;  %v1751_v27 = vld [vmem:[%s2464_s0 + $0x188] sm:$0xf0]  ;;  %v1563_v30 = vor.u32 %v1757_v21, %v1560_v22 }
  0x24   :  { %v1558_v28 = vld [vmem:[%s2464_s0 + $0x1b8] sm:$0xf]  ;;  %v1759_v29 = vld [vmem:[%s2464_s0 + $0x1c8] sm:$0xf0]  ;;  %v1567_v31 = vor.u32 %v1760_v25, %v1566_v24  ;;  %v1518_v32 = vor.u32 %v1751_v27, %v1517_v26  ;;  %v1752_v33 = vld [vmem:[%s2464_s0 + $0x194] sm:$0xf] }
  0x25   :  { %v1540_v34 = vld [vmem:[%s2464_s0 + $0x1a4] sm:$0xf0]  ;;  %v1546_v35 = vld [vmem:[%s2464_s0 + $0x198] sm:$0xf]  ;;  %v1559_v36 = vor.u32 %v1759_v29, %v1558_v28  ;;  %v1755_v37 = vld [vmem:[%s2464_s0 + $0x1a8] sm:$0xf0] }
  0x26   :  { %v1497_v38 = vld [vmem:[%s2464_s0 + $0x150] sm:$0xf]  ;;  %v1746_v39 = vld [vmem:[%s2464_s0 + $0x160] sm:$0xf0]  ;;  %v1615_v46 = vld [vmem:[%s2464_s0 + $0x208] sm:$0xf] }
  0x27   :  { %v1538_v40 = vld [vmem:[%s2464_s0 + $0x190] sm:$0xf]  ;;  %v1754_v41 = vld [vmem:[%s2464_s0 + $0x1a0] sm:$0xf0]  ;;  %v1769_v47 = vld [vmem:[%s2464_s0 + $0x218] sm:$0xf0] }
  0x28   :  { %604 = vperm.xlu0 %1783, %v18_v60   ;;  %v1539_v45 = vor.u32 %v1754_v41, %v1538_v40  ;;  %v1617_v49 = vld [vmem:[%s2464_s0 + $0x21c] sm:$0xf0]  ;;  %v1758_v50 = vld [vmem:[%s2464_s0 + $0x1c4] sm:$0xf]  ;;  %v1568_v51 = vld [vmem:[%s2464_s0 + $0x1d4] sm:$0xf0] }
  0x29   :  { %v1574_v52 = vld [vmem:[%s2464_s0 + $0x1c8] sm:$0xf]  ;;  %v1761_v53 = vld [vmem:[%s2464_s0 + $0x1d8] sm:$0xf0]  ;;  %v1595_v57 = vld [vmem:[%s2464_s0 + $0x1e0] sm:$0xf] }
  0x2a   :  { %v1762_v59 = vld [vmem:[%s2464_s0 + $0x1e4] sm:$0xf]  ;;  %v1575_v60 = vor.u32 %v1761_v53, %v1574_v52  ;;  %v1597_v61 = vld [vmem:[%s2464_s0 + $0x1f4] sm:$0xf0]  ;;  %v1753_v62 = vld [vmem:[%s2464_s0 + $0x19c] sm:$0xf] }
  0x2b   :  { %1351 = vmatmul.msk.bf16.vlgmr.msra.gmra.mxu0 %vm88_vm0, %v1856_v23  ;;  %v1548_v63 = vld [vmem:[%s2464_s0 + $0x1ac] sm:$0xf0]  ;;  %v1554_v0 = vld [vmem:[%s2464_s0 + $0x1a0] sm:$0xf]  ;;  %v1756_v1 = vld [vmem:[%s2464_s0 + $0x1b0] sm:$0xf0]  ;;  %v1600_v3 = vor.u32 %v1762_v59, %v1597_v61 }
  0x2c   :  { %1352 = vmatmul.msk.bf16.vlgmr.msra.gmra.mxu1 %vm88_vm0, %v1856_v23  ;;  %1405 = vmatmul.msk.bf16.vlgmr.msra.gmra.mxu2 %vm88_vm0, %v1856_v23  ;;  %v1551_v4 = vor.u32 %v1753_v62, %v1548_v63  ;;  %v1672_v8 = vld [vmem:[%s2464_s0 + $0x258] sm:$0xf]  ;;  %v1779_v9 = vld [vmem:[%s2464_s0 + $0x268] sm:$0xf0]  ;;  %v1623_v10 = vld [vmem:[%s2464_s0 + $0x210] sm:$0xf] }
  0x2d   :  { %1406 = vmatmul.msk.bf16.vlgmr.msra.gmra.mxu3 %vm88_vm0, %v1856_v23  ;;  %565 = vmatpush.bf16.msra.mxu2 %v1457_v42  ;;  %v1543_v42 = vor.u32 %v1752_v33, %v1540_v34  ;;  %v1768_v12 = vld [vmem:[%s2464_s0 + $0x214] sm:$0xf]  ;;  %v1625_v13 = vld [vmem:[%s2464_s0 + $0x224] sm:$0xf0]  ;;  %v1673_v15 = vor.u32 %v1779_v9, %v1672_v8  ;;  %v1774_v21 = vld [vmem:[%s2464_s0 + $0x240] sm:$0xf0] }
  0x2e   :  { %579 = vmatpush.bf16.msra.mxu3 %v1461_v43  ;;  %537 = vmatpush.bf16.msra.mxu0 %v1449_v44  ;;  %v1547_v43 = vor.u32 %v1755_v37, %v1546_v35  ;;  %v1498_v44 = vor.u32 %v1746_v39, %v1497_v38  ;;  %v1603_v22 = vld [vmem:[%s2464_s0 + $0x1e8] sm:$0xf]  ;;  %v1765_v24 = vld [vmem:[%s2464_s0 + $0x1f8] sm:$0xf0]  ;;  %v1763_v25 = vld [vmem:[%s2464_s0 + $0x1ec] sm:$0xf] }
  0x2f   :  { %551 = vmatpush.bf16.msra.mxu1 %v1453_v48  ;;  %v1767_v48 = vld [vmem:[%s2464_s0 + $0x20c] sm:$0xf]  ;;  %v1605_v26 = vld [vmem:[%s2464_s0 + $0x1fc] sm:$0xf0]  ;;  %v1604_v29 = vor.u32 %v1765_v24, %v1603_v22  ;;  %v1688_v33 = vld [vmem:[%s2464_s0 + $0x268] sm:$0xf] }
  0x30   :  { %v1781_v34 = vld [vmem:[%s2464_s0 + $0x278] sm:$0xf0]  ;;  %v1680_v37 = vld [vmem:[%s2464_s0 + $0x260] sm:$0xf]  ;;  %v1780_v38 = vld [vmem:[%s2464_s0 + $0x270] sm:$0xf0] }
  0x31   :  { %566 = vmatpush.bf16.msra.mxu2 %v1437_v54  ;;  %v1616_v54 = vor.u32 %v1769_v47, %v1615_v46  ;;  %v1777_v35 = vld [vmem:[%s2464_s0 + $0x25c] sm:$0xf]  ;;  %v1689_v40 = vor.u32 %v1781_v34, %v1688_v33  ;;  %v1776_v46 = vld [vmem:[%s2464_s0 + $0x250] sm:$0xf0] }
  0x32   :  { %580 = vmatpush.bf16.msra.mxu3 %v1441_v55  ;;  %538 = vmatpush.bf16.msra.mxu0 %v1429_v56  ;;  %v1620_v55 = vor.u32 %v1767_v48, %v1617_v49  ;;  %v1571_v56 = vor.u32 %v1758_v50, %v1568_v51  ;;  %v1772_v47 = vld [vmem:[%s2464_s0 + $0x234] sm:$0xf]  ;;  %v1654_v48 = vld [vmem:[%s2464_s0 + $0x244] sm:$0xf0]  ;;  %v1660_v49 = vld [vmem:[%s2464_s0 + $0x238] sm:$0xf] }
  0x33   :  { %552 = vmatpush.bf16.msra.mxu1 %v1433_v58  ;;  %v1764_v58 = vld [vmem:[%s2464_s0 + $0x1f0] sm:$0xf0]  ;;  %v1775_v50 = vld [vmem:[%s2464_s0 + $0x248] sm:$0xf0]  ;;  %v1657_v53 = vor.u32 %v1772_v47, %v1654_v48 }
  0x34   :  { %v1596_v2 = vor.u32 %v1764_v58, %v1595_v57 }
  0x3b   :  { %1407 = vmatmul.msk.bf16.vlgmr.msrb.gmra.mxu0 %vm88_vm0, %v1856_v23 }
  0x3c   :  { %1408 = vmatmul.msk.bf16.vlgmr.msrb.gmra.mxu1 %vm88_vm0, %v1856_v23  ;;  %1409 = vmatmul.msk.bf16.vlgmr.msrb.gmra.mxu2 %vm88_vm0, %v1856_v23 }
  0x3d   :  { %1462 = vmatmul.msk.bf16.vlgmr.msrb.gmra.mxu3 %vm88_vm0, %v1856_v23  ;;  %739 = vmatpush.bf16.msrb.mxu2 %v1510_v5  ;;  %v1555_v5 = vor.u32 %v1756_v1, %v1554_v0 }
  0x3e   :  { %753 = vmatpush.bf16.msrb.mxu3 %v1514_v6  ;;  %711 = vmatpush.bf16.msrb.mxu0 %v1502_v7  ;;  %v1631_v6 = vld [vmem:[%s2464_s0 + $0x218] sm:$0xf]  ;;  %v1771_v7 = vld [vmem:[%s2464_s0 + $0x228] sm:$0xf0] }
  0x3f   :  { %725 = vmatpush.bf16.msrb.mxu1 %v1506_v11  ;;  %v1770_v11 = vld [vmem:[%s2464_s0 + $0x220] sm:$0xf0]  ;;  %v1632_v14 = vor.u32 %v1771_v7, %v1631_v6 }
  0x40   :  { %v1624_v16 = vor.u32 %v1770_v11, %v1623_v10 }
  0x41   :  { %740 = vmatpush.bf16.msrb.mxu2 %v1490_v17  ;;  %v1611_v17 = vld [vmem:[%s2464_s0 + $0x1f0] sm:$0xf] }
  0x42   :  { %754 = vmatpush.bf16.msrb.mxu3 %v1494_v18  ;;  %712 = vmatpush.bf16.msrb.mxu0 %v1482_v19  ;;  %v1766_v18 = vld [vmem:[%s2464_s0 + $0x200] sm:$0xf0]  ;;  %v1652_v19 = vld [vmem:[%s2464_s0 + $0x230] sm:$0xf] }
  0x43   :  { %726 = vmatpush.bf16.msrb.mxu1 %v1486_v20  ;;  %v1628_v20 = vor.u32 %v1768_v12, %v1625_v13  ;;  %v1612_v27 = vor.u32 %v1766_v18, %v1611_v17  ;;  %v1653_v28 = vor.u32 %v1774_v21, %v1652_v19 }
  0x4b   :  { %1463 = vmatmul.msk.bf16.vlgmr.msra.gmra.mxu0 %vm88_vm0, %v1856_v23 }
  0x4c   :  { %1464 = vmatmul.msk.bf16.vlgmr.msra.gmra.mxu1 %vm88_vm0, %v1856_v23  ;;  %1465 = vmatmul.msk.bf16.vlgmr.msra.gmra.mxu2 %vm88_vm0, %v1856_v23 }
  0x4d   :  { %1466 = vmatmul.msk.bf16.vlgmr.msra.gmra.mxu3 %vm88_vm0, %v1856_v23  ;;  %860 = vmatpush.bf16.msra.mxu2 %v1563_v30  ;;  %v1608_v30 = vor.u32 %v1763_v25, %v1605_v26 }
  0x4e   :  { %874 = vmatpush.bf16.msra.mxu3 %v1567_v31  ;;  %767 = vmatpush.bf16.msra.mxu0 %v1518_v32  ;;  %v1778_v31 = vld [vmem:[%s2464_s0 + $0x264] sm:$0xf]  ;;  %v1682_v32 = vld [vmem:[%s2464_s0 + $0x274] sm:$0xf0] }
  0x4f   :  { %846 = vmatpush.bf16.msra.mxu1 %v1559_v36  ;;  %v1674_v36 = vld [vmem:[%s2464_s0 + $0x26c] sm:$0xf0]  ;;  %v1685_v39 = vor.u32 %v1778_v31, %v1682_v32 }
  0x50   :  { %v1677_v41 = vor.u32 %v1777_v35, %v1674_v36 }
  0x51   :  { %861 = vmatpush.bf16.msra.mxu2 %v1543_v42  ;;  %v1773_v42 = vld [vmem:[%s2464_s0 + $0x23c] sm:$0xf] }
  0x52   :  { %875 = vmatpush.bf16.msra.mxu3 %v1547_v43  ;;  %768 = vmatpush.bf16.msra.mxu0 %v1498_v44  ;;  %v1662_v43 = vld [vmem:[%s2464_s0 + $0x24c] sm:$0xf0]  ;;  %v1668_v44 = vld [vmem:[%s2464_s0 + $0x240] sm:$0xf] }
  0x53   :  { %847 = vmatpush.bf16.msra.mxu1 %v1539_v45  ;;  %v1681_v45 = vor.u32 %v1780_v38, %v1680_v37  ;;  %v1665_v51 = vor.u32 %v1773_v42, %v1662_v43  ;;  %v1669_v52 = vor.u32 %v1776_v46, %v1668_v44 }
  0x5b   :  { %1519 = vmatmul.msk.bf16.vlgmr.msrb.gmra.mxu0 %vm88_vm0, %v1856_v23 }
  0x5c   :  { %1520 = vmatmul.msk.bf16.vlgmr.msrb.gmra.mxu1 %vm88_vm0, %v1856_v23  ;;  %1521 = vmatmul.msk.bf16.vlgmr.msrb.gmra.mxu2 %vm88_vm0, %v1856_v23 }
  0x5d   :  { %1522 = vmatmul.msk.bf16.vlgmr.msrb.gmra.mxu3 %vm88_vm0, %v1856_v23  ;;  %991 = vmatpush.bf16.msrb.mxu2 %v1616_v54  ;;  %v1661_v54 = vor.u32 %v1775_v50, %v1660_v49 }
  0x5e   :  { %1005 = vmatpush.bf16.msrb.mxu3 %v1620_v55  ;;  %888 = vmatpush.bf16.msrb.mxu0 %v1571_v56 }
  0x5f   :  { %902 = vmatpush.bf16.msrb.mxu1 %v1575_v60 }
  0x61   :  { %992 = vmatpush.bf16.msrb.mxu2 %v1596_v2 }
  0x62   :  { %1006 = vmatpush.bf16.msrb.mxu3 %v1600_v3  ;;  %889 = vmatpush.bf16.msrb.mxu0 %v1551_v4 }
  0x63   :  { %903 = vmatpush.bf16.msrb.mxu1 %v1555_v5 }
  0x6b   :  { %1523 = vmatmul.msk.bf16.vlgmr.msra.gmra.mxu0 %vm88_vm0, %v1856_v23 }
  0x6c   :  { %1576 = vmatmul.msk.bf16.vlgmr.msra.gmra.mxu1 %vm88_vm0, %v1856_v23  ;;  %1577 = vmatmul.msk.bf16.vlgmr.msra.gmra.mxu2 %vm88_vm0, %v1856_v23 }
  0x6d   :  { %1578 = vmatmul.msk.bf16.vlgmr.msra.gmra.mxu3 %vm88_vm0, %v1856_v23  ;;  %1047 = vmatpush.bf16.msra.mxu2 %v1632_v14 }
  0x6e   :  { %1136 = vmatpush.bf16.msra.mxu3 %v1673_v15  ;;  %1019 = vmatpush.bf16.msra.mxu0 %v1624_v16 }
  0x6f   :  { %1033 = vmatpush.bf16.msra.mxu1 %v1628_v20 }
  0x71   :  { %1048 = vmatpush.bf16.msra.mxu2 %v1612_v27 }
  0x72   :  { %1137 = vmatpush.bf16.msra.mxu3 %v1653_v28  ;;  %1020 = vmatpush.bf16.msra.mxu0 %v1604_v29 }
  0x73   :  { %1034 = vmatpush.bf16.msra.mxu1 %v1608_v30 }
  0x7b   :  { %1579 = vmatmul.msk.bf16.vlgmr.msrb.gmra.mxu0 %vm88_vm0, %v1856_v23 }
  0x7c   :  { %1580 = vmatmul.msk.bf16.vlgmr.msrb.gmra.mxu1 %vm88_vm0, %v1856_v23  ;;  %1633 = vmatmul.msk.bf16.vlgmr.msrb.gmra.mxu2 %vm88_vm0, %v1856_v23 }
  0x7d   :  { %1634 = vmatmul.msk.bf16.vlgmr.msrb.gmra.mxu3 %vm88_vm0, %v1856_v23  ;;  %1178 = vmatpush.bf16.msrb.mxu2 %v1685_v39 }
  0x7e   :  { %1192 = vmatpush.bf16.msrb.mxu3 %v1689_v40  ;;  %1150 = vmatpush.bf16.msrb.mxu0 %v1677_v41 }
  0x7f   :  { %1164 = vmatpush.bf16.msrb.mxu1 %v1681_v45 }
  0x81   :  { %1179 = vmatpush.bf16.msrb.mxu2 %v1665_v51 }
  0x82   :  { %1193 = vmatpush.bf16.msrb.mxu3 %v1669_v52  ;;  %1151 = vmatpush.bf16.msrb.mxu0 %v1657_v53 }
  0x83   :  { %1165 = vmatpush.bf16.msrb.mxu1 %v1661_v54 }
  0x88   :  { %v101_v55 = vpop.f32.mrf.mxu0 }
  0x89   :  { %v115_v56 = vpop.f32.mrf.mxu1 }
  0x8b   :  { %1635 = vmatmul.msk.bf16.vlgmr.msra.gmra.mxu0 %vm88_vm0, %v1856_v23 }
  0x8c   :  { %1636 = vmatmul.msk.bf16.vlgmr.msra.gmra.mxu1 %vm88_vm0, %v1856_v23  ;;  %1637 = vmatmul.msk.bf16.vlgmr.msra.gmra.mxu2 %vm88_vm0, %v1856_v23 }
  0x8d   :  { %1690 = vmatmul.msk.bf16.vlgmr.msra.gmra.mxu3 %vm88_vm0, %v1856_v23 }
  0x8f   :  { %v129_v57 = vpop.f32.mrf.mxu2 }
  0x90   :  { %v143_v58 = vpop.f32.mrf.mxu3  ;;  %v103_v59 = vpop.f32.mrf.mxu0 }
  0x91   :  { %v117_v60 = vpop.f32.mrf.mxu1 }
  0x92   :  { %v2386_v22 = vpop.permute.xlu0 %599 }
  0x97   :  { %v2368_v61 = vpop.f32.mrf.mxu2 }
  0x98   :  { %v2370_v62 = vpop.f32.mrf.mxu3  ;;  %v157_v63 = vpop.f32.mrf.mxu0 }
  0x99   :  { %v236_v0 = vpop.f32.mrf.mxu1 }
  0x9a   :  { %v297_v19 = vmax.f32 %v101_v55, %v236_v0  ;;  %v2390_v46 = vpop.permute.xlu0 %604 }
  0x9b   :  { %1691 = vmatmul.msk.bf16.vlgmr.msrb.gmra.mxu0 %vm88_vm0, %v1856_v23 }
  0x9c   :  { %1692 = vmatmul.msk.bf16.vlgmr.msrb.gmra.mxu1 %vm88_vm0, %v1856_v23  ;;  %1693 = vmatmul.msk.bf16.vlgmr.msrb.gmra.mxu2 %vm88_vm0, %v1856_v23 }
  0x9d   :  { %1694 = vmatmul.msk.bf16.vlgmr.msrb.gmra.mxu3 %vm88_vm0, %v1856_v23 }
  0x9f   :  { %v250_v1 = vpop.f32.mrf.mxu2 }
  0xa0   :  { %v264_v2 = vpop.f32.mrf.mxu3  ;;  %v2380_v3 = vpop.f32.mrf.mxu0  ;;  %v298_v24 = vmax.f32 %v115_v56, %v250_v1 }
  0xa1   :  { %v238_v4 = vpop.f32.mrf.mxu1  ;;  %v299_v28 = vmax.f32 %v129_v57, %v264_v2 }
  0xa2   :  { %v302_v31 = vmax.f32 %v103_v59, %v238_v4 }
  0xa7   :  { %v252_v5 = vpop.f32.mrf.mxu2 }
  0xa8   :  { %v266_v6 = vpop.f32.mrf.mxu3  ;;  %v278_v7 = vpop.f32.mrf.mxu0  ;;  %v303_v38 = vmax.f32 %v117_v60, %v252_v5 }
  0xa9   :  { %v292_v8 = vpop.f32.mrf.mxu1  ;;  %v300_v39 = vmax.f32 %v143_v58, %v278_v7  ;;  %v304_v51 = vmax.f32 %v2368_v61, %v266_v6 }
  0xaa   :  { %v301_v41 = vmax.f32 %v157_v63, %v292_v8 }
  0xaf   :  { %v381_v9 = vpop.f32.mrf.mxu2 }
  0xb0   :  { %v395_v10 = vpop.f32.mrf.mxu3  ;;  %v2382_v11 = vpop.f32.mrf.mxu0  ;;  %v442_v21 = vmax.f32 %v297_v19, %v381_v9 }
  0xb1   :  { %v2384_v12 = vpop.f32.mrf.mxu1  ;;  %v443_v26 = vmax.f32 %v298_v24, %v395_v10  ;;  %v305_v1 = vmax.f32 %v2370_v62, %v2382_v11 }
  0xb2   :  { %v306_v6 = vmax.f32 %v2380_v3, %v2384_v12 }
  0xb7   :  { %v383_v13 = vpop.f32.mrf.mxu2 }
  0xb8   :  { %v397_v14 = vpop.f32.mrf.mxu3  ;;  %v409_v15 = vpop.f32.mrf.mxu0  ;;  %v447_v36 = vmax.f32 %v302_v31, %v383_v13 }
  0xb9   :  { %v423_v16 = vpop.f32.mrf.mxu1  ;;  %v444_v35 = vmax.f32 %v299_v28, %v409_v15  ;;  %v448_v47 = vmax.f32 %v303_v38, %v397_v14 }
  0xba   :  { %v445_v45 = vmax.f32 %v300_v39, %v423_v16 }
  0xbf   :  { %v437_v23 = vpop.f32.mrf.mxu2 }
  0xc0   :  { %v526_v17 = vpop.f32.mrf.mxu3  ;;  %v411_v18 = vpop.f32.mrf.mxu0  ;;  %v446_v48 = vmax.f32 %v301_v41, %v437_v23 }
  0xc1   :  { %v425_v20 = vpop.f32.mrf.mxu1  ;;  %v587_v25 = vmax.f32 %v442_v21, %v526_v17  ;;  %v449_v60 = vmax.f32 %v304_v51, %v411_v18 }
  0xc2   :  { %v450_v10 = vmax.f32 %v305_v1, %v425_v20 }
  0xc3   :  { %v607_v33 = vadd.f32 %v2386_v22, %v587_v25 }
  0xc5   :  { %v617_v43 = vmax.f32 %v607_v33, 0.0 }
  0xc7   :  { %v439_v27 = vpop.f32.mrf.mxu2 }
  0xc8   :  { %v528_v29 = vpop.f32.mrf.mxu3  ;;  %v540_v30 = vpop.f32.mrf.mxu0  ;;  %v451_v14 = vmax.f32 %v306_v6, %v439_v27 }
  0xc9   :  { %v588_v32 = vmax.f32 %v443_v26, %v540_v30  ;;  %v554_v34 = vpop.f32.mrf.mxu1  ;;  %v592_v42 = vmax.f32 %v447_v36, %v528_v29 }
  0xca   :  { %v589_v40 = vmax.f32 %v444_v35, %v554_v34 }
  0xcb   :  { %v608_v37 = vadd.f32 %v2386_v22, %v588_v32  ;;  %v612_v58 = vadd.f32 %v2390_v46, %v592_v42 }
  0xcc   :  { %v609_v52 = vadd.f32 %v2386_v22, %v589_v40 }
  0xcd   :  { %v618_v44 = vmax.f32 %v608_v37, 0.0  ;;  %v622_v8 = vmax.f32 %v612_v58, 0.0 }
  0xce   :  { %v619_v2 = vmax.f32 %v609_v52, 0.0 }
  0xcf   :  { %v627_v49 = vpack.c.bf16 %v618_v44, %v617_v43  ;;  %v568_v50 = vpop.f32.mrf.mxu2 }
  0xd0   :  { %v590_v53 = vmax.f32 %v445_v45, %v568_v50  ;;  %v582_v54 = vpop.f32.mrf.mxu3  ;;  %v542_v55 = vpop.f32.mrf.mxu0 }
  0xd1   :  { %633 = vst [vmem:[%s2467_s3] sm:$0xff] %v627_v49  ;;  %v591_v56 = vmax.f32 %v446_v48, %v582_v54  ;;  %v593_v57 = vmax.f32 %v448_v47, %v542_v55  ;;  %v556_v59 = vpop.f32.mrf.mxu1 }
  0xd2   :  { %v610_v63 = vadd.f32 %v2386_v22, %v590_v53  ;;  %v594_v5 = vmax.f32 %v449_v60, %v556_v59 }
  0xd3   :  { %v611_v0 = vadd.f32 %v2386_v22, %v591_v56  ;;  %v613_v61 = vadd.f32 %v2390_v46, %v593_v57 }
  0xd4   :  { %v620_v4 = vmax.f32 %v610_v63, 0.0  ;;  %v614_v62 = vadd.f32 %v2390_v46, %v594_v5 }
  0xd5   :  { %v621_v7 = vmax.f32 %v611_v0, 0.0  ;;  %v623_v9 = vmax.f32 %v613_v61, 0.0 }
  0xd6   :  { %v628_v13 = vpack.c.bf16 %v620_v4, %v619_v2  ;;  %v624_v21 = vmax.f32 %v614_v62, 0.0 }
  0xd7   :  { %v629_v15 = vpack.c.bf16 %v621_v7, %v621_v7  ;;  %v630_v16 = vpack.c.bf16 %v623_v9, %v622_v8  ;;  %v570_v23 = vpop.f32.mrf.mxu2 }
  0xd8   :  { %634 = vst [vmem:[%s2467_s3 + $0x8] sm:$0xff] %v628_v13  ;;  %v595_v11 = vmax.f32 %v450_v10, %v570_v23  ;;  %v584_v17 = vpop.f32.mrf.mxu3  ;;  %v714_v18 = vpop.f32.mrf.mxu0 }
  0xd9   :  { %636 = vst.msk [vmem:[%s2467_s3 + $0x10] sm:$0xf] %vm635_vm1, %v629_v15  ;;  %v596_v3 = vmax.f32 %v451_v14, %v584_v17  ;;  %v728_v12 = vpop.f32.mrf.mxu1 }
  0xda   :  { %637 = vst [vmem:[%s2467_s3 + $0x14] sm:$0xff] %v630_v16  ;;  %v615_v19 = vadd.f32 %v2390_v46, %v595_v11 }
  0xdb   :  { %v616_v20 = vadd.f32 %v2390_v46, %v596_v3 }
  0xdc   :  { %v625_v24 = vmax.f32 %v615_v19, 0.0 }
  0xdd   :  { %v626_v25 = vmax.f32 %v616_v20, 0.0 }
  0xde   :  { %v631_v26 = vpack.c.bf16 %v625_v24, %v624_v21 }
  0xdf   :  { %v632_v27 = vpack.c.bf16 %v626_v25, %v626_v25  ;;  %v742_v28 = vpop.f32.mrf.mxu2 }
  0xe0   :  { %638 = vst [vmem:[%s2467_s3 + $0x1c] sm:$0xff] %v631_v26  ;;  %v756_v29 = vpop.f32.mrf.mxu3  ;;  %v716_v30 = vpop.f32.mrf.mxu0 }
  0xe1   :  { %639 = vst.msk [vmem:[%s2467_s3 + $0x24] sm:$0xf] %vm635_vm1, %v632_v27  ;;  %v730_v31 = vpop.f32.mrf.mxu1 }
  0xe7   :  { %v2425_v32 = vpop.f32.mrf.mxu2 }
  0xe8   :  { %v2427_v33 = vpop.f32.mrf.mxu3  ;;  %v770_v34 = vpop.f32.mrf.mxu0 }
  0xe9   :  { %v849_v35 = vpop.f32.mrf.mxu1 }
  0xea   :  { %v910_v56 = vmax.f32 %v714_v18, %v849_v35 }
  0xef   :  { %v863_v36 = vpop.f32.mrf.mxu2 }
  0xf0   :  { %v877_v37 = vpop.f32.mrf.mxu3  ;;  %v2429_v38 = vpop.f32.mrf.mxu0  ;;  %v911_v59 = vmax.f32 %v728_v12, %v863_v36 }
  0xf1   :  { %v851_v39 = vpop.f32.mrf.mxu1  ;;  %v912_v61 = vmax.f32 %v742_v28, %v877_v37 }
  0xf2   :  { %v915_v4 = vmax.f32 %v716_v30, %v851_v39 }
  0xf7   :  { %v865_v40 = vpop.f32.mrf.mxu2 }
  0xf8   :  { %v879_v41 = vpop.f32.mrf.mxu3  ;;  %v891_v42 = vpop.f32.mrf.mxu0  ;;  %v916_v13 = vmax.f32 %v730_v31, %v865_v40 }
  0xf9   :  { %v905_v43 = vpop.f32.mrf.mxu1  ;;  %v913_v14 = vmax.f32 %v756_v29, %v891_v42  ;;  %v917_v20 = vmax.f32 %v2425_v32, %v879_v41 }
  0xfa   :  { %v914_v16 = vmax.f32 %v770_v34, %v905_v43 }
  0xff   :  { %v994_v44 = vpop.f32.mrf.mxu2 }
 0x100   :  { %v1008_v45 = vpop.f32.mrf.mxu3  ;;  %v893_v47 = vpop.f32.mrf.mxu0  ;;  %v1055_v58 = vmax.f32 %v910_v56, %v994_v44 }
 0x101   :  { %v907_v48 = vpop.f32.mrf.mxu1  ;;  %v1056_v63 = vmax.f32 %v911_v59, %v1008_v45  ;;  %v918_v36 = vmax.f32 %v2427_v33, %v893_v47 }
 0x102   :  { %v919_v41 = vmax.f32 %v2429_v38, %v907_v48 }
 0x107   :  { %v996_v49 = vpop.f32.mrf.mxu2 }
 0x108   :  { %v1010_v50 = vpop.f32.mrf.mxu3  ;;  %v1022_v51 = vpop.f32.mrf.mxu0  ;;  %v1060_v9 = vmax.f32 %v915_v4, %v996_v49 }
 0x109   :  { %v1036_v52 = vpop.f32.mrf.mxu1  ;;  %v1057_v8 = vmax.f32 %v912_v61, %v1022_v51  ;;  %v1061_v18 = vmax.f32 %v916_v13, %v1010_v50 }
 0x10a   :  { %v1058_v17 = vmax.f32 %v913_v14, %v1036_v52 }
 0x10f   :  { %v1050_v53 = vpop.f32.mrf.mxu2 }
 0x110   :  { %v1139_v54 = vpop.f32.mrf.mxu3  ;;  %v1024_v55 = vpop.f32.mrf.mxu0  ;;  %v1059_v3 = vmax.f32 %v914_v16, %v1050_v53 }
 0x111   :  { %v1038_v57 = vpop.f32.mrf.mxu1  ;;  %v1200_v60 = vmax.f32 %v1055_v58, %v1139_v54  ;;  %v1062_v31 = vmax.f32 %v917_v20, %v1024_v55 }
 0x112   :  { %v1063_v45 = vmax.f32 %v918_v36, %v1038_v57 }
 0x113   :  { %v1210_v5 = vadd.f32 %v1200_v60, %v2386_v22 }
 0x115   :  { %v1220_v23 = vmax.f32 %v1210_v5, 0.0 }
 0x117   :  { %v1052_v0 = vpop.f32.mrf.mxu2 }
 0x118   :  { %v1141_v1 = vpop.f32.mrf.mxu3  ;;  %v1153_v2 = vpop.f32.mrf.mxu0  ;;  %v1064_v50 = vmax.f32 %v919_v41, %v1052_v0 }
 0x119   :  { %v1201_v6 = vmax.f32 %v1056_v63, %v1153_v2  ;;  %v1167_v7 = vpop.f32.mrf.mxu1  ;;  %v1205_v62 = vmax.f32 %v1060_v9, %v1141_v1 }
 0x11a   :  { %v1202_v15 = vmax.f32 %v1057_v8, %v1167_v7 }
 0x11b   :  { %v1211_v10 = vadd.f32 %v1201_v6, %v2386_v22  ;;  %v1215_v27 = vadd.f32 %v1205_v62, %v2390_v46 }
 0x11c   :  { %v1212_v21 = vadd.f32 %v1202_v15, %v2386_v22 }
 0x11d   :  { %v1221_v11 = vmax.f32 %v1211_v10, 0.0  ;;  %v1225_v42 = vmax.f32 %v1215_v27, 0.0 }
 0x11e   :  { %v1222_v37 = vmax.f32 %v1212_v21, 0.0 }
 0x11f   :  { %v1230_v12 = vpack.c.bf16 %v1221_v11, %v1220_v23  ;;  %v1181_v19 = vpop.f32.mrf.mxu2 }
 0x120   :  { %v1203_v24 = vmax.f32 %v1058_v17, %v1181_v19  ;;  %v1195_v25 = vpop.f32.mrf.mxu3  ;;  %v1155_v26 = vpop.f32.mrf.mxu0 }
 0x121   :  { %1695 = vst [vmem:[%s2467_s3 + $0x28] sm:$0xff] %v1230_v12  ;;  %v1204_v28 = vmax.f32 %v1059_v3, %v1195_v25  ;;  %v1206_v29 = vmax.f32 %v1061_v18, %v1155_v26  ;;  %v1169_v30 = vpop.f32.mrf.mxu1 }
 0x122   :  { %v1213_v34 = vadd.f32 %v1203_v24, %v2386_v22  ;;  %v1207_v40 = vmax.f32 %v1062_v31, %v1169_v30 }
 0x123   :  { %v1214_v35 = vadd.f32 %v1204_v28, %v2386_v22  ;;  %v1216_v32 = vadd.f32 %v1206_v29, %v2390_v46 }
 0x124   :  { %v1223_v39 = vmax.f32 %v1213_v34, 0.0  ;;  %v1217_v22 = vadd.f32 %v1207_v40, %v2390_v46 }
 0x125   :  { %v1224_v43 = vmax.f32 %v1214_v35, 0.0  ;;  %v1226_v44 = vmax.f32 %v1216_v32, 0.0 }
 0x126   :  { %v1231_v49 = vpack.c.bf16 %v1223_v39, %v1222_v37  ;;  %v1227_v55 = vmax.f32 %v1217_v22, 0.0 }
 0x127   :  { %v1232_v51 = vpack.c.bf16 %v1224_v43, %v1224_v43  ;;  %v1233_v52 = vpack.c.bf16 %v1226_v44, %v1225_v42  ;;  %v1183_v53 = vpop.f32.mrf.mxu2 }
 0x128   :  { %1696 = vst [vmem:[%s2467_s3 + $0x30] sm:$0xff] %v1231_v49  ;;  %v1208_v33 = vmax.f32 %v1063_v45, %v1183_v53  ;;  %v1197_v47 = vpop.f32.mrf.mxu3 }
 0x129   :  { %1697 = vst.msk [vmem:[%s2467_s3 + $0x38] sm:$0xf] %vm635_vm1, %v1232_v51  ;;  %v1209_v38 = vmax.f32 %v1064_v50, %v1197_v47 }
 0x12a   :  { %1698 = vst [vmem:[%s2467_s3 + $0x3c] sm:$0xff] %v1233_v52  ;;  %v1218_v48 = vadd.f32 %v1208_v33, %v2390_v46 }
 0x12b   :  { %v1219_v54 = vadd.f32 %v1209_v38, %v2390_v46 }
 0x12c   :  { %v1228_v56 = vmax.f32 %v1218_v48, 0.0 }
 0x12d   :  { %v1229_v57 = vmax.f32 %v1219_v54, 0.0 }
 0x12e   :  { %v1234_v58 = vpack.c.bf16 %v1228_v56, %v1227_v55 }
 0x12f   :  { %v1235_v59 = vpack.c.bf16 %v1229_v57, %v1229_v57 }
 0x130   :  { %1699 = vst [vmem:[%s2467_s3 + $0x44] sm:$0xff] %v1234_v58 }
 0x131   :  { %1700 = vst.msk [vmem:[%s2467_s3 + $0x4c] sm:$0xf] %vm635_vm1, %v1235_v59 }

// kernel: custom_1conv_forward.3
= control target key start
LH: loop header
LB: loop body
LE: loop exit
PB: predicated region body
PF: predicated region fallthrough
CT: control target
= control target key end

     0   :  { %s10459_s0 = inlined_call_operand.vmem [shape: bf16[2,9216], index: 0, kind: input, shape index: {}]   ;;  %s10460_s1 = inlined_call_operand.vmem [shape: bf16[9216,128], index: 1, kind: input, shape index: {}]   ;;  %s10461_s2 = inlined_call_operand.vmem [shape: f32[1,128], index: 2, kind: input, shape index: {}]   ;;  %s10462_s3 = inlined_call_operand.hbm [shape: f32[2,128], index: 3, kind: output, shape index: {}]  }
   0x1   :  { %v8062_v0 = vld [vmem:[%s10460_s1 + $0x38] sm:$0xff]  ;;  %v8061_v4 = vld [vmem:[%s10460_s1 + $0x30] sm:$0xff]  ;;  %v8060_v8 = vld [vmem:[%s10460_s1 + $0x28] sm:$0xff] }
   0x2   :  { %v8070_v1 = vld [vmem:[%s10460_s1 + $0x78] sm:$0xff]  ;;  %4798 = vmatpush.bf16.msra.mxu0 %v8062_v0  ;;  %v8069_v5 = vld [vmem:[%s10460_s1 + $0x70] sm:$0xff]  ;;  %v8068_v9 = vld [vmem:[%s10460_s1 + $0x68] sm:$0xff] }
   0x3   :  { %v8078_v2 = vld [vmem:[%s10460_s1 + $0xb8] sm:$0xff]  ;;  %4811 = vmatpush.bf16.msra.mxu1 %v8070_v1  ;;  %v8077_v6 = vld [vmem:[%s10460_s1 + $0xb0] sm:$0xff]  ;;  %v8076_v10 = vld [vmem:[%s10460_s1 + $0xa8] sm:$0xff] }
   0x4   :  { %v8086_v3 = vld [vmem:[%s10460_s1 + $0xf8] sm:$0xff]  ;;  %4824 = vmatpush.bf16.msra.mxu2 %v8078_v2  ;;  %v8085_v7 = vld [vmem:[%s10460_s1 + $0xf0] sm:$0xff]  ;;  %v8084_v11 = vld [vmem:[%s10460_s1 + $0xe8] sm:$0xff] }
   0x5   :  { %4837 = vmatpush.bf16.msra.mxu3 %v8086_v3  ;;  %v8059_v12 = vld [vmem:[%s10460_s1 + $0x20] sm:$0xff]  ;;  %v8058_v16 = vld [vmem:[%s10460_s1 + $0x18] sm:$0xff]  ;;  %v8057_v20 = vld [vmem:[%s10460_s1 + $0x10] sm:$0xff] }
   0x6   :  { %4799 = vmatpush.bf16.msra.mxu0 %v8061_v4  ;;  %v8067_v13 = vld [vmem:[%s10460_s1 + $0x60] sm:$0xff]  ;;  %v8066_v17 = vld [vmem:[%s10460_s1 + $0x58] sm:$0xff]  ;;  %v8065_v21 = vld [vmem:[%s10460_s1 + $0x50] sm:$0xff] }
   0x7   :  { %4812 = vmatpush.bf16.msra.mxu1 %v8069_v5  ;;  %v8075_v14 = vld [vmem:[%s10460_s1 + $0xa0] sm:$0xff]  ;;  %v8074_v18 = vld [vmem:[%s10460_s1 + $0x98] sm:$0xff] }
   0x8   :  { %4825 = vmatpush.bf16.msra.mxu2 %v8077_v6  ;;  %v8083_v15 = vld [vmem:[%s10460_s1 + $0xe0] sm:$0xff]  ;;  %v8082_v19 = vld [vmem:[%s10460_s1 + $0xd8] sm:$0xff] }
   0x9   :  { %4838 = vmatpush.bf16.msra.mxu3 %v8085_v7  ;;  %v15_v22 = vld [vmem:[%s10459_s0] sm:$0xff] }
   0xa   :  { %4800 = vmatpush.bf16.msra.mxu0 %v8060_v8  ;;  %1181 = vst [vmem:[#allocation1] ss:$9 sm:$0xff] %v15_v22 }
   0xb   :  { %4813 = vmatpush.bf16.msra.mxu1 %v8068_v9 }
   0xc   :  { %4826 = vmatpush.bf16.msra.mxu2 %v8076_v10 }
   0xd   :  { %4839 = vmatpush.bf16.msra.mxu3 %v8084_v11 }
   0xe   :  { %4801 = vmatpush.bf16.msra.mxu0 %v8059_v12 }
   0xf   :  { %4814 = vmatpush.bf16.msra.mxu1 %v8067_v13 }
  0x10   :  { %4827 = vmatpush.bf16.msra.mxu2 %v8075_v14 }
  0x11   :  { %4840 = vmatpush.bf16.msra.mxu3 %v8083_v15 }
  0x12   :  { %4802 = vmatpush.bf16.msra.mxu0 %v8058_v16 }
  0x13   :  { %4815 = vmatpush.bf16.msra.mxu1 %v8066_v17 }
  0x14   :  { %8 = vsyncpa [#allocation3], 0  ;;  %4828 = vmatpush.bf16.msra.mxu2 %v8074_v18  ;;  %v8073_v23 = vld [vmem:[%s10460_s1 + $0x90] sm:$0xff]  ;;  %v8056_v25 = vld [vmem:[%s10460_s1 + $0x8] sm:$0xff]  ;;  %s5742_s18 = sshll.u32 %s10462_s3, 4  ;;  %s5743_s18 = int_to_ptr.hbm [resolvable:$true] %s5742_s18 }
  0x15   :  { %4841 = vmatpush.bf16.msra.mxu3 %v8082_v19  ;;  %v8081_v24 = vld [vmem:[%s10460_s1 + $0xd0] sm:$0xff]  ;;  %v8064_v26 = vld [vmem:[%s10460_s1 + $0x48] sm:$0xff]  ;;  %v8055_v29 = vld [vmem:[%s10460_s1] sm:$0xff] }
  0x16   :  { %4803 = vmatpush.bf16.msra.mxu0 %v8057_v20  ;;  %v8072_v27 = vld [vmem:[%s10460_s1 + $0x88] sm:$0xff]  ;;  %v8063_v30 = vld [vmem:[%s10460_s1 + $0x40] sm:$0xff]  ;;  %v8094_v33 = vld [vmem:[%s10460_s1 + $0x138] sm:$0xff] }
  0x17   :  { %4816 = vmatpush.bf16.msra.mxu1 %v8065_v21  ;;  %v8080_v28 = vld [vmem:[%s10460_s1 + $0xc8] sm:$0xff]  ;;  %v8071_v31 = vld [vmem:[%s10460_s1 + $0x80] sm:$0xff]  ;;  %v8102_v34 = vld [vmem:[%s10460_s1 + $0x178] sm:$0xff] }
  0x18   :  { %4829 = vmatpush.bf16.msra.mxu2 %v8073_v23  ;;  %v8079_v32 = vld [vmem:[%s10460_s1 + $0xc0] sm:$0xff]  ;;  %v8110_v35 = vld [vmem:[%s10460_s1 + $0x1b8] sm:$0xff]  ;;  %v8093_v37 = vld [vmem:[%s10460_s1 + $0x130] sm:$0xff] }
  0x19   :  { %4842 = vmatpush.bf16.msra.mxu3 %v8081_v24  ;;  %v8118_v36 = vld [vmem:[%s10460_s1 + $0x1f8] sm:$0xff]  ;;  %v1182_v39 = vld [vmem:[#allocation1] sm:$0xff]  ;;  %v8101_v40 = vld [vmem:[%s10460_s1 + $0x170] sm:$0xff] }
  0x1a   :  { %4804 = vmatpush.bf16.msra.mxu0 %v8056_v25  ;;  %v1184_v38 = vld [vmem:[#allocation1 + $0x12] sm:$0xff]  ;;  %v1185_v41 = vld [vmem:[#allocation1 + $0x1b] sm:$0xff]  ;;  %v1183_v42 = vld [vmem:[#allocation1 + $0x9] sm:$0xff] }
  0x1b   :  { %4817 = vmatpush.bf16.msra.mxu1 %v8064_v26  ;;  %v8109_v43 = vld [vmem:[%s10460_s1 + $0x1b0] sm:$0xff]  ;;  %v8092_v45 = vld [vmem:[%s10460_s1 + $0x128] sm:$0xff]  ;;  %v1189_v51 = vld [vmem:[#allocation1 + $0x3f] sm:$0xff] }
  0x1c   :  { %4830 = vmatpush.bf16.msra.mxu2 %v8072_v27  ;;  %v8117_v44 = vld [vmem:[%s10460_s1 + $0x1f0] sm:$0xff]  ;;  %v8100_v46 = vld [vmem:[%s10460_s1 + $0x168] sm:$0xff]  ;;  %v8091_v54 = vld [vmem:[%s10460_s1 + $0x120] sm:$0xff] }
  0x1d   :  { %4843 = vmatpush.bf16.msra.mxu3 %v8080_v28  ;;  %v8108_v47 = vld [vmem:[%s10460_s1 + $0x1a8] sm:$0xff]  ;;  %v1188_v49 = vld [vmem:[#allocation1 + $0x36] sm:$0xff]  ;;  %v8099_v55 = vld [vmem:[%s10460_s1 + $0x160] sm:$0xff] }
  0x1e   :  { %4805 = vmatpush.bf16.msra.mxu0 %v8055_v29  ;;  %v8116_v48 = vld [vmem:[%s10460_s1 + $0x1e8] sm:$0xff]  ;;  %v8107_v56 = vld [vmem:[%s10460_s1 + $0x1a0] sm:$0xff]  ;;  %v8090_v58 = vld [vmem:[%s10460_s1 + $0x118] sm:$0xff] }
  0x1f   :  { %4818 = vmatpush.bf16.msra.mxu1 %v8063_v30  ;;  %v1186_v50 = vld [vmem:[#allocation1 + $0x24] sm:$0xff]  ;;  %v1187_v53 = vld [vmem:[#allocation1 + $0x2d] sm:$0xff]  ;;  %v8098_v59 = vld [vmem:[%s10460_s1 + $0x158] sm:$0xff] }
  0x20   :  { %4831 = vmatpush.bf16.msra.mxu2 %v8071_v31  ;;  %v16_v52 = vld [vmem:[%s10459_s0 + $0x8] sm:$0xff]  ;;  %v8115_v57 = vld [vmem:[%s10460_s1 + $0x1e0] sm:$0xff]  ;;  %v8106_v60 = vld [vmem:[%s10460_s1 + $0x198] sm:$0xff] }
  0x21   :  { %4844 = vmatpush.bf16.msra.mxu3 %v8079_v32  ;;  %4806 = vmatmul.bf16.vlgmr.msra.gmra.mxu0 %v1182_v39  ;;  %1191 = vst [vmem:[#allocation1] ss:$9 sm:$0xff] %v16_v52  ;;  %v8114_v61 = vld [vmem:[%s10460_s1 + $0x1d8] sm:$0xff]  ;;  %v8089_v62 = vld [vmem:[%s10460_s1 + $0x110] sm:$0xff]  ;;  %v8088_v2 = vld [vmem:[%s10460_s1 + $0x108] sm:$0xff] }
  0x22   :  { %4850 = vmatpush.bf16.msrb.mxu0 %v8094_v33  ;;  %4819 = vmatmul.bf16.vlgmr.msra.gmra.mxu1 %v1183_v42  ;;  %v8097_v63 = vld [vmem:[%s10460_s1 + $0x150] sm:$0xff]  ;;  %v8096_v3 = vld [vmem:[%s10460_s1 + $0x148] sm:$0xff]  ;;  %v8087_v6 = vld [vmem:[%s10460_s1 + $0x100] sm:$0xff] }
  0x23   :  { %4863 = vmatpush.bf16.msrb.mxu1 %v8102_v34  ;;  %4832 = vmatmul.bf16.vlgmr.msra.gmra.mxu2 %v1184_v38  ;;  %v8105_v0 = vld [vmem:[%s10460_s1 + $0x190] sm:$0xff]  ;;  %v8104_v4 = vld [vmem:[%s10460_s1 + $0x188] sm:$0xff]  ;;  %v8095_v7 = vld [vmem:[%s10460_s1 + $0x140] sm:$0xff] }
  0x24   :  { %4876 = vmatpush.bf16.msrb.mxu2 %v8110_v35  ;;  %4845 = vmatmul.bf16.vlgmr.msra.gmra.mxu3 %v1185_v41  ;;  %v8113_v1 = vld [vmem:[%s10460_s1 + $0x1d0] sm:$0xff]  ;;  %v8112_v5 = vld [vmem:[%s10460_s1 + $0x1c8] sm:$0xff]  ;;  %v8103_v8 = vld [vmem:[%s10460_s1 + $0x180] sm:$0xff] }
  0x25   :  { %4889 = vmatpush.bf16.msrb.mxu3 %v8118_v36  ;;  %v8111_v9 = vld [vmem:[%s10460_s1 + $0x1c0] sm:$0xff]  ;;  %v8126_v10 = vld [vmem:[%s10460_s1 + $0x238] sm:$0xff]  ;;  %v8125_v14 = vld [vmem:[%s10460_s1 + $0x230] sm:$0xff] }
  0x26   :  { %4851 = vmatpush.bf16.msrb.mxu0 %v8093_v37  ;;  %v8134_v11 = vld [vmem:[%s10460_s1 + $0x278] sm:$0xff]  ;;  %v8133_v15 = vld [vmem:[%s10460_s1 + $0x270] sm:$0xff]  ;;  %v8124_v18 = vld [vmem:[%s10460_s1 + $0x228] sm:$0xff] }
  0x27   :  { %4864 = vmatpush.bf16.msrb.mxu1 %v8101_v40  ;;  %v8142_v12 = vld [vmem:[%s10460_s1 + $0x2b8] sm:$0xff]  ;;  %v8141_v16 = vld [vmem:[%s10460_s1 + $0x2b0] sm:$0xff]  ;;  %v8132_v19 = vld [vmem:[%s10460_s1 + $0x268] sm:$0xff] }
  0x28   :  { %4877 = vmatpush.bf16.msrb.mxu2 %v8109_v43  ;;  %v8150_v13 = vld [vmem:[%s10460_s1 + $0x2f8] sm:$0xff]  ;;  %v8149_v17 = vld [vmem:[%s10460_s1 + $0x2f0] sm:$0xff]  ;;  %v8140_v20 = vld [vmem:[%s10460_s1 + $0x2a8] sm:$0xff] }
  0x29   :  { %4890 = vmatpush.bf16.msrb.mxu3 %v8117_v44  ;;  %v8148_v21 = vld [vmem:[%s10460_s1 + $0x2e8] sm:$0xff]  ;;  %v8123_v22 = vld [vmem:[%s10460_s1 + $0x220] sm:$0xff]  ;;  %v8122_v26 = vld [vmem:[%s10460_s1 + $0x218] sm:$0xff] }
  0x2a   :  { %4852 = vmatpush.bf16.msrb.mxu0 %v8092_v45  ;;  %v8131_v23 = vld [vmem:[%s10460_s1 + $0x260] sm:$0xff]  ;;  %v8130_v27 = vld [vmem:[%s10460_s1 + $0x258] sm:$0xff]  ;;  %v8121_v30 = vld [vmem:[%s10460_s1 + $0x210] sm:$0xff] }
  0x2b   :  { %4865 = vmatpush.bf16.msrb.mxu1 %v8100_v46  ;;  %v8139_v24 = vld [vmem:[%s10460_s1 + $0x2a0] sm:$0xff]  ;;  %v8138_v28 = vld [vmem:[%s10460_s1 + $0x298] sm:$0xff]  ;;  %v8129_v31 = vld [vmem:[%s10460_s1 + $0x250] sm:$0xff] }
  0x2c   :  { %4878 = vmatpush.bf16.msrb.mxu2 %v8108_v47  ;;  %v8147_v25 = vld [vmem:[%s10460_s1 + $0x2e0] sm:$0xff]  ;;  %v8146_v29 = vld [vmem:[%s10460_s1 + $0x2d8] sm:$0xff]  ;;  %v8137_v32 = vld [vmem:[%s10460_s1 + $0x290] sm:$0xff] }
  0x2d   :  { %4891 = vmatpush.bf16.msrb.mxu3 %v8116_v48  ;;  %v8145_v33 = vld [vmem:[%s10460_s1 + $0x2d0] sm:$0xff]  ;;  %v8120_v34 = vld [vmem:[%s10460_s1 + $0x208] sm:$0xff]  ;;  %v8119_v38 = vld [vmem:[%s10460_s1 + $0x200] sm:$0xff] }
  0x2e   :  { %4853 = vmatpush.bf16.msrb.mxu0 %v8091_v54  ;;  %v8128_v35 = vld [vmem:[%s10460_s1 + $0x248] sm:$0xff]  ;;  %v8127_v39 = vld [vmem:[%s10460_s1 + $0x240] sm:$0xff]  ;;  %v8158_v42 = vld [vmem:[%s10460_s1 + $0x338] sm:$0xff] }
  0x2f   :  { %4866 = vmatpush.bf16.msrb.mxu1 %v8099_v55  ;;  %v8136_v36 = vld [vmem:[%s10460_s1 + $0x288] sm:$0xff]  ;;  %v8135_v40 = vld [vmem:[%s10460_s1 + $0x280] sm:$0xff]  ;;  %v8166_v43 = vld [vmem:[%s10460_s1 + $0x378] sm:$0xff] }
  0x30   :  { %4879 = vmatpush.bf16.msrb.mxu2 %v8107_v56  ;;  %v8144_v37 = vld [vmem:[%s10460_s1 + $0x2c8] sm:$0xff]  ;;  %v8143_v41 = vld [vmem:[%s10460_s1 + $0x2c0] sm:$0xff]  ;;  %v8174_v44 = vld [vmem:[%s10460_s1 + $0x3b8] sm:$0xff] }
  0x31   :  { %4892 = vmatpush.bf16.msrb.mxu3 %v8115_v57  ;;  %v8182_v45 = vld [vmem:[%s10460_s1 + $0x3f8] sm:$0xff]  ;;  %v1192_v46 = vld [vmem:[#allocation1] sm:$0xff]  ;;  %v1193_v48 = vld [vmem:[#allocation1 + $0x9] sm:$0xff] }
  0x32   :  { %4854 = vmatpush.bf16.msrb.mxu0 %v8090_v58  ;;  %v1194_v47 = vld [vmem:[#allocation1 + $0x12] sm:$0xff]  ;;  %v8156_v54 = vld [vmem:[%s10460_s1 + $0x328] sm:$0xff]  ;;  %v8155_v58 = vld [vmem:[%s10460_s1 + $0x320] sm:$0xff] }
  0x33   :  { %4867 = vmatpush.bf16.msrb.mxu1 %v8098_v59  ;;  %v8173_v52 = vld [vmem:[%s10460_s1 + $0x3b0] sm:$0xff]  ;;  %v8164_v55 = vld [vmem:[%s10460_s1 + $0x368] sm:$0xff]  ;;  %v8163_v59 = vld [vmem:[%s10460_s1 + $0x360] sm:$0xff] }
  0x34   :  { %4880 = vmatpush.bf16.msrb.mxu2 %v8106_v60  ;;  %v8172_v56 = vld [vmem:[%s10460_s1 + $0x3a8] sm:$0xff]  ;;  %v8171_v60 = vld [vmem:[%s10460_s1 + $0x3a0] sm:$0xff] }
  0x35   :  { %4893 = vmatpush.bf16.msrb.mxu3 %v8114_v61  ;;  %v8180_v57 = vld [vmem:[%s10460_s1 + $0x3e8] sm:$0xff]  ;;  %v8179_v61 = vld [vmem:[%s10460_s1 + $0x3e0] sm:$0xff] }
  0x36   :  { %4855 = vmatpush.bf16.msrb.mxu0 %v8089_v62  ;;  %v8154_v62 = vld [vmem:[%s10460_s1 + $0x318] sm:$0xff] }
  0x37   :  { %4868 = vmatpush.bf16.msrb.mxu1 %v8097_v63  ;;  %v8162_v63 = vld [vmem:[%s10460_s1 + $0x358] sm:$0xff] }
  0x38   :  { %4881 = vmatpush.bf16.msrb.mxu2 %v8105_v0  ;;  %v8170_v0 = vld [vmem:[%s10460_s1 + $0x398] sm:$0xff] }
  0x39   :  { %4894 = vmatpush.bf16.msrb.mxu3 %v8113_v1  ;;  %v8178_v1 = vld [vmem:[%s10460_s1 + $0x3d8] sm:$0xff] }
  0x3a   :  { %4856 = vmatpush.bf16.msrb.mxu0 %v8088_v2  ;;  %v8153_v2 = vld [vmem:[%s10460_s1 + $0x310] sm:$0xff] }
  0x3b   :  { %4869 = vmatpush.bf16.msrb.mxu1 %v8096_v3  ;;  %v8161_v3 = vld [vmem:[%s10460_s1 + $0x350] sm:$0xff] }
  0x3c   :  { %4882 = vmatpush.bf16.msrb.mxu2 %v8104_v4  ;;  %v8169_v4 = vld [vmem:[%s10460_s1 + $0x390] sm:$0xff] }
  0x3d   :  { %4895 = vmatpush.bf16.msrb.mxu3 %v8112_v5  ;;  %v8177_v5 = vld [vmem:[%s10460_s1 + $0x3d0] sm:$0xff] }
  0x3e   :  { %4857 = vmatpush.bf16.msrb.mxu0 %v8087_v6  ;;  %v8152_v6 = vld [vmem:[%s10460_s1 + $0x308] sm:$0xff] }
  0x3f   :  { %4870 = vmatpush.bf16.msrb.mxu1 %v8095_v7  ;;  %v8160_v7 = vld [vmem:[%s10460_s1 + $0x348] sm:$0xff] }
  0x40   :  { %4883 = vmatpush.bf16.msrb.mxu2 %v8103_v8  ;;  %v8168_v8 = vld [vmem:[%s10460_s1 + $0x388] sm:$0xff] }
  0x41   :  { %4896 = vmatpush.bf16.msrb.mxu3 %v8111_v9  ;;  %4858 = vmatmul.bf16.vlgmr.msrb.gmra.mxu0 %v1186_v50  ;;  %v8157_v50 = vld [vmem:[%s10460_s1 + $0x330] sm:$0xff]  ;;  %v8176_v9 = vld [vmem:[%s10460_s1 + $0x3c8] sm:$0xff] }
  0x42   :  { %4902 = vmatpush.bf16.msra.mxu0 %v8126_v10  ;;  %4871 = vmatmul.bf16.vlgmr.msrb.gmra.mxu1 %v1187_v53  ;;  %v8181_v53 = vld [vmem:[%s10460_s1 + $0x3f0] sm:$0xff]  ;;  %v1196_v10 = vld [vmem:[#allocation1 + $0x24] sm:$0xff] }
  0x43   :  { %4915 = vmatpush.bf16.msra.mxu1 %v8134_v11  ;;  %4884 = vmatmul.bf16.vlgmr.msrb.gmra.mxu2 %v1188_v49  ;;  %v1195_v49 = vld [vmem:[#allocation1 + $0x1b] sm:$0xff] }
  0x44   :  { %4928 = vmatpush.bf16.msra.mxu2 %v8142_v12  ;;  %4897 = vmatmul.bf16.vlgmr.msrb.gmra.mxu3 %v1189_v51  ;;  %v8165_v51 = vld [vmem:[%s10460_s1 + $0x370] sm:$0xff] }
  0x45   :  { %4941 = vmatpush.bf16.msra.mxu3 %v8150_v13  ;;  %v1198_v11 = vld [vmem:[#allocation1 + $0x36] sm:$0xff]  ;;  %v1197_v12 = vld [vmem:[#allocation1 + $0x2d] sm:$0xff]  ;;  %v1199_v13 = vld [vmem:[#allocation1 + $0x3f] sm:$0xff] }
  0x46   :  { %4903 = vmatpush.bf16.msra.mxu0 %v8125_v14  ;;  %v17_v14 = vld [vmem:[%s10459_s0 + $0x10] sm:$0xff] }
  0x47   :  { %4916 = vmatpush.bf16.msra.mxu1 %v8133_v15  ;;  %1201 = vst [vmem:[#allocation1] ss:$9 sm:$0xff] %v17_v14  ;;  %v8151_v15 = vld [vmem:[%s10460_s1 + $0x300] sm:$0xff]  ;;  %v8234_v14 = vld [vmem:[%s10460_s1 + $0x598] sm:$0xff] }
  0x48   :  { %4929 = vmatpush.bf16.msra.mxu2 %v8141_v16  ;;  %v8159_v16 = vld [vmem:[%s10460_s1 + $0x340] sm:$0xff] }
  0x49   :  { %4942 = vmatpush.bf16.msra.mxu3 %v8149_v17  ;;  %v8167_v17 = vld [vmem:[%s10460_s1 + $0x380] sm:$0xff] }
  0x4a   :  { %4904 = vmatpush.bf16.msra.mxu0 %v8124_v18  ;;  %v8175_v18 = vld [vmem:[%s10460_s1 + $0x3c0] sm:$0xff] }
  0x4b   :  { %4917 = vmatpush.bf16.msra.mxu1 %v8132_v19  ;;  %v8190_v19 = vld [vmem:[%s10460_s1 + $0x438] sm:$0xff] }
  0x4c   :  { %4930 = vmatpush.bf16.msra.mxu2 %v8140_v20  ;;  %v8198_v20 = vld [vmem:[%s10460_s1 + $0x478] sm:$0xff] }
  0x4d   :  { %4943 = vmatpush.bf16.msra.mxu3 %v8148_v21  ;;  %v8206_v21 = vld [vmem:[%s10460_s1 + $0x4b8] sm:$0xff] }
  0x4e   :  { %4905 = vmatpush.bf16.msra.mxu0 %v8123_v22  ;;  %v8214_v22 = vld [vmem:[%s10460_s1 + $0x4f8] sm:$0xff] }
  0x4f   :  { %4918 = vmatpush.bf16.msra.mxu1 %v8131_v23  ;;  %v8189_v23 = vld [vmem:[%s10460_s1 + $0x430] sm:$0xff] }
  0x50   :  { %4931 = vmatpush.bf16.msra.mxu2 %v8139_v24  ;;  %v8197_v24 = vld [vmem:[%s10460_s1 + $0x470] sm:$0xff] }
  0x51   :  { %4944 = vmatpush.bf16.msra.mxu3 %v8147_v25  ;;  %v8205_v25 = vld [vmem:[%s10460_s1 + $0x4b0] sm:$0xff] }
  0x52   :  { %4906 = vmatpush.bf16.msra.mxu0 %v8122_v26  ;;  %v8213_v26 = vld [vmem:[%s10460_s1 + $0x4f0] sm:$0xff] }
  0x53   :  { %4919 = vmatpush.bf16.msra.mxu1 %v8130_v27  ;;  %v8188_v27 = vld [vmem:[%s10460_s1 + $0x428] sm:$0xff] }
  0x54   :  { %4932 = vmatpush.bf16.msra.mxu2 %v8138_v28  ;;  %v8196_v28 = vld [vmem:[%s10460_s1 + $0x468] sm:$0xff] }
  0x55   :  { %4945 = vmatpush.bf16.msra.mxu3 %v8146_v29  ;;  %v8204_v29 = vld [vmem:[%s10460_s1 + $0x4a8] sm:$0xff] }
  0x56   :  { %4907 = vmatpush.bf16.msra.mxu0 %v8121_v30  ;;  %v8212_v30 = vld [vmem:[%s10460_s1 + $0x4e8] sm:$0xff] }
  0x57   :  { %4920 = vmatpush.bf16.msra.mxu1 %v8129_v31  ;;  %v8187_v31 = vld [vmem:[%s10460_s1 + $0x420] sm:$0xff] }
  0x58   :  { %4933 = vmatpush.bf16.msra.mxu2 %v8137_v32  ;;  %v8195_v32 = vld [vmem:[%s10460_s1 + $0x460] sm:$0xff] }
  0x59   :  { %4946 = vmatpush.bf16.msra.mxu3 %v8145_v33  ;;  %v8203_v33 = vld [vmem:[%s10460_s1 + $0x4a0] sm:$0xff] }
  0x5a   :  { %4908 = vmatpush.bf16.msra.mxu0 %v8120_v34  ;;  %v8211_v34 = vld [vmem:[%s10460_s1 + $0x4e0] sm:$0xff] }
  0x5b   :  { %4921 = vmatpush.bf16.msra.mxu1 %v8128_v35  ;;  %v8186_v35 = vld [vmem:[%s10460_s1 + $0x418] sm:$0xff] }
  0x5c   :  { %4934 = vmatpush.bf16.msra.mxu2 %v8136_v36  ;;  %v8194_v36 = vld [vmem:[%s10460_s1 + $0x458] sm:$0xff] }
  0x5d   :  { %4947 = vmatpush.bf16.msra.mxu3 %v8144_v37  ;;  %v8202_v37 = vld [vmem:[%s10460_s1 + $0x498] sm:$0xff] }
  0x5e   :  { %4909 = vmatpush.bf16.msra.mxu0 %v8119_v38  ;;  %v8210_v38 = vld [vmem:[%s10460_s1 + $0x4d8] sm:$0xff] }
  0x5f   :  { %4922 = vmatpush.bf16.msra.mxu1 %v8127_v39  ;;  %v8185_v39 = vld [vmem:[%s10460_s1 + $0x410] sm:$0xff] }
  0x60   :  { %4935 = vmatpush.bf16.msra.mxu2 %v8135_v40  ;;  %v8193_v40 = vld [vmem:[%s10460_s1 + $0x450] sm:$0xff] }
  0x61   :  { %4948 = vmatpush.bf16.msra.mxu3 %v8143_v41  ;;  %4910 = vmatmul.bf16.vlgmr.msra.gmra.mxu0 %v1192_v46  ;;  %v8201_v41 = vld [vmem:[%s10460_s1 + $0x490] sm:$0xff]  ;;  %v8208_v46 = vld [vmem:[%s10460_s1 + $0x4c8] sm:$0xff] }
  0x62   :  { %4954 = vmatpush.bf16.msrb.mxu0 %v8158_v42  ;;  %4923 = vmatmul.bf16.vlgmr.msra.gmra.mxu1 %v1193_v48  ;;  %v8209_v42 = vld [vmem:[%s10460_s1 + $0x4d0] sm:$0xff]  ;;  %v8191_v48 = vld [vmem:[%s10460_s1 + $0x440] sm:$0xff] }
  0x63   :  { %4967 = vmatpush.bf16.msrb.mxu1 %v8166_v43  ;;  %4936 = vmatmul.bf16.vlgmr.msra.gmra.mxu2 %v1194_v47  ;;  %v8184_v43 = vld [vmem:[%s10460_s1 + $0x408] sm:$0xff]  ;;  %v8183_v47 = vld [vmem:[%s10460_s1 + $0x400] sm:$0xff] }
  0x64   :  { %4980 = vmatpush.bf16.msrb.mxu2 %v8174_v44  ;;  %4949 = vmatmul.bf16.vlgmr.msra.gmra.mxu3 %v1195_v49  ;;  %v8192_v44 = vld [vmem:[%s10460_s1 + $0x448] sm:$0xff]  ;;  %v8199_v49 = vld [vmem:[%s10460_s1 + $0x480] sm:$0xff] }
  0x65   :  { %4993 = vmatpush.bf16.msrb.mxu3 %v8182_v45  ;;  %v8200_v45 = vld [vmem:[%s10460_s1 + $0x488] sm:$0xff] }
  0x66   :  { %4955 = vmatpush.bf16.msrb.mxu0 %v8157_v50  ;;  %v8207_v50 = vld [vmem:[%s10460_s1 + $0x4c0] sm:$0xff] }
  0x67   :  { %4968 = vmatpush.bf16.msrb.mxu1 %v8165_v51  ;;  %v8222_v51 = vld [vmem:[%s10460_s1 + $0x538] sm:$0xff] }
  0x68   :  { %4981 = vmatpush.bf16.msrb.mxu2 %v8173_v52  ;;  %v8230_v52 = vld [vmem:[%s10460_s1 + $0x578] sm:$0xff] }
  0x69   :  { %4994 = vmatpush.bf16.msrb.mxu3 %v8181_v53  ;;  %v8238_v53 = vld [vmem:[%s10460_s1 + $0x5b8] sm:$0xff] }
  0x6a   :  { %4956 = vmatpush.bf16.msrb.mxu0 %v8156_v54  ;;  %v8246_v54 = vld [vmem:[%s10460_s1 + $0x5f8] sm:$0xff] }
  0x6b   :  { %4969 = vmatpush.bf16.msrb.mxu1 %v8164_v55  ;;  %v1202_v55 = vld [vmem:[#allocation1] sm:$0xff] }
  0x6c   :  { %4982 = vmatpush.bf16.msrb.mxu2 %v8172_v56  ;;  %v1204_v56 = vld [vmem:[#allocation1 + $0x12] sm:$0xff] }
  0x6d   :  { %4995 = vmatpush.bf16.msrb.mxu3 %v8180_v57  ;;  %v1203_v57 = vld [vmem:[#allocation1 + $0x9] sm:$0xff] }
  0x6e   :  { %4957 = vmatpush.bf16.msrb.mxu0 %v8155_v58  ;;  %v1205_v58 = vld [vmem:[#allocation1 + $0x1b] sm:$0xff] }
  0x6f   :  { %4970 = vmatpush.bf16.msrb.mxu1 %v8163_v59  ;;  %v8221_v59 = vld [vmem:[%s10460_s1 + $0x530] sm:$0xff] }
  0x70   :  { %4983 = vmatpush.bf16.msrb.mxu2 %v8171_v60  ;;  %v8229_v60 = vld [vmem:[%s10460_s1 + $0x570] sm:$0xff] }
  0x71   :  { %4996 = vmatpush.bf16.msrb.mxu3 %v8179_v61  ;;  %v8237_v61 = vld [vmem:[%s10460_s1 + $0x5b0] sm:$0xff] }
  0x72   :  { %4958 = vmatpush.bf16.msrb.mxu0 %v8154_v62  ;;  %v8245_v62 = vld [vmem:[%s10460_s1 + $0x5f0] sm:$0xff] }
  0x73   :  { %4971 = vmatpush.bf16.msrb.mxu1 %v8162_v63  ;;  %v8220_v63 = vld [vmem:[%s10460_s1 + $0x528] sm:$0xff] }
  0x74   :  { %4984 = vmatpush.bf16.msrb.mxu2 %v8170_v0  ;;  %v8228_v0 = vld [vmem:[%s10460_s1 + $0x568] sm:$0xff] }
  0x75   :  { %4997 = vmatpush.bf16.msrb.mxu3 %v8178_v1  ;;  %v8632_v1 = vld [vmem:[%s10461_s2] ss:$0 sm:$0xff] }
  0x76   :  { %4959 = vmatpush.bf16.msrb.mxu0 %v8153_v2  ;;  %v8236_v2 = vld [vmem:[%s10460_s1 + $0x5a8] sm:$0xff] }
  0x77   :  { %4972 = vmatpush.bf16.msrb.mxu1 %v8161_v3  ;;  %v8244_v3 = vld [vmem:[%s10460_s1 + $0x5e8] sm:$0xff] }
  0x78   :  { %4985 = vmatpush.bf16.msrb.mxu2 %v8169_v4 }
  0x79   :  { %4998 = vmatpush.bf16.msrb.mxu3 %v8177_v5  ;;  %v8219_v5 = vld [vmem:[%s10460_s1 + $0x520] sm:$0xff] }
  0x7a   :  { %4960 = vmatpush.bf16.msrb.mxu0 %v8152_v6  ;;  %v8227_v6 = vld [vmem:[%s10460_s1 + $0x560] sm:$0xff] }
  0x7b   :  { %4973 = vmatpush.bf16.msrb.mxu1 %v8160_v7 }
  0x7c   :  { %4986 = vmatpush.bf16.msrb.mxu2 %v8168_v8 }
  0x7d   :  { %4999 = vmatpush.bf16.msrb.mxu3 %v8176_v9  ;;  %v8235_v9 = vld [vmem:[%s10460_s1 + $0x5a0] sm:$0xff] }
  0x7e   :  { %4961 = vmatpush.bf16.msrb.mxu0 %v8151_v15  ;;  %v8242_v15 = vld [vmem:[%s10460_s1 + $0x5d8] sm:$0xff] }
  0x7f   :  { %4974 = vmatpush.bf16.msrb.mxu1 %v8159_v16 }
  0x80   :  { %4987 = vmatpush.bf16.msrb.mxu2 %v8167_v17 }
  0x81   :  { %5000 = vmatpush.bf16.msrb.mxu3 %v8175_v18  ;;  %4962 = vmatmul.bf16.vlgmr.msrb.gmra.mxu0 %v1196_v10  ;;  %v8243_v10 = vld [vmem:[%s10460_s1 + $0x5e0] sm:$0xff] }
  0x82   :  { %5006 = vmatpush.bf16.msra.mxu0 %v8190_v19  ;;  %4975 = vmatmul.bf16.vlgmr.msrb.gmra.mxu1 %v1197_v12  ;;  %v8218_v12 = vld [vmem:[%s10460_s1 + $0x518] sm:$0xff] }
  0x83   :  { %5019 = vmatpush.bf16.msra.mxu1 %v8198_v20  ;;  %4988 = vmatmul.bf16.vlgmr.msrb.gmra.mxu2 %v1198_v11  ;;  %v8217_v20 = vld [vmem:[%s10460_s1 + $0x510] sm:$0xff] }
  0x84   :  { %5032 = vmatpush.bf16.msra.mxu2 %v8206_v21  ;;  %5001 = vmatmul.bf16.vlgmr.msrb.gmra.mxu3 %v1199_v13  ;;  %v8226_v13 = vld [vmem:[%s10460_s1 + $0x558] sm:$0xff]  ;;  %v8225_v21 = vld [vmem:[%s10460_s1 + $0x550] sm:$0xff] }
  0x85   :  { %5045 = vmatpush.bf16.msra.mxu3 %v8214_v22 }
  0x86   :  { %5007 = vmatpush.bf16.msra.mxu0 %v8189_v23 }
  0x87   :  { %5020 = vmatpush.bf16.msra.mxu1 %v8197_v24  ;;  %v8233_v24 = vld [vmem:[%s10460_s1 + $0x590] sm:$0xff] }
  0x88   :  { %5033 = vmatpush.bf16.msra.mxu2 %v8205_v25  ;;  %v8241_v25 = vld [vmem:[%s10460_s1 + $0x5d0] sm:$0xff] }
  0x89   :  { %5046 = vmatpush.bf16.msra.mxu3 %v8213_v26  ;;  %v8216_v26 = vld [vmem:[%s10460_s1 + $0x508] sm:$0xff] }
  0x8a   :  { %5008 = vmatpush.bf16.msra.mxu0 %v8188_v27  ;;  %v8224_v27 = vld [vmem:[%s10460_s1 + $0x548] sm:$0xff] }
  0x8b   :  { %5021 = vmatpush.bf16.msra.mxu1 %v8196_v28  ;;  %v8232_v28 = vld [vmem:[%s10460_s1 + $0x588] sm:$0xff] }
  0x8c   :  { %5034 = vmatpush.bf16.msra.mxu2 %v8204_v29  ;;  %v8240_v29 = vld [vmem:[%s10460_s1 + $0x5c8] sm:$0xff] }
  0x8d   :  { %5047 = vmatpush.bf16.msra.mxu3 %v8212_v30  ;;  %v1206_v30 = vld [vmem:[#allocation1 + $0x24] sm:$0xff] }
  0x8e   :  { %5009 = vmatpush.bf16.msra.mxu0 %v8187_v31  ;;  %v1208_v31 = vld [vmem:[#allocation1 + $0x36] sm:$0xff] }
  0x8f   :  { %5022 = vmatpush.bf16.msra.mxu1 %v8195_v32 }
  0x90   :  { %5035 = vmatpush.bf16.msra.mxu2 %v8203_v33  ;;  %v1207_v33 = vld [vmem:[#allocation1 + $0x2d] sm:$0xff] }
  0x91   :  { %5048 = vmatpush.bf16.msra.mxu3 %v8211_v34  ;;  %v1209_v34 = vld [vmem:[#allocation1 + $0x3f] sm:$0xff] }
  0x92   :  { %5010 = vmatpush.bf16.msra.mxu0 %v8186_v35 }
  0x93   :  { %5023 = vmatpush.bf16.msra.mxu1 %v8194_v36  ;;  %v18_v36 = vld [vmem:[%s10459_s0 + $0x18] sm:$0xff] }
  0x94   :  { %5036 = vmatpush.bf16.msra.mxu2 %v8202_v37  ;;  %1211 = vst [vmem:[#allocation1] ss:$9 sm:$0xff] %v18_v36  ;;  %v8215_v37 = vld [vmem:[%s10460_s1 + $0x500] sm:$0xff]  ;;  %v8308_v36 = vld [vmem:[%s10460_s1 + $0x7e8] sm:$0xff] }
  0x95   :  { %5049 = vmatpush.bf16.msra.mxu3 %v8210_v38  ;;  %v8223_v38 = vld [vmem:[%s10460_s1 + $0x540] sm:$0xff] }
  0x96   :  { %5011 = vmatpush.bf16.msra.mxu0 %v8185_v39  ;;  %v8231_v39 = vld [vmem:[%s10460_s1 + $0x580] sm:$0xff] }
  0x97   :  { %5024 = vmatpush.bf16.msra.mxu1 %v8193_v40  ;;  %v8239_v40 = vld [vmem:[%s10460_s1 + $0x5c0] sm:$0xff] }
  0x98   :  { %5037 = vmatpush.bf16.msra.mxu2 %v8201_v41  ;;  %v8254_v41 = vld [vmem:[%s10460_s1 + $0x638] sm:$0xff] }
  0x99   :  { %5050 = vmatpush.bf16.msra.mxu3 %v8209_v42  ;;  %v8262_v42 = vld [vmem:[%s10460_s1 + $0x678] sm:$0xff] }
  0x9a   :  { %5012 = vmatpush.bf16.msra.mxu0 %v8184_v43  ;;  %v8270_v43 = vld [vmem:[%s10460_s1 + $0x6b8] sm:$0xff] }
  0x9b   :  { %5025 = vmatpush.bf16.msra.mxu1 %v8192_v44  ;;  %v8278_v44 = vld [vmem:[%s10460_s1 + $0x6f8] sm:$0xff] }
  0x9c   :  { %5038 = vmatpush.bf16.msra.mxu2 %v8200_v45  ;;  %v8253_v45 = vld [vmem:[%s10460_s1 + $0x630] sm:$0xff] }
  0x9d   :  { %5051 = vmatpush.bf16.msra.mxu3 %v8208_v46  ;;  %v8261_v46 = vld [vmem:[%s10460_s1 + $0x670] sm:$0xff] }
  0x9e   :  { %5013 = vmatpush.bf16.msra.mxu0 %v8183_v47  ;;  %v4807_v4 = vpop.f32.mrf.mxu0  ;;  %v8269_v47 = vld [vmem:[%s10460_s1 + $0x6b0] sm:$0xff] }
  0x9f   :  { %5026 = vmatpush.bf16.msra.mxu1 %v8191_v48  ;;  %v4808_v7 = vadd.f32 %v8632_v1, %v4807_v4  ;;  %v4820_v8 = vpop.f32.mrf.mxu1  ;;  %v8277_v48 = vld [vmem:[%s10460_s1 + $0x6f0] sm:$0xff] }
  0xa0   :  { %5039 = vmatpush.bf16.msra.mxu2 %v8199_v49  ;;  %v8252_v49 = vld [vmem:[%s10460_s1 + $0x628] sm:$0xff] }
  0xa1   :  { %5052 = vmatpush.bf16.msra.mxu3 %v8207_v50  ;;  %5014 = vmatmul.bf16.vlgmr.msra.gmra.mxu0 %v1202_v55  ;;  %v4821_v11 = vadd.f32 %v4820_v8, %v4808_v7  ;;  %v8260_v50 = vld [vmem:[%s10460_s1 + $0x668] sm:$0xff]  ;;  %v8259_v55 = vld [vmem:[%s10460_s1 + $0x660] sm:$0xff] }
  0xa2   :  { %5058 = vmatpush.bf16.msrb.mxu0 %v8222_v51  ;;  %5027 = vmatmul.bf16.vlgmr.msra.gmra.mxu1 %v1203_v57  ;;  %v8268_v51 = vld [vmem:[%s10460_s1 + $0x6a8] sm:$0xff] }
  0xa3   :  { %5071 = vmatpush.bf16.msrb.mxu1 %v8230_v52  ;;  %5040 = vmatmul.bf16.vlgmr.msra.gmra.mxu2 %v1204_v56  ;;  %v8276_v52 = vld [vmem:[%s10460_s1 + $0x6e8] sm:$0xff] }
  0xa4   :  { %5084 = vmatpush.bf16.msrb.mxu2 %v8238_v53  ;;  %5053 = vmatmul.bf16.vlgmr.msra.gmra.mxu3 %v1205_v58  ;;  %v8267_v58 = vld [vmem:[%s10460_s1 + $0x6a0] sm:$0xff] }
  0xa5   :  { %5097 = vmatpush.bf16.msrb.mxu3 %v8246_v54  ;;  %v8251_v54 = vld [vmem:[%s10460_s1 + $0x620] sm:$0xff] }
  0xa6   :  { %5059 = vmatpush.bf16.msrb.mxu0 %v8221_v59  ;;  %v4833_v16 = vpop.f32.mrf.mxu2  ;;  %v4809_v19 = vpop.f32.mrf.mxu0  ;;  %v8275_v59 = vld [vmem:[%s10460_s1 + $0x6e0] sm:$0xff] }
  0xa7   :  { %5072 = vmatpush.bf16.msrb.mxu1 %v8229_v60  ;;  %v4834_v17 = vadd.f32 %v4833_v16, %v4821_v11  ;;  %v4846_v18 = vpop.f32.mrf.mxu3  ;;  %v4822_v23 = vpop.f32.mrf.mxu1  ;;  %v8248_v11 = vld [vmem:[%s10460_s1 + $0x608] sm:$0xff]  ;;  %v8263_v19 = vld [vmem:[%s10460_s1 + $0x680] sm:$0xff] }
  0xa8   :  { %5085 = vmatpush.bf16.msrb.mxu2 %v8237_v61  ;;  %v8250_v61 = vld [vmem:[%s10460_s1 + $0x618] sm:$0xff] }
  0xa9   :  { %5098 = vmatpush.bf16.msrb.mxu3 %v8245_v62  ;;  %v9238_v22 = vadd.f32 %v4846_v18, %v4834_v17  ;;  %v8258_v62 = vld [vmem:[%s10460_s1 + $0x658] sm:$0xff]  ;;  %v8247_v17 = vld [vmem:[%s10460_s1 + $0x600] sm:$0xff] }
  0xaa   :  { %5060 = vmatpush.bf16.msrb.mxu0 %v8220_v63  ;;  %v8266_v63 = vld [vmem:[%s10460_s1 + $0x698] sm:$0xff]  ;;  %v8255_v18 = vld [vmem:[%s10460_s1 + $0x640] sm:$0xff] }
  0xab   :  { %5073 = vmatpush.bf16.msrb.mxu1 %v8228_v0  ;;  %v8274_v0 = vld [vmem:[%s10460_s1 + $0x6d8] sm:$0xff] }
  0xac   :  { %5086 = vmatpush.bf16.msrb.mxu2 %v8236_v2  ;;  %v8302_v23 = vld [vmem:[%s10460_s1 + $0x7b8] sm:$0xff] }
  0xad   :  { %5099 = vmatpush.bf16.msrb.mxu3 %v8244_v3 }
  0xae   :  { %5061 = vmatpush.bf16.msrb.mxu0 %v8219_v5  ;;  %v4835_v32 = vpop.f32.mrf.mxu2  ;;  %v8249_v5 = vld [vmem:[%s10460_s1 + $0x610] sm:$0xff] }
  0xaf   :  { %5074 = vmatpush.bf16.msrb.mxu1 %v8227_v6  ;;  %v4848_v35 = vpop.f32.mrf.mxu3  ;;  %v8257_v6 = vld [vmem:[%s10460_s1 + $0x650] sm:$0xff] }
  0xb0   :  { %5087 = vmatpush.bf16.msrb.mxu2 %v8235_v9  ;;  %v8265_v9 = vld [vmem:[%s10460_s1 + $0x690] sm:$0xff]  ;;  %v8300_v35 = vld [vmem:[%s10460_s1 + $0x7a8] sm:$0xff] }
  0xb1   :  { %5100 = vmatpush.bf16.msrb.mxu3 %v8243_v10  ;;  %v8273_v10 = vld [vmem:[%s10460_s1 + $0x6d0] sm:$0xff] }
  0xb2   :  { %5062 = vmatpush.bf16.msrb.mxu0 %v8218_v12  ;;  %v8256_v12 = vld [vmem:[%s10460_s1 + $0x648] sm:$0xff]  ;;  %v8309_v32 = vld [vmem:[%s10460_s1 + $0x7f0] sm:$0xff] }
  0xb3   :  { %5075 = vmatpush.bf16.msrb.mxu1 %v8226_v13  ;;  %v8264_v13 = vld [vmem:[%s10460_s1 + $0x688] sm:$0xff] }
  0xb4   :  { %5088 = vmatpush.bf16.msrb.mxu2 %v8234_v14  ;;  %v8272_v14 = vld [vmem:[%s10460_s1 + $0x6c8] sm:$0xff] }
  0xb5   :  { %5101 = vmatpush.bf16.msrb.mxu3 %v8242_v15 }
  0xb6   :  { %5063 = vmatpush.bf16.msrb.mxu0 %v8217_v20  ;;  %v8271_v20 = vld [vmem:[%s10460_s1 + $0x6c0] sm:$0xff] }
  0xb7   :  { %5076 = vmatpush.bf16.msrb.mxu1 %v8225_v21  ;;  %v8286_v21 = vld [vmem:[%s10460_s1 + $0x738] sm:$0xff] }
  0xb8   :  { %5089 = vmatpush.bf16.msrb.mxu2 %v8233_v24  ;;  %v8310_v24 = vld [vmem:[%s10460_s1 + $0x7f8] sm:$0xff] }
  0xb9   :  { %5102 = vmatpush.bf16.msrb.mxu3 %v8241_v25  ;;  %v1212_v25 = vld [vmem:[#allocation1] sm:$0xff] }
  0xba   :  { %5064 = vmatpush.bf16.msrb.mxu0 %v8216_v26  ;;  %v1214_v26 = vld [vmem:[#allocation1 + $0x12] sm:$0xff] }
  0xbb   :  { %5077 = vmatpush.bf16.msrb.mxu1 %v8224_v27  ;;  %v1213_v27 = vld [vmem:[#allocation1 + $0x9] sm:$0xff] }
  0xbc   :  { %5090 = vmatpush.bf16.msrb.mxu2 %v8232_v28  ;;  %v1215_v28 = vld [vmem:[#allocation1 + $0x1b] sm:$0xff] }
  0xbd   :  { %5103 = vmatpush.bf16.msrb.mxu3 %v8240_v29  ;;  %v8285_v29 = vld [vmem:[%s10460_s1 + $0x730] sm:$0xff] }
  0xbe   :  { %5065 = vmatpush.bf16.msrb.mxu0 %v8215_v37  ;;  %v4859_v53 = vpop.f32.mrf.mxu0 }
  0xbf   :  { %5078 = vmatpush.bf16.msrb.mxu1 %v8223_v38  ;;  %v4860_v56 = vadd.f32 %v4859_v53, %v9238_v22  ;;  %v4872_v57 = vpop.f32.mrf.mxu1  ;;  %v8294_v22 = vld [vmem:[%s10460_s1 + $0x778] sm:$0xff] }
  0xc0   :  { %5091 = vmatpush.bf16.msrb.mxu2 %v8231_v39  ;;  %v8283_v39 = vld [vmem:[%s10460_s1 + $0x720] sm:$0xff] }
  0xc1   :  { %5104 = vmatpush.bf16.msrb.mxu3 %v8239_v40  ;;  %5066 = vmatmul.bf16.vlgmr.msrb.gmra.mxu0 %v1206_v30  ;;  %v4873_v60 = vadd.f32 %v4872_v57, %v4860_v56  ;;  %v8293_v30 = vld [vmem:[%s10460_s1 + $0x770] sm:$0xff]  ;;  %v8291_v40 = vld [vmem:[%s10460_s1 + $0x760] sm:$0xff] }
  0xc2   :  { %5110 = vmatpush.bf16.msra.mxu0 %v8254_v41  ;;  %5079 = vmatmul.bf16.vlgmr.msrb.gmra.mxu1 %v1207_v33  ;;  %v8284_v33 = vld [vmem:[%s10460_s1 + $0x728] sm:$0xff]  ;;  %v8297_v57 = vld [vmem:[%s10460_s1 + $0x790] sm:$0xff] }
  0xc3   :  { %5123 = vmatpush.bf16.msra.mxu1 %v8262_v42  ;;  %5092 = vmatmul.bf16.vlgmr.msrb.gmra.mxu2 %v1208_v31  ;;  %v8301_v31 = vld [vmem:[%s10460_s1 + $0x7b0] sm:$0xff]  ;;  %v8299_v42 = vld [vmem:[%s10460_s1 + $0x7a0] sm:$0xff] }
  0xc4   :  { %5136 = vmatpush.bf16.msra.mxu2 %v8270_v43  ;;  %5105 = vmatmul.bf16.vlgmr.msrb.gmra.mxu3 %v1209_v34  ;;  %v8292_v34 = vld [vmem:[%s10460_s1 + $0x768] sm:$0xff]  ;;  %v8307_v43 = vld [vmem:[%s10460_s1 + $0x7e0] sm:$0xff] }
  0xc5   :  { %5149 = vmatpush.bf16.msra.mxu3 %v8278_v44 }
  0xc6   :  { %5111 = vmatpush.bf16.msra.mxu0 %v8253_v45  ;;  %v4885_v1 = vpop.f32.mrf.mxu2  ;;  %v4861_v4 = vpop.f32.mrf.mxu0  ;;  %v8282_v45 = vld [vmem:[%s10460_s1 + $0x718] sm:$0xff] }
  0xc7   :  { %5124 = vmatpush.bf16.msra.mxu1 %v8261_v46  ;;  %v4886_v2 = vadd.f32 %v4885_v1, %v4873_v60  ;;  %v4898_v3 = vpop.f32.mrf.mxu3  ;;  %v4874_v8 = vpop.f32.mrf.mxu1  ;;  %v8290_v46 = vld [vmem:[%s10460_s1 + $0x758] sm:$0xff]  ;;  %v8288_v60 = vld [vmem:[%s10460_s1 + $0x748] sm:$0xff] }
  0xc8   :  { %5137 = vmatpush.bf16.msra.mxu2 %v8269_v47  ;;  %v8298_v47 = vld [vmem:[%s10460_s1 + $0x798] sm:$0xff]  ;;  %v8295_v8 = vld [vmem:[%s10460_s1 + $0x780] sm:$0xff] }
  0xc9   :  { %5150 = vmatpush.bf16.msra.mxu3 %v8277_v48  ;;  %v4899_v7 = vadd.f32 %v4898_v3, %v4886_v2  ;;  %v8306_v48 = vld [vmem:[%s10460_s1 + $0x7d8] sm:$0xff]  ;;  %v1217_v2 = vld [vmem:[#allocation1 + $0x2d] sm:$0xff] }
  0xca   :  { %5112 = vmatpush.bf16.msra.mxu0 %v8252_v49  ;;  %v1219_v3 = vld [vmem:[#allocation1 + $0x3f] sm:$0xff] }
  0xcb   :  { %5125 = vmatpush.bf16.msra.mxu1 %v8260_v50 }
  0xcc   :  { %5138 = vmatpush.bf16.msra.mxu2 %v8268_v51 }
  0xcd   :  { %5151 = vmatpush.bf16.msra.mxu3 %v8276_v52 }
  0xce   :  { %5113 = vmatpush.bf16.msra.mxu0 %v8251_v54  ;;  %v4887_v15 = vpop.f32.mrf.mxu2  ;;  %v8281_v54 = vld [vmem:[%s10460_s1 + $0x710] sm:$0xff] }
  0xcf   :  { %5126 = vmatpush.bf16.msra.mxu1 %v8259_v55  ;;  %v4900_v16 = vpop.f32.mrf.mxu3  ;;  %v8289_v55 = vld [vmem:[%s10460_s1 + $0x750] sm:$0xff] }
  0xd0   :  { %5139 = vmatpush.bf16.msra.mxu2 %v8267_v58  ;;  %v8305_v58 = vld [vmem:[%s10460_s1 + $0x7d0] sm:$0xff] }
  0xd1   :  { %5152 = vmatpush.bf16.msra.mxu3 %v8275_v59  ;;  %v8280_v59 = vld [vmem:[%s10460_s1 + $0x708] sm:$0xff]  ;;  %v8325_v15 = vld [vmem:[%s10460_s1 + $0x870] sm:$0xff] }
  0xd2   :  { %5114 = vmatpush.bf16.msra.mxu0 %v8250_v61  ;;  %v8296_v61 = vld [vmem:[%s10460_s1 + $0x788] sm:$0xff]  ;;  %v8333_v16 = vld [vmem:[%s10460_s1 + $0x8b0] sm:$0xff] }
  0xd3   :  { %5127 = vmatpush.bf16.msra.mxu1 %v8258_v62  ;;  %v8304_v62 = vld [vmem:[%s10460_s1 + $0x7c8] sm:$0xff] }
  0xd4   :  { %5140 = vmatpush.bf16.msra.mxu2 %v8266_v63  ;;  %v1216_v63 = vld [vmem:[#allocation1 + $0x24] sm:$0xff] }
  0xd5   :  { %5153 = vmatpush.bf16.msra.mxu3 %v8274_v0  ;;  %v1218_v0 = vld [vmem:[#allocation1 + $0x36] sm:$0xff] }
  0xd6   :  { %5115 = vmatpush.bf16.msra.mxu0 %v8249_v5  ;;  %v19_v5 = vld [vmem:[%s10459_s0 + $0x20] sm:$0xff] }
  0xd7   :  { %5128 = vmatpush.bf16.msra.mxu1 %v8257_v6  ;;  %1221 = vst [vmem:[#allocation1] ss:$9 sm:$0xff] %v19_v5  ;;  %v8279_v6 = vld [vmem:[%s10460_s1 + $0x700] sm:$0xff]  ;;  %v8372_v5 = vld [vmem:[%s10460_s1 + $0x9e8] sm:$0xff] }
  0xd8   :  { %5141 = vmatpush.bf16.msra.mxu2 %v8265_v9  ;;  %v8303_v9 = vld [vmem:[%s10460_s1 + $0x7c0] sm:$0xff] }
  0xd9   :  { %5154 = vmatpush.bf16.msra.mxu3 %v8273_v10  ;;  %v8318_v10 = vld [vmem:[%s10460_s1 + $0x838] sm:$0xff] }
  0xda   :  { %5116 = vmatpush.bf16.msra.mxu0 %v8248_v11  ;;  %v8326_v11 = vld [vmem:[%s10460_s1 + $0x878] sm:$0xff] }
  0xdb   :  { %5129 = vmatpush.bf16.msra.mxu1 %v8256_v12  ;;  %v8334_v12 = vld [vmem:[%s10460_s1 + $0x8b8] sm:$0xff] }
  0xdc   :  { %5142 = vmatpush.bf16.msra.mxu2 %v8264_v13  ;;  %v8342_v13 = vld [vmem:[%s10460_s1 + $0x8f8] sm:$0xff] }
  0xdd   :  { %5155 = vmatpush.bf16.msra.mxu3 %v8272_v14  ;;  %v8317_v14 = vld [vmem:[%s10460_s1 + $0x830] sm:$0xff] }
  0xde   :  { %5117 = vmatpush.bf16.msra.mxu0 %v8247_v17  ;;  %v4911_v37 = vpop.f32.mrf.mxu0  ;;  %v8341_v17 = vld [vmem:[%s10460_s1 + $0x8f0] sm:$0xff] }
  0xdf   :  { %5130 = vmatpush.bf16.msra.mxu1 %v8255_v18  ;;  %v4912_v38 = vadd.f32 %v4911_v37, %v4899_v7  ;;  %v4924_v41 = vpop.f32.mrf.mxu1  ;;  %v8287_v7 = vld [vmem:[%s10460_s1 + $0x740] sm:$0xff]  ;;  %v8316_v18 = vld [vmem:[%s10460_s1 + $0x828] sm:$0xff] }
  0xe0   :  { %5143 = vmatpush.bf16.msra.mxu2 %v8263_v19  ;;  %v8324_v19 = vld [vmem:[%s10460_s1 + $0x868] sm:$0xff] }
  0xe1   :  { %5156 = vmatpush.bf16.msra.mxu3 %v8271_v20  ;;  %5118 = vmatmul.bf16.vlgmr.msra.gmra.mxu0 %v1212_v25  ;;  %v4925_v44 = vadd.f32 %v4924_v41, %v4912_v38  ;;  %v8332_v20 = vld [vmem:[%s10460_s1 + $0x8a8] sm:$0xff]  ;;  %v8323_v25 = vld [vmem:[%s10460_s1 + $0x860] sm:$0xff] }
  0xe2   :  { %5162 = vmatpush.bf16.msrb.mxu0 %v8286_v21  ;;  %5131 = vmatmul.bf16.vlgmr.msra.gmra.mxu1 %v1213_v27  ;;  %v8340_v21 = vld [vmem:[%s10460_s1 + $0x8e8] sm:$0xff]  ;;  %v8331_v27 = vld [vmem:[%s10460_s1 + $0x8a0] sm:$0xff] }
  0xe3   :  { %5175 = vmatpush.bf16.msrb.mxu1 %v8294_v22  ;;  %5144 = vmatmul.bf16.vlgmr.msra.gmra.mxu2 %v1214_v26 }
  0xe4   :  { %5188 = vmatpush.bf16.msrb.mxu2 %v8302_v23  ;;  %5157 = vmatmul.bf16.vlgmr.msra.gmra.mxu3 %v1215_v28  ;;  %v8339_v28 = vld [vmem:[%s10460_s1 + $0x8e0] sm:$0xff] }
  0xe5   :  { %5201 = vmatpush.bf16.msrb.mxu3 %v8310_v24  ;;  %v8315_v24 = vld [vmem:[%s10460_s1 + $0x820] sm:$0xff] }
  0xe6   :  { %5163 = vmatpush.bf16.msrb.mxu0 %v8285_v29  ;;  %v4937_v49 = vpop.f32.mrf.mxu2  ;;  %v4913_v52 = vpop.f32.mrf.mxu0 }
  0xe7   :  { %5176 = vmatpush.bf16.msrb.mxu1 %v8293_v30  ;;  %v4938_v50 = vadd.f32 %v4937_v49, %v4925_v44  ;;  %v4950_v51 = vpop.f32.mrf.mxu3  ;;  %v4926_v56 = vpop.f32.mrf.mxu1  ;;  %v8314_v30 = vld [vmem:[%s10460_s1 + $0x818] sm:$0xff]  ;;  %v8312_v44 = vld [vmem:[%s10460_s1 + $0x808] sm:$0xff]  ;;  %v8327_v52 = vld [vmem:[%s10460_s1 + $0x880] sm:$0xff] }
  0xe8   :  { %5189 = vmatpush.bf16.msrb.mxu2 %v8301_v31  ;;  %v8322_v31 = vld [vmem:[%s10460_s1 + $0x858] sm:$0xff] }
  0xe9   :  { %5202 = vmatpush.bf16.msrb.mxu3 %v8309_v32  ;;  %v9430_v53 = vadd.f32 %v4950_v51, %v4938_v50  ;;  %v8330_v32 = vld [vmem:[%s10460_s1 + $0x898] sm:$0xff]  ;;  %v8311_v50 = vld [vmem:[%s10460_s1 + $0x800] sm:$0xff] }
  0xea   :  { %5164 = vmatpush.bf16.msrb.mxu0 %v8284_v33  ;;  %v8338_v33 = vld [vmem:[%s10460_s1 + $0x8d8] sm:$0xff]  ;;  %v8319_v51 = vld [vmem:[%s10460_s1 + $0x840] sm:$0xff] }
  0xeb   :  { %5177 = vmatpush.bf16.msrb.mxu1 %v8292_v34  ;;  %v8366_v56 = vld [vmem:[%s10460_s1 + $0x9b8] sm:$0xff] }
  0xec   :  { %5190 = vmatpush.bf16.msrb.mxu2 %v8300_v35 }
  0xed   :  { %5203 = vmatpush.bf16.msrb.mxu3 %v8308_v36 }
  0xee   :  { %5165 = vmatpush.bf16.msrb.mxu0 %v8283_v39  ;;  %v4939_v1 = vpop.f32.mrf.mxu2  ;;  %v8313_v39 = vld [vmem:[%s10460_s1 + $0x810] sm:$0xff] }
  0xef   :  { %5178 = vmatpush.bf16.msrb.mxu1 %v8291_v40  ;;  %v4952_v4 = vpop.f32.mrf.mxu3  ;;  %v8321_v40 = vld [vmem:[%s10460_s1 + $0x850] sm:$0xff] }
  0xf0   :  { %5191 = vmatpush.bf16.msrb.mxu2 %v8299_v42  ;;  %v8329_v42 = vld [vmem:[%s10460_s1 + $0x890] sm:$0xff]  ;;  %v8364_v4 = vld [vmem:[%s10460_s1 + $0x9a8] sm:$0xff] }
  0xf1   :  { %5204 = vmatpush.bf16.msrb.mxu3 %v8307_v43  ;;  %v8337_v43 = vld [vmem:[%s10460_s1 + $0x8d0] sm:$0xff] }
  0xf2   :  { %5166 = vmatpush.bf16.msrb.mxu0 %v8282_v45  ;;  %v8320_v45 = vld [vmem:[%s10460_s1 + $0x848] sm:$0xff]  ;;  %v8373_v1 = vld [vmem:[%s10460_s1 + $0x9f0] sm:$0xff] }
  0xf3   :  { %5179 = vmatpush.bf16.msrb.mxu1 %v8290_v46  ;;  %v8328_v46 = vld [vmem:[%s10460_s1 + $0x888] sm:$0xff] }
  0xf4   :  { %5192 = vmatpush.bf16.msrb.mxu2 %v8298_v47  ;;  %v8336_v47 = vld [vmem:[%s10460_s1 + $0x8c8] sm:$0xff] }
  0xf5   :  { %5205 = vmatpush.bf16.msrb.mxu3 %v8306_v48 }
  0xf6   :  { %5167 = vmatpush.bf16.msrb.mxu0 %v8281_v54  ;;  %v8350_v54 = vld [vmem:[%s10460_s1 + $0x938] sm:$0xff] }
  0xf7   :  { %5180 = vmatpush.bf16.msrb.mxu1 %v8289_v55  ;;  %v8358_v55 = vld [vmem:[%s10460_s1 + $0x978] sm:$0xff] }
  0xf8   :  { %5193 = vmatpush.bf16.msrb.mxu2 %v8297_v57  ;;  %v8374_v57 = vld [vmem:[%s10460_s1 + $0x9f8] sm:$0xff] }
  0xf9   :  { %5206 = vmatpush.bf16.msrb.mxu3 %v8305_v58  ;;  %v1222_v58 = vld [vmem:[#allocation1] sm:$0xff] }
  0xfa   :  { %5168 = vmatpush.bf16.msrb.mxu0 %v8280_v59  ;;  %v1224_v59 = vld [vmem:[#allocation1 + $0x12] sm:$0xff] }
  0xfb   :  { %5181 = vmatpush.bf16.msrb.mxu1 %v8288_v60  ;;  %v1223_v60 = vld [vmem:[#allocation1 + $0x9] sm:$0xff] }
  0xfc   :  { %5194 = vmatpush.bf16.msrb.mxu2 %v8296_v61  ;;  %v1225_v61 = vld [vmem:[#allocation1 + $0x1b] sm:$0xff] }
  0xfd   :  { %5207 = vmatpush.bf16.msrb.mxu3 %v8304_v62  ;;  %v8349_v62 = vld [vmem:[%s10460_s1 + $0x930] sm:$0xff] }
  0xfe   :  { %5169 = vmatpush.bf16.msrb.mxu0 %v8279_v6  ;;  %v4963_v22 = vpop.f32.mrf.mxu0 }
  0xff   :  { %5182 = vmatpush.bf16.msrb.mxu1 %v8287_v7  ;;  %v4964_v23 = vadd.f32 %v4963_v22, %v9430_v53  ;;  %v4976_v26 = vpop.f32.mrf.mxu1  ;;  %v8335_v53 = vld [vmem:[%s10460_s1 + $0x8c0] sm:$0xff] }
 0x100   :  { %5195 = vmatpush.bf16.msrb.mxu2 %v8295_v8  ;;  %v8347_v8 = vld [vmem:[%s10460_s1 + $0x920] sm:$0xff] }
 0x101   :  { %5208 = vmatpush.bf16.msrb.mxu3 %v8303_v9  ;;  %5170 = vmatmul.bf16.vlgmr.msrb.gmra.mxu0 %v1216_v63  ;;  %v4977_v29 = vadd.f32 %v4976_v26, %v4964_v23  ;;  %v8357_v63 = vld [vmem:[%s10460_s1 + $0x970] sm:$0xff]  ;;  %v8355_v9 = vld [vmem:[%s10460_s1 + $0x960] sm:$0xff] }
 0x102   :  { %5214 = vmatpush.bf16.msra.mxu0 %v8318_v10  ;;  %5183 = vmatmul.bf16.vlgmr.msrb.gmra.mxu1 %v1217_v2  ;;  %v8348_v2 = vld [vmem:[%s10460_s1 + $0x928] sm:$0xff]  ;;  %v8345_v23 = vld [vmem:[%s10460_s1 + $0x910] sm:$0xff] }
 0x103   :  { %5227 = vmatpush.bf16.msra.mxu1 %v8326_v11  ;;  %5196 = vmatmul.bf16.vlgmr.msrb.gmra.mxu2 %v1218_v0  ;;  %v8365_v0 = vld [vmem:[%s10460_s1 + $0x9b0] sm:$0xff]  ;;  %v8363_v11 = vld [vmem:[%s10460_s1 + $0x9a0] sm:$0xff] }
 0x104   :  { %5240 = vmatpush.bf16.msra.mxu2 %v8334_v12  ;;  %5209 = vmatmul.bf16.vlgmr.msrb.gmra.mxu3 %v1219_v3  ;;  %v8356_v3 = vld [vmem:[%s10460_s1 + $0x968] sm:$0xff]  ;;  %v8371_v12 = vld [vmem:[%s10460_s1 + $0x9e0] sm:$0xff]  ;;  %v8361_v26 = vld [vmem:[%s10460_s1 + $0x990] sm:$0xff] }
 0x105   :  { %5253 = vmatpush.bf16.msra.mxu3 %v8342_v13 }
 0x106   :  { %5215 = vmatpush.bf16.msra.mxu0 %v8317_v14  ;;  %v4989_v34 = vpop.f32.mrf.mxu2  ;;  %v4965_v37 = vpop.f32.mrf.mxu0  ;;  %v8346_v14 = vld [vmem:[%s10460_s1 + $0x918] sm:$0xff] }
 0x107   :  { %5228 = vmatpush.bf16.msra.mxu1 %v8325_v15  ;;  %v4990_v35 = vadd.f32 %v4989_v34, %v4977_v29  ;;  %v5002_v36 = vpop.f32.mrf.mxu3  ;;  %v4978_v41 = vpop.f32.mrf.mxu1  ;;  %v8354_v15 = vld [vmem:[%s10460_s1 + $0x958] sm:$0xff]  ;;  %v8352_v29 = vld [vmem:[%s10460_s1 + $0x948] sm:$0xff] }
 0x108   :  { %5241 = vmatpush.bf16.msra.mxu2 %v8333_v16  ;;  %v8362_v16 = vld [vmem:[%s10460_s1 + $0x998] sm:$0xff]  ;;  %v8359_v41 = vld [vmem:[%s10460_s1 + $0x980] sm:$0xff] }
 0x109   :  { %5254 = vmatpush.bf16.msra.mxu3 %v8341_v17  ;;  %v5003_v38 = vadd.f32 %v5002_v36, %v4990_v35  ;;  %v8370_v17 = vld [vmem:[%s10460_s1 + $0x9d8] sm:$0xff]  ;;  %v1227_v35 = vld [vmem:[#allocation1 + $0x2d] sm:$0xff] }
 0x10a   :  { %5216 = vmatpush.bf16.msra.mxu0 %v8316_v18  ;;  %v1229_v36 = vld [vmem:[#allocation1 + $0x3f] sm:$0xff] }
 0x10b   :  { %5229 = vmatpush.bf16.msra.mxu1 %v8324_v19 }
 0x10c   :  { %5242 = vmatpush.bf16.msra.mxu2 %v8332_v20 }
 0x10d   :  { %5255 = vmatpush.bf16.msra.mxu3 %v8340_v21 }
 0x10e   :  { %5217 = vmatpush.bf16.msra.mxu0 %v8315_v24  ;;  %v4991_v48 = vpop.f32.mrf.mxu2  ;;  %v8353_v24 = vld [vmem:[%s10460_s1 + $0x950] sm:$0xff] }
 0x10f   :  { %5230 = vmatpush.bf16.msra.mxu1 %v8323_v25  ;;  %v5004_v49 = vpop.f32.mrf.mxu3  ;;  %v8389_v48 = vld [vmem:[%s10460_s1 + $0xa70] sm:$0xff] }
 0x110   :  { %5243 = vmatpush.bf16.msra.mxu2 %v8331_v27  ;;  %v8369_v27 = vld [vmem:[%s10460_s1 + $0x9d0] sm:$0xff] }
 0x111   :  { %5256 = vmatpush.bf16.msra.mxu3 %v8339_v28  ;;  %v8344_v28 = vld [vmem:[%s10460_s1 + $0x908] sm:$0xff]  ;;  %v8397_v49 = vld [vmem:[%s10460_s1 + $0xab0] sm:$0xff] }
 0x112   :  { %5218 = vmatpush.bf16.msra.mxu0 %v8314_v30  ;;  %v8360_v30 = vld [vmem:[%s10460_s1 + $0x988] sm:$0xff] }
 0x113   :  { %5231 = vmatpush.bf16.msra.mxu1 %v8322_v31  ;;  %v8368_v31 = vld [vmem:[%s10460_s1 + $0x9c8] sm:$0xff] }
 0x114   :  { %5244 = vmatpush.bf16.msra.mxu2 %v8330_v32  ;;  %v1226_v32 = vld [vmem:[#allocation1 + $0x24] sm:$0xff] }
 0x115   :  { %5257 = vmatpush.bf16.msra.mxu3 %v8338_v33  ;;  %v1228_v33 = vld [vmem:[#allocation1 + $0x36] sm:$0xff] }
 0x116   :  { %5219 = vmatpush.bf16.msra.mxu0 %v8313_v39  ;;  %v8343_v39 = vld [vmem:[%s10460_s1 + $0x900] sm:$0xff] }
 0x117   :  { %5232 = vmatpush.bf16.msra.mxu1 %v8321_v40  ;;  %v8351_v40 = vld [vmem:[%s10460_s1 + $0x940] sm:$0xff] }
 0x118   :  { %5245 = vmatpush.bf16.msra.mxu2 %v8329_v42  ;;  %v8367_v42 = vld [vmem:[%s10460_s1 + $0x9c0] sm:$0xff] }
 0x119   :  { %5258 = vmatpush.bf16.msra.mxu3 %v8337_v43  ;;  %v8382_v43 = vld [vmem:[%s10460_s1 + $0xa38] sm:$0xff] }
 0x11a   :  { %5220 = vmatpush.bf16.msra.mxu0 %v8312_v44  ;;  %v8390_v44 = vld [vmem:[%s10460_s1 + $0xa78] sm:$0xff] }
 0x11b   :  { %5233 = vmatpush.bf16.msra.mxu1 %v8320_v45  ;;  %v8398_v45 = vld [vmem:[%s10460_s1 + $0xab8] sm:$0xff] }
 0x11c   :  { %5246 = vmatpush.bf16.msra.mxu2 %v8328_v46  ;;  %v8406_v46 = vld [vmem:[%s10460_s1 + $0xaf8] sm:$0xff] }
 0x11d   :  { %5259 = vmatpush.bf16.msra.mxu3 %v8336_v47  ;;  %v8381_v47 = vld [vmem:[%s10460_s1 + $0xa30] sm:$0xff] }
 0x11e   :  { %5221 = vmatpush.bf16.msra.mxu0 %v8311_v50  ;;  %v5015_v6 = vpop.f32.mrf.mxu0  ;;  %v8405_v50 = vld [vmem:[%s10460_s1 + $0xaf0] sm:$0xff] }
 0x11f   :  { %5234 = vmatpush.bf16.msra.mxu1 %v8319_v51  ;;  %v5016_v7 = vadd.f32 %v5015_v6, %v5003_v38  ;;  %v5028_v10 = vpop.f32.mrf.mxu1  ;;  %v20_v38 = vld [vmem:[%s10459_s0 + $0x28] sm:$0xff] }
 0x120   :  { %5247 = vmatpush.bf16.msra.mxu2 %v8327_v52  ;;  %1231 = vst [vmem:[#allocation1] ss:$9 sm:$0xff] %v20_v38  ;;  %v8380_v51 = vld [vmem:[%s10460_s1 + $0xa28] sm:$0xff] }
 0x121   :  { %5260 = vmatpush.bf16.msra.mxu3 %v8335_v53  ;;  %5222 = vmatmul.bf16.vlgmr.msra.gmra.mxu0 %v1222_v58  ;;  %v5029_v13 = vadd.f32 %v5028_v10, %v5016_v7  ;;  %v8388_v52 = vld [vmem:[%s10460_s1 + $0xa68] sm:$0xff]  ;;  %v8387_v58 = vld [vmem:[%s10460_s1 + $0xa60] sm:$0xff] }
 0x122   :  { %5266 = vmatpush.bf16.msrb.mxu0 %v8350_v54  ;;  %5235 = vmatmul.bf16.vlgmr.msra.gmra.mxu1 %v1223_v60  ;;  %v8396_v53 = vld [vmem:[%s10460_s1 + $0xaa8] sm:$0xff]  ;;  %v8395_v60 = vld [vmem:[%s10460_s1 + $0xaa0] sm:$0xff] }
 0x123   :  { %5279 = vmatpush.bf16.msrb.mxu1 %v8358_v55  ;;  %5248 = vmatmul.bf16.vlgmr.msra.gmra.mxu2 %v1224_v59  ;;  %v8404_v54 = vld [vmem:[%s10460_s1 + $0xae8] sm:$0xff] }
 0x124   :  { %5292 = vmatpush.bf16.msrb.mxu2 %v8366_v56  ;;  %5261 = vmatmul.bf16.vlgmr.msra.gmra.mxu3 %v1225_v61  ;;  %v8403_v61 = vld [vmem:[%s10460_s1 + $0xae0] sm:$0xff]  ;;  %v8436_v38 = vld [vmem:[%s10460_s1 + $0xbe8] sm:$0xff] }
 0x125   :  { %5305 = vmatpush.bf16.msrb.mxu3 %v8374_v57  ;;  %v8379_v57 = vld [vmem:[%s10460_s1 + $0xa20] sm:$0xff] }
 0x126   :  { %5267 = vmatpush.bf16.msrb.mxu0 %v8349_v62  ;;  %v5041_v18 = vpop.f32.mrf.mxu2  ;;  %v5017_v21 = vpop.f32.mrf.mxu0 }
 0x127   :  { %5280 = vmatpush.bf16.msrb.mxu1 %v8357_v63  ;;  %v5042_v19 = vadd.f32 %v5041_v18, %v5029_v13  ;;  %v5054_v20 = vpop.f32.mrf.mxu3  ;;  %v5030_v25 = vpop.f32.mrf.mxu1  ;;  %v8378_v63 = vld [vmem:[%s10460_s1 + $0xa18] sm:$0xff]  ;;  %v8376_v13 = vld [vmem:[%s10460_s1 + $0xa08] sm:$0xff]  ;;  %v8391_v21 = vld [vmem:[%s10460_s1 + $0xa80] sm:$0xff] }
 0x128   :  { %5293 = vmatpush.bf16.msrb.mxu2 %v8365_v0  ;;  %v8386_v0 = vld [vmem:[%s10460_s1 + $0xa58] sm:$0xff] }
 0x129   :  { %5306 = vmatpush.bf16.msrb.mxu3 %v8373_v1  ;;  %v9628_v22 = vadd.f32 %v5054_v20, %v5042_v19  ;;  %v8394_v1 = vld [vmem:[%s10460_s1 + $0xa98] sm:$0xff]  ;;  %v8375_v19 = vld [vmem:[%s10460_s1 + $0xa00] sm:$0xff] }
 0x12a   :  { %5268 = vmatpush.bf16.msrb.mxu0 %v8348_v2  ;;  %v8402_v2 = vld [vmem:[%s10460_s1 + $0xad8] sm:$0xff]  ;;  %v8383_v20 = vld [vmem:[%s10460_s1 + $0xa40] sm:$0xff] }
 0x12b   :  { %5281 = vmatpush.bf16.msrb.mxu1 %v8356_v3  ;;  %v8430_v25 = vld [vmem:[%s10460_s1 + $0xbb8] sm:$0xff] }
 0x12c   :  { %5294 = vmatpush.bf16.msrb.mxu2 %v8364_v4 }
 0x12d   :  { %5307 = vmatpush.bf16.msrb.mxu3 %v8372_v5 }
 0x12e   :  { %5269 = vmatpush.bf16.msrb.mxu0 %v8347_v8  ;;  %v5043_v34 = vpop.f32.mrf.mxu2  ;;  %v8377_v8 = vld [vmem:[%s10460_s1 + $0xa10] sm:$0xff] }
 0x12f   :  { %5282 = vmatpush.bf16.msrb.mxu1 %v8355_v9  ;;  %v5056_v37 = vpop.f32.mrf.mxu3  ;;  %v8385_v9 = vld [vmem:[%s10460_s1 + $0xa50] sm:$0xff] }
 0x130   :  { %5295 = vmatpush.bf16.msrb.mxu2 %v8363_v11  ;;  %v8393_v11 = vld [vmem:[%s10460_s1 + $0xa90] sm:$0xff]  ;;  %v8428_v37 = vld [vmem:[%s10460_s1 + $0xba8] sm:$0xff] }
 0x131   :  { %5308 = vmatpush.bf16.msrb.mxu3 %v8371_v12  ;;  %v8401_v12 = vld [vmem:[%s10460_s1 + $0xad0] sm:$0xff] }
 0x132   :  { %5270 = vmatpush.bf16.msrb.mxu0 %v8346_v14  ;;  %v8384_v14 = vld [vmem:[%s10460_s1 + $0xa48] sm:$0xff]  ;;  %v8437_v34 = vld [vmem:[%s10460_s1 + $0xbf0] sm:$0xff] }
 0x133   :  { %5283 = vmatpush.bf16.msrb.mxu1 %v8354_v15  ;;  %v8392_v15 = vld [vmem:[%s10460_s1 + $0xa88] sm:$0xff] }
 0x134   :  { %5296 = vmatpush.bf16.msrb.mxu2 %v8362_v16  ;;  %v8400_v16 = vld [vmem:[%s10460_s1 + $0xac8] sm:$0xff] }
 0x135   :  { %5309 = vmatpush.bf16.msrb.mxu3 %v8370_v17 }
 0x136   :  { %5271 = vmatpush.bf16.msrb.mxu0 %v8345_v23  ;;  %v8414_v23 = vld [vmem:[%s10460_s1 + $0xb38] sm:$0xff] }
 0x137   :  { %5284 = vmatpush.bf16.msrb.mxu1 %v8353_v24  ;;  %v8422_v24 = vld [vmem:[%s10460_s1 + $0xb78] sm:$0xff] }
 0x138   :  { %5297 = vmatpush.bf16.msrb.mxu2 %v8361_v26  ;;  %v8438_v26 = vld [vmem:[%s10460_s1 + $0xbf8] sm:$0xff] }
 0x139   :  { %5310 = vmatpush.bf16.msrb.mxu3 %v8369_v27  ;;  %v1232_v27 = vld [vmem:[#allocation1] sm:$0xff] }
 0x13a   :  { %5272 = vmatpush.bf16.msrb.mxu0 %v8344_v28  ;;  %v1234_v28 = vld [vmem:[#allocation1 + $0x12] sm:$0xff] }
 0x13b   :  { %5285 = vmatpush.bf16.msrb.mxu1 %v8352_v29  ;;  %v1233_v29 = vld [vmem:[#allocation1 + $0x9] sm:$0xff] }
 0x13c   :  { %5298 = vmatpush.bf16.msrb.mxu2 %v8360_v30  ;;  %v1235_v30 = vld [vmem:[#allocation1 + $0x1b] sm:$0xff] }
 0x13d   :  { %5311 = vmatpush.bf16.msrb.mxu3 %v8368_v31  ;;  %v8413_v31 = vld [vmem:[%s10460_s1 + $0xb30] sm:$0xff] }
 0x13e   :  { %5273 = vmatpush.bf16.msrb.mxu0 %v8343_v39  ;;  %v5067_v55 = vpop.f32.mrf.mxu0 }
 0x13f   :  { %5286 = vmatpush.bf16.msrb.mxu1 %v8351_v40  ;;  %v5068_v56 = vadd.f32 %v5067_v55, %v9628_v22  ;;  %v5080_v59 = vpop.f32.mrf.mxu1  ;;  %v8399_v22 = vld [vmem:[%s10460_s1 + $0xac0] sm:$0xff] }
 0x140   :  { %5299 = vmatpush.bf16.msrb.mxu2 %v8359_v41  ;;  %v8411_v41 = vld [vmem:[%s10460_s1 + $0xb20] sm:$0xff] }
 0x141   :  { %5312 = vmatpush.bf16.msrb.mxu3 %v8367_v42  ;;  %5274 = vmatmul.bf16.vlgmr.msrb.gmra.mxu0 %v1226_v32  ;;  %v5081_v62 = vadd.f32 %v5080_v59, %v5068_v56  ;;  %v8421_v32 = vld [vmem:[%s10460_s1 + $0xb70] sm:$0xff]  ;;  %v8419_v42 = vld [vmem:[%s10460_s1 + $0xb60] sm:$0xff] }
 0x142   :  { %5318 = vmatpush.bf16.msra.mxu0 %v8382_v43  ;;  %5287 = vmatmul.bf16.vlgmr.msrb.gmra.mxu1 %v1227_v35  ;;  %v8412_v35 = vld [vmem:[%s10460_s1 + $0xb28] sm:$0xff]  ;;  %v8409_v56 = vld [vmem:[%s10460_s1 + $0xb10] sm:$0xff] }
 0x143   :  { %5331 = vmatpush.bf16.msra.mxu1 %v8390_v44  ;;  %5300 = vmatmul.bf16.vlgmr.msrb.gmra.mxu2 %v1228_v33  ;;  %v8429_v33 = vld [vmem:[%s10460_s1 + $0xbb0] sm:$0xff]  ;;  %v8427_v44 = vld [vmem:[%s10460_s1 + $0xba0] sm:$0xff] }
 0x144   :  { %5344 = vmatpush.bf16.msra.mxu2 %v8398_v45  ;;  %5313 = vmatmul.bf16.vlgmr.msrb.gmra.mxu3 %v1229_v36  ;;  %v8420_v36 = vld [vmem:[%s10460_s1 + $0xb68] sm:$0xff]  ;;  %v8435_v45 = vld [vmem:[%s10460_s1 + $0xbe0] sm:$0xff]  ;;  %v8425_v59 = vld [vmem:[%s10460_s1 + $0xb90] sm:$0xff] }
 0x145   :  { %5357 = vmatpush.bf16.msra.mxu3 %v8406_v46 }
 0x146   :  { %5319 = vmatpush.bf16.msra.mxu0 %v8381_v47  ;;  %v5093_v3 = vpop.f32.mrf.mxu2  ;;  %v5069_v6 = vpop.f32.mrf.mxu0  ;;  %v8410_v47 = vld [vmem:[%s10460_s1 + $0xb18] sm:$0xff] }
 0x147   :  { %5332 = vmatpush.bf16.msra.mxu1 %v8389_v48  ;;  %v5094_v4 = vadd.f32 %v5093_v3, %v5081_v62  ;;  %v5106_v5 = vpop.f32.mrf.mxu3  ;;  %v5082_v10 = vpop.f32.mrf.mxu1  ;;  %v8418_v48 = vld [vmem:[%s10460_s1 + $0xb58] sm:$0xff]  ;;  %v8416_v62 = vld [vmem:[%s10460_s1 + $0xb48] sm:$0xff] }
 0x148   :  { %5345 = vmatpush.bf16.msra.mxu2 %v8397_v49  ;;  %v8426_v49 = vld [vmem:[%s10460_s1 + $0xb98] sm:$0xff]  ;;  %v8423_v10 = vld [vmem:[%s10460_s1 + $0xb80] sm:$0xff] }
 0x149   :  { %5358 = vmatpush.bf16.msra.mxu3 %v8405_v50  ;;  %v5107_v7 = vadd.f32 %v5106_v5, %v5094_v4  ;;  %v8434_v50 = vld [vmem:[%s10460_s1 + $0xbd8] sm:$0xff]  ;;  %v1237_v4 = vld [vmem:[#allocation1 + $0x2d] sm:$0xff] }
 0x14a   :  { %5320 = vmatpush.bf16.msra.mxu0 %v8380_v51  ;;  %v1239_v5 = vld [vmem:[#allocation1 + $0x3f] sm:$0xff] }
 0x14b   :  { %5333 = vmatpush.bf16.msra.mxu1 %v8388_v52 }
 0x14c   :  { %5346 = vmatpush.bf16.msra.mxu2 %v8396_v53 }
 0x14d   :  { %5359 = vmatpush.bf16.msra.mxu3 %v8404_v54 }
 0x14e   :  { %5321 = vmatpush.bf16.msra.mxu0 %v8379_v57  ;;  %v5095_v17 = vpop.f32.mrf.mxu2  ;;  %v8417_v57 = vld [vmem:[%s10460_s1 + $0xb50] sm:$0xff] }
 0x14f   :  { %5334 = vmatpush.bf16.msra.mxu1 %v8387_v58  ;;  %v5108_v18 = vpop.f32.mrf.mxu3  ;;  %v8453_v17 = vld [vmem:[%s10460_s1 + $0xc70] sm:$0xff] }
 0x150   :  { %5347 = vmatpush.bf16.msra.mxu2 %v8395_v60  ;;  %v8433_v60 = vld [vmem:[%s10460_s1 + $0xbd0] sm:$0xff] }
 0x151   :  { %5360 = vmatpush.bf16.msra.mxu3 %v8403_v61  ;;  %v8408_v61 = vld [vmem:[%s10460_s1 + $0xb08] sm:$0xff]  ;;  %v8461_v18 = vld [vmem:[%s10460_s1 + $0xcb0] sm:$0xff] }
 0x152   :  { %5322 = vmatpush.bf16.msra.mxu0 %v8378_v63  ;;  %v8424_v63 = vld [vmem:[%s10460_s1 + $0xb88] sm:$0xff] }
 0x153   :  { %5335 = vmatpush.bf16.msra.mxu1 %v8386_v0  ;;  %v8432_v0 = vld [vmem:[%s10460_s1 + $0xbc8] sm:$0xff] }
 0x154   :  { %5348 = vmatpush.bf16.msra.mxu2 %v8394_v1  ;;  %v1236_v1 = vld [vmem:[#allocation1 + $0x24] sm:$0xff] }
 0x155   :  { %5361 = vmatpush.bf16.msra.mxu3 %v8402_v2  ;;  %v1238_v2 = vld [vmem:[#allocation1 + $0x36] sm:$0xff] }
 0x156   :  { %5323 = vmatpush.bf16.msra.mxu0 %v8377_v8  ;;  %v8407_v8 = vld [vmem:[%s10460_s1 + $0xb00] sm:$0xff] }
 0x157   :  { %5336 = vmatpush.bf16.msra.mxu1 %v8385_v9  ;;  %v8415_v9 = vld [vmem:[%s10460_s1 + $0xb40] sm:$0xff] }
 0x158   :  { %5349 = vmatpush.bf16.msra.mxu2 %v8393_v11  ;;  %v8431_v11 = vld [vmem:[%s10460_s1 + $0xbc0] sm:$0xff] }
 0x159   :  { %5362 = vmatpush.bf16.msra.mxu3 %v8401_v12  ;;  %v8446_v12 = vld [vmem:[%s10460_s1 + $0xc38] sm:$0xff] }
 0x15a   :  { %5324 = vmatpush.bf16.msra.mxu0 %v8376_v13  ;;  %v8454_v13 = vld [vmem:[%s10460_s1 + $0xc78] sm:$0xff] }
 0x15b   :  { %5337 = vmatpush.bf16.msra.mxu1 %v8384_v14  ;;  %v8462_v14 = vld [vmem:[%s10460_s1 + $0xcb8] sm:$0xff] }
 0x15c   :  { %5350 = vmatpush.bf16.msra.mxu2 %v8392_v15  ;;  %v8470_v15 = vld [vmem:[%s10460_s1 + $0xcf8] sm:$0xff] }
 0x15d   :  { %5363 = vmatpush.bf16.msra.mxu3 %v8400_v16  ;;  %v8445_v16 = vld [vmem:[%s10460_s1 + $0xc30] sm:$0xff] }
 0x15e   :  { %5325 = vmatpush.bf16.msra.mxu0 %v8375_v19  ;;  %v5119_v39 = vpop.f32.mrf.mxu0  ;;  %v8469_v19 = vld [vmem:[%s10460_s1 + $0xcf0] sm:$0xff] }
 0x15f   :  { %5338 = vmatpush.bf16.msra.mxu1 %v8383_v20  ;;  %v5120_v40 = vadd.f32 %v5119_v39, %v5107_v7  ;;  %v5132_v43 = vpop.f32.mrf.mxu1  ;;  %v21_v7 = vld [vmem:[%s10459_s0 + $0x30] sm:$0xff]  ;;  %v8444_v20 = vld [vmem:[%s10460_s1 + $0xc28] sm:$0xff] }
 0x160   :  { %5351 = vmatpush.bf16.msra.mxu2 %v8391_v21  ;;  %1241 = vst [vmem:[#allocation1] ss:$9 sm:$0xff] %v21_v7  ;;  %v8452_v21 = vld [vmem:[%s10460_s1 + $0xc68] sm:$0xff] }
 0x161   :  { %5364 = vmatpush.bf16.msra.mxu3 %v8399_v22  ;;  %5326 = vmatmul.bf16.vlgmr.msra.gmra.mxu0 %v1232_v27  ;;  %v5133_v46 = vadd.f32 %v5132_v43, %v5120_v40  ;;  %v8460_v22 = vld [vmem:[%s10460_s1 + $0xca8] sm:$0xff]  ;;  %v8451_v27 = vld [vmem:[%s10460_s1 + $0xc60] sm:$0xff] }
 0x162   :  { %5370 = vmatpush.bf16.msrb.mxu0 %v8414_v23  ;;  %5339 = vmatmul.bf16.vlgmr.msra.gmra.mxu1 %v1233_v29  ;;  %v8468_v23 = vld [vmem:[%s10460_s1 + $0xce8] sm:$0xff]  ;;  %v8459_v29 = vld [vmem:[%s10460_s1 + $0xca0] sm:$0xff] }
 0x163   :  { %5383 = vmatpush.bf16.msrb.mxu1 %v8422_v24  ;;  %5352 = vmatmul.bf16.vlgmr.msra.gmra.mxu2 %v1234_v28  ;;  %v8500_v7 = vld [vmem:[%s10460_s1 + $0xde8] sm:$0xff] }
 0x164   :  { %5396 = vmatpush.bf16.msrb.mxu2 %v8430_v25  ;;  %5365 = vmatmul.bf16.vlgmr.msra.gmra.mxu3 %v1235_v30  ;;  %v8467_v30 = vld [vmem:[%s10460_s1 + $0xce0] sm:$0xff] }
 0x165   :  { %5409 = vmatpush.bf16.msrb.mxu3 %v8438_v26  ;;  %v8443_v26 = vld [vmem:[%s10460_s1 + $0xc20] sm:$0xff] }
 0x166   :  { %5371 = vmatpush.bf16.msrb.mxu0 %v8413_v31  ;;  %v5145_v51 = vpop.f32.mrf.mxu2  ;;  %v5121_v54 = vpop.f32.mrf.mxu0 }
 0x167   :  { %5384 = vmatpush.bf16.msrb.mxu1 %v8421_v32  ;;  %v5146_v52 = vadd.f32 %v5145_v51, %v5133_v46  ;;  %v5158_v53 = vpop.f32.mrf.mxu3  ;;  %v5134_v58 = vpop.f32.mrf.mxu1  ;;  %v8442_v32 = vld [vmem:[%s10460_s1 + $0xc18] sm:$0xff]  ;;  %v8440_v46 = vld [vmem:[%s10460_s1 + $0xc08] sm:$0xff]  ;;  %v8455_v54 = vld [vmem:[%s10460_s1 + $0xc80] sm:$0xff] }
 0x168   :  { %5397 = vmatpush.bf16.msrb.mxu2 %v8429_v33  ;;  %v8450_v33 = vld [vmem:[%s10460_s1 + $0xc58] sm:$0xff] }
 0x169   :  { %5410 = vmatpush.bf16.msrb.mxu3 %v8437_v34  ;;  %v9826_v55 = vadd.f32 %v5158_v53, %v5146_v52  ;;  %v8458_v34 = vld [vmem:[%s10460_s1 + $0xc98] sm:$0xff]  ;;  %v8439_v52 = vld [vmem:[%s10460_s1 + $0xc00] sm:$0xff] }
 0x16a   :  { %5372 = vmatpush.bf16.msrb.mxu0 %v8412_v35  ;;  %v8466_v35 = vld [vmem:[%s10460_s1 + $0xcd8] sm:$0xff]  ;;  %v8447_v53 = vld [vmem:[%s10460_s1 + $0xc40] sm:$0xff] }
 0x16b   :  { %5385 = vmatpush.bf16.msrb.mxu1 %v8420_v36  ;;  %v8494_v58 = vld [vmem:[%s10460_s1 + $0xdb8] sm:$0xff] }
 0x16c   :  { %5398 = vmatpush.bf16.msrb.mxu2 %v8428_v37 }
 0x16d   :  { %5411 = vmatpush.bf16.msrb.mxu3 %v8436_v38 }
 0x16e   :  { %5373 = vmatpush.bf16.msrb.mxu0 %v8411_v41  ;;  %v5147_v3 = vpop.f32.mrf.mxu2  ;;  %v8441_v41 = vld [vmem:[%s10460_s1 + $0xc10] sm:$0xff] }
 0x16f   :  { %5386 = vmatpush.bf16.msrb.mxu1 %v8419_v42  ;;  %v5160_v6 = vpop.f32.mrf.mxu3  ;;  %v8449_v42 = vld [vmem:[%s10460_s1 + $0xc50] sm:$0xff] }
 0x170   :  { %5399 = vmatpush.bf16.msrb.mxu2 %v8427_v44  ;;  %v8457_v44 = vld [vmem:[%s10460_s1 + $0xc90] sm:$0xff]  ;;  %v8492_v6 = vld [vmem:[%s10460_s1 + $0xda8] sm:$0xff] }
 0x171   :  { %5412 = vmatpush.bf16.msrb.mxu3 %v8435_v45  ;;  %v8465_v45 = vld [vmem:[%s10460_s1 + $0xcd0] sm:$0xff] }
 0x172   :  { %5374 = vmatpush.bf16.msrb.mxu0 %v8410_v47  ;;  %v8448_v47 = vld [vmem:[%s10460_s1 + $0xc48] sm:$0xff]  ;;  %v8501_v3 = vld [vmem:[%s10460_s1 + $0xdf0] sm:$0xff] }
 0x173   :  { %5387 = vmatpush.bf16.msrb.mxu1 %v8418_v48  ;;  %v8456_v48 = vld [vmem:[%s10460_s1 + $0xc88] sm:$0xff] }
 0x174   :  { %5400 = vmatpush.bf16.msrb.mxu2 %v8426_v49  ;;  %v8464_v49 = vld [vmem:[%s10460_s1 + $0xcc8] sm:$0xff] }
 0x175   :  { %5413 = vmatpush.bf16.msrb.mxu3 %v8434_v50 }
 0x176   :  { %5375 = vmatpush.bf16.msrb.mxu0 %v8409_v56  ;;  %v8478_v56 = vld [vmem:[%s10460_s1 + $0xd38] sm:$0xff] }
 0x177   :  { %5388 = vmatpush.bf16.msrb.mxu1 %v8417_v57  ;;  %v8486_v57 = vld [vmem:[%s10460_s1 + $0xd78] sm:$0xff] }
 0x178   :  { %5401 = vmatpush.bf16.msrb.mxu2 %v8425_v59  ;;  %v8502_v59 = vld [vmem:[%s10460_s1 + $0xdf8] sm:$0xff] }
 0x179   :  { %5414 = vmatpush.bf16.msrb.mxu3 %v8433_v60  ;;  %v1242_v60 = vld [vmem:[#allocation1] sm:$0xff] }
 0x17a   :  { %5376 = vmatpush.bf16.msrb.mxu0 %v8408_v61  ;;  %v1244_v61 = vld [vmem:[#allocation1 + $0x12] sm:$0xff] }
 0x17b   :  { %5389 = vmatpush.bf16.msrb.mxu1 %v8416_v62  ;;  %v1243_v62 = vld [vmem:[#allocation1 + $0x9] sm:$0xff] }
 0x17c   :  { %5402 = vmatpush.bf16.msrb.mxu2 %v8424_v63  ;;  %v1245_v63 = vld [vmem:[#allocation1 + $0x1b] sm:$0xff] }
 0x17d   :  { %5415 = vmatpush.bf16.msrb.mxu3 %v8432_v0  ;;  %v8477_v0 = vld [vmem:[%s10460_s1 + $0xd30] sm:$0xff] }
 0x17e   :  { %5377 = vmatpush.bf16.msrb.mxu0 %v8407_v8  ;;  %v5171_v24 = vpop.f32.mrf.mxu0 }
 0x17f   :  { %5390 = vmatpush.bf16.msrb.mxu1 %v8415_v9  ;;  %v5172_v25 = vadd.f32 %v5171_v24, %v9826_v55  ;;  %v5184_v28 = vpop.f32.mrf.mxu1  ;;  %v8463_v55 = vld [vmem:[%s10460_s1 + $0xcc0] sm:$0xff] }
 0x180   :  { %5403 = vmatpush.bf16.msrb.mxu2 %v8423_v10  ;;  %v8475_v10 = vld [vmem:[%s10460_s1 + $0xd20] sm:$0xff] }
 0x181   :  { %5416 = vmatpush.bf16.msrb.mxu3 %v8431_v11  ;;  %5378 = vmatmul.bf16.vlgmr.msrb.gmra.mxu0 %v1236_v1  ;;  %v5185_v31 = vadd.f32 %v5184_v28, %v5172_v25  ;;  %v8485_v1 = vld [vmem:[%s10460_s1 + $0xd70] sm:$0xff]  ;;  %v8483_v11 = vld [vmem:[%s10460_s1 + $0xd60] sm:$0xff] }
 0x182   :  { %5422 = vmatpush.bf16.msra.mxu0 %v8446_v12  ;;  %5391 = vmatmul.bf16.vlgmr.msrb.gmra.mxu1 %v1237_v4  ;;  %v8476_v4 = vld [vmem:[%s10460_s1 + $0xd28] sm:$0xff]  ;;  %v8473_v25 = vld [vmem:[%s10460_s1 + $0xd10] sm:$0xff] }
 0x183   :  { %5435 = vmatpush.bf16.msra.mxu1 %v8454_v13  ;;  %5404 = vmatmul.bf16.vlgmr.msrb.gmra.mxu2 %v1238_v2  ;;  %v8493_v2 = vld [vmem:[%s10460_s1 + $0xdb0] sm:$0xff]  ;;  %v8491_v13 = vld [vmem:[%s10460_s1 + $0xda0] sm:$0xff] }
 0x184   :  { %5448 = vmatpush.bf16.msra.mxu2 %v8462_v14  ;;  %5417 = vmatmul.bf16.vlgmr.msrb.gmra.mxu3 %v1239_v5  ;;  %v8484_v5 = vld [vmem:[%s10460_s1 + $0xd68] sm:$0xff]  ;;  %v8499_v14 = vld [vmem:[%s10460_s1 + $0xde0] sm:$0xff]  ;;  %v8489_v28 = vld [vmem:[%s10460_s1 + $0xd90] sm:$0xff] }
 0x185   :  { %5461 = vmatpush.bf16.msra.mxu3 %v8470_v15 }
 0x186   :  { %5423 = vmatpush.bf16.msra.mxu0 %v8445_v16  ;;  %v5197_v36 = vpop.f32.mrf.mxu2  ;;  %v5173_v39 = vpop.f32.mrf.mxu0  ;;  %v8474_v16 = vld [vmem:[%s10460_s1 + $0xd18] sm:$0xff] }
 0x187   :  { %5436 = vmatpush.bf16.msra.mxu1 %v8453_v17  ;;  %v5198_v37 = vadd.f32 %v5197_v36, %v5185_v31  ;;  %v5210_v38 = vpop.f32.mrf.mxu3  ;;  %v5186_v43 = vpop.f32.mrf.mxu1  ;;  %v8482_v17 = vld [vmem:[%s10460_s1 + $0xd58] sm:$0xff]  ;;  %v8480_v31 = vld [vmem:[%s10460_s1 + $0xd48] sm:$0xff] }
 0x188   :  { %5449 = vmatpush.bf16.msra.mxu2 %v8461_v18  ;;  %v8490_v18 = vld [vmem:[%s10460_s1 + $0xd98] sm:$0xff]  ;;  %v8487_v43 = vld [vmem:[%s10460_s1 + $0xd80] sm:$0xff] }
 0x189   :  { %5462 = vmatpush.bf16.msra.mxu3 %v8469_v19  ;;  %v5211_v40 = vadd.f32 %v5210_v38, %v5198_v37  ;;  %v8498_v19 = vld [vmem:[%s10460_s1 + $0xdd8] sm:$0xff]  ;;  %v1247_v37 = vld [vmem:[#allocation1 + $0x2d] sm:$0xff] }
 0x18a   :  { %5424 = vmatpush.bf16.msra.mxu0 %v8444_v20  ;;  %v1249_v38 = vld [vmem:[#allocation1 + $0x3f] sm:$0xff] }
 0x18b   :  { %5437 = vmatpush.bf16.msra.mxu1 %v8452_v21 }
 0x18c   :  { %5450 = vmatpush.bf16.msra.mxu2 %v8460_v22 }
 0x18d   :  { %5463 = vmatpush.bf16.msra.mxu3 %v8468_v23 }
 0x18e   :  { %5425 = vmatpush.bf16.msra.mxu0 %v8443_v26  ;;  %v5199_v50 = vpop.f32.mrf.mxu2  ;;  %v8481_v26 = vld [vmem:[%s10460_s1 + $0xd50] sm:$0xff] }
 0x18f   :  { %5438 = vmatpush.bf16.msra.mxu1 %v8451_v27  ;;  %v5212_v51 = vpop.f32.mrf.mxu3  ;;  %v8517_v50 = vld [vmem:[%s10460_s1 + $0xe70] sm:$0xff] }
 0x190   :  { %5451 = vmatpush.bf16.msra.mxu2 %v8459_v29  ;;  %v8497_v29 = vld [vmem:[%s10460_s1 + $0xdd0] sm:$0xff] }
 0x191   :  { %5464 = vmatpush.bf16.msra.mxu3 %v8467_v30  ;;  %v8472_v30 = vld [vmem:[%s10460_s1 + $0xd08] sm:$0xff]  ;;  %v8525_v51 = vld [vmem:[%s10460_s1 + $0xeb0] sm:$0xff] }
 0x192   :  { %5426 = vmatpush.bf16.msra.mxu0 %v8442_v32  ;;  %v8488_v32 = vld [vmem:[%s10460_s1 + $0xd88] sm:$0xff] }
 0x193   :  { %5439 = vmatpush.bf16.msra.mxu1 %v8450_v33  ;;  %v8496_v33 = vld [vmem:[%s10460_s1 + $0xdc8] sm:$0xff] }
 0x194   :  { %5452 = vmatpush.bf16.msra.mxu2 %v8458_v34  ;;  %v1246_v34 = vld [vmem:[#allocation1 + $0x24] sm:$0xff] }
 0x195   :  { %5465 = vmatpush.bf16.msra.mxu3 %v8466_v35  ;;  %v1248_v35 = vld [vmem:[#allocation1 + $0x36] sm:$0xff] }
 0x196   :  { %5427 = vmatpush.bf16.msra.mxu0 %v8441_v41  ;;  %v8471_v41 = vld [vmem:[%s10460_s1 + $0xd00] sm:$0xff] }
 0x197   :  { %5440 = vmatpush.bf16.msra.mxu1 %v8449_v42  ;;  %v8479_v42 = vld [vmem:[%s10460_s1 + $0xd40] sm:$0xff] }
 0x198   :  { %5453 = vmatpush.bf16.msra.mxu2 %v8457_v44  ;;  %v8495_v44 = vld [vmem:[%s10460_s1 + $0xdc0] sm:$0xff] }
 0x199   :  { %5466 = vmatpush.bf16.msra.mxu3 %v8465_v45  ;;  %v8510_v45 = vld [vmem:[%s10460_s1 + $0xe38] sm:$0xff] }
 0x19a   :  { %5428 = vmatpush.bf16.msra.mxu0 %v8440_v46  ;;  %v8518_v46 = vld [vmem:[%s10460_s1 + $0xe78] sm:$0xff] }
 0x19b   :  { %5441 = vmatpush.bf16.msra.mxu1 %v8448_v47  ;;  %v8526_v47 = vld [vmem:[%s10460_s1 + $0xeb8] sm:$0xff] }
 0x19c   :  { %5454 = vmatpush.bf16.msra.mxu2 %v8456_v48  ;;  %v8534_v48 = vld [vmem:[%s10460_s1 + $0xef8] sm:$0xff] }
 0x19d   :  { %5467 = vmatpush.bf16.msra.mxu3 %v8464_v49  ;;  %v8509_v49 = vld [vmem:[%s10460_s1 + $0xe30] sm:$0xff] }
 0x19e   :  { %5429 = vmatpush.bf16.msra.mxu0 %v8439_v52  ;;  %v5223_v8 = vpop.f32.mrf.mxu0  ;;  %v8533_v52 = vld [vmem:[%s10460_s1 + $0xef0] sm:$0xff] }
 0x19f   :  { %5442 = vmatpush.bf16.msra.mxu1 %v8447_v53  ;;  %v5224_v9 = vadd.f32 %v5223_v8, %v5211_v40  ;;  %v5236_v12 = vpop.f32.mrf.mxu1  ;;  %v22_v40 = vld [vmem:[%s10459_s0 + $0x38] sm:$0xff]  ;;  %v8508_v53 = vld [vmem:[%s10460_s1 + $0xe28] sm:$0xff] }
 0x1a0   :  { %5455 = vmatpush.bf16.msra.mxu2 %v8455_v54  ;;  %1251 = vst [vmem:[#allocation1] ss:$9 sm:$0xff] %v22_v40  ;;  %v8516_v54 = vld [vmem:[%s10460_s1 + $0xe68] sm:$0xff] }
 0x1a1   :  { %5468 = vmatpush.bf16.msra.mxu3 %v8463_v55  ;;  %5430 = vmatmul.bf16.vlgmr.msra.gmra.mxu0 %v1242_v60  ;;  %v5237_v15 = vadd.f32 %v5236_v12, %v5224_v9  ;;  %v8524_v55 = vld [vmem:[%s10460_s1 + $0xea8] sm:$0xff]  ;;  %v8515_v60 = vld [vmem:[%s10460_s1 + $0xe60] sm:$0xff] }
 0x1a2   :  { %5474 = vmatpush.bf16.msrb.mxu0 %v8478_v56  ;;  %5443 = vmatmul.bf16.vlgmr.msra.gmra.mxu1 %v1243_v62  ;;  %v8532_v56 = vld [vmem:[%s10460_s1 + $0xee8] sm:$0xff]  ;;  %v8523_v62 = vld [vmem:[%s10460_s1 + $0xea0] sm:$0xff] }
 0x1a3   :  { %5487 = vmatpush.bf16.msrb.mxu1 %v8486_v57  ;;  %5456 = vmatmul.bf16.vlgmr.msra.gmra.mxu2 %v1244_v61  ;;  %v8564_v40 = vld [vmem:[%s10460_s1 + $0xfe8] sm:$0xff] }
 0x1a4   :  { %5500 = vmatpush.bf16.msrb.mxu2 %v8494_v58  ;;  %5469 = vmatmul.bf16.vlgmr.msra.gmra.mxu3 %v1245_v63  ;;  %v8531_v63 = vld [vmem:[%s10460_s1 + $0xee0] sm:$0xff] }
 0x1a5   :  { %5513 = vmatpush.bf16.msrb.mxu3 %v8502_v59  ;;  %v8507_v59 = vld [vmem:[%s10460_s1 + $0xe20] sm:$0xff] }
 0x1a6   :  { %5475 = vmatpush.bf16.msrb.mxu0 %v8477_v0  ;;  %v5249_v20 = vpop.f32.mrf.mxu2  ;;  %v5225_v23 = vpop.f32.mrf.mxu0 }
 0x1a7   :  { %5488 = vmatpush.bf16.msrb.mxu1 %v8485_v1  ;;  %v5250_v21 = vadd.f32 %v5249_v20, %v5237_v15  ;;  %v5262_v22 = vpop.f32.mrf.mxu3  ;;  %v5238_v27 = vpop.f32.mrf.mxu1  ;;  %v8506_v1 = vld [vmem:[%s10460_s1 + $0xe18] sm:$0xff]  ;;  %v8504_v15 = vld [vmem:[%s10460_s1 + $0xe08] sm:$0xff]  ;;  %v8519_v23 = vld [vmem:[%s10460_s1 + $0xe80] sm:$0xff] }
 0x1a8   :  { %5501 = vmatpush.bf16.msrb.mxu2 %v8493_v2  ;;  %v8514_v2 = vld [vmem:[%s10460_s1 + $0xe58] sm:$0xff] }
 0x1a9   :  { %5514 = vmatpush.bf16.msrb.mxu3 %v8501_v3  ;;  %v10024_v24 = vadd.f32 %v5262_v22, %v5250_v21  ;;  %v8522_v3 = vld [vmem:[%s10460_s1 + $0xe98] sm:$0xff]  ;;  %v8503_v21 = vld [vmem:[%s10460_s1 + $0xe00] sm:$0xff] }
 0x1aa   :  { %5476 = vmatpush.bf16.msrb.mxu0 %v8476_v4  ;;  %v8530_v4 = vld [vmem:[%s10460_s1 + $0xed8] sm:$0xff]  ;;  %v8511_v22 = vld [vmem:[%s10460_s1 + $0xe40] sm:$0xff] }
 0x1ab   :  { %5489 = vmatpush.bf16.msrb.mxu1 %v8484_v5  ;;  %v8558_v27 = vld [vmem:[%s10460_s1 + $0xfb8] sm:$0xff] }
 0x1ac   :  { %5502 = vmatpush.bf16.msrb.mxu2 %v8492_v6 }
 0x1ad   :  { %5515 = vmatpush.bf16.msrb.mxu3 %v8500_v7 }
 0x1ae   :  { %5477 = vmatpush.bf16.msrb.mxu0 %v8475_v10  ;;  %v5251_v36 = vpop.f32.mrf.mxu2  ;;  %v8505_v10 = vld [vmem:[%s10460_s1 + $0xe10] sm:$0xff] }
 0x1af   :  { %5490 = vmatpush.bf16.msrb.mxu1 %v8483_v11  ;;  %v5264_v39 = vpop.f32.mrf.mxu3  ;;  %v8513_v11 = vld [vmem:[%s10460_s1 + $0xe50] sm:$0xff] }
 0x1b0   :  { %5503 = vmatpush.bf16.msrb.mxu2 %v8491_v13  ;;  %v8521_v13 = vld [vmem:[%s10460_s1 + $0xe90] sm:$0xff]  ;;  %v8556_v39 = vld [vmem:[%s10460_s1 + $0xfa8] sm:$0xff] }
 0x1b1   :  { %5516 = vmatpush.bf16.msrb.mxu3 %v8499_v14  ;;  %v8529_v14 = vld [vmem:[%s10460_s1 + $0xed0] sm:$0xff] }
 0x1b2   :  { %5478 = vmatpush.bf16.msrb.mxu0 %v8474_v16  ;;  %v8512_v16 = vld [vmem:[%s10460_s1 + $0xe48] sm:$0xff]  ;;  %v8565_v36 = vld [vmem:[%s10460_s1 + $0xff0] sm:$0xff] }
 0x1b3   :  { %5491 = vmatpush.bf16.msrb.mxu1 %v8482_v17  ;;  %v8520_v17 = vld [vmem:[%s10460_s1 + $0xe88] sm:$0xff] }
 0x1b4   :  { %5504 = vmatpush.bf16.msrb.mxu2 %v8490_v18  ;;  %v8528_v18 = vld [vmem:[%s10460_s1 + $0xec8] sm:$0xff] }
 0x1b5   :  { %5517 = vmatpush.bf16.msrb.mxu3 %v8498_v19 }
 0x1b6   :  { %5479 = vmatpush.bf16.msrb.mxu0 %v8473_v25  ;;  %v8542_v25 = vld [vmem:[%s10460_s1 + $0xf38] sm:$0xff] }
 0x1b7   :  { %5492 = vmatpush.bf16.msrb.mxu1 %v8481_v26  ;;  %v8550_v26 = vld [vmem:[%s10460_s1 + $0xf78] sm:$0xff] }
 0x1b8   :  { %5505 = vmatpush.bf16.msrb.mxu2 %v8489_v28  ;;  %v8566_v28 = vld [vmem:[%s10460_s1 + $0xff8] sm:$0xff] }
 0x1b9   :  { %5518 = vmatpush.bf16.msrb.mxu3 %v8497_v29  ;;  %v1252_v29 = vld [vmem:[#allocation1] sm:$0xff] }
 0x1ba   :  { %5480 = vmatpush.bf16.msrb.mxu0 %v8472_v30  ;;  %v1254_v30 = vld [vmem:[#allocation1 + $0x12] sm:$0xff] }
 0x1bb   :  { %5493 = vmatpush.bf16.msrb.mxu1 %v8480_v31  ;;  %v1253_v31 = vld [vmem:[#allocation1 + $0x9] sm:$0xff] }
 0x1bc   :  { %5506 = vmatpush.bf16.msrb.mxu2 %v8488_v32  ;;  %v1255_v32 = vld [vmem:[#allocation1 + $0x1b] sm:$0xff] }
 0x1bd   :  { %5519 = vmatpush.bf16.msrb.mxu3 %v8496_v33  ;;  %v8541_v33 = vld [vmem:[%s10460_s1 + $0xf30] sm:$0xff] }
 0x1be   :  { %5481 = vmatpush.bf16.msrb.mxu0 %v8471_v41  ;;  %v5275_v57 = vpop.f32.mrf.mxu0 }
 0x1bf   :  { %5494 = vmatpush.bf16.msrb.mxu1 %v8479_v42  ;;  %v5276_v58 = vadd.f32 %v5275_v57, %v10024_v24  ;;  %v5288_v61 = vpop.f32.mrf.mxu1  ;;  %v8527_v24 = vld [vmem:[%s10460_s1 + $0xec0] sm:$0xff] }
 0x1c0   :  { %5507 = vmatpush.bf16.msrb.mxu2 %v8487_v43  ;;  %v8539_v43 = vld [vmem:[%s10460_s1 + $0xf20] sm:$0xff] }
 0x1c1   :  { %5520 = vmatpush.bf16.msrb.mxu3 %v8495_v44  ;;  %5482 = vmatmul.bf16.vlgmr.msrb.gmra.mxu0 %v1246_v34  ;;  %v5289_v0 = vadd.f32 %v5288_v61, %v5276_v58  ;;  %v8549_v34 = vld [vmem:[%s10460_s1 + $0xf70] sm:$0xff]  ;;  %v8547_v44 = vld [vmem:[%s10460_s1 + $0xf60] sm:$0xff] }
 0x1c2   :  { %5526 = vmatpush.bf16.msra.mxu0 %v8510_v45  ;;  %5495 = vmatmul.bf16.vlgmr.msrb.gmra.mxu1 %v1247_v37  ;;  %v8540_v37 = vld [vmem:[%s10460_s1 + $0xf28] sm:$0xff]  ;;  %v8537_v58 = vld [vmem:[%s10460_s1 + $0xf10] sm:$0xff] }
 0x1c3   :  { %5539 = vmatpush.bf16.msra.mxu1 %v8518_v46  ;;  %5508 = vmatmul.bf16.vlgmr.msrb.gmra.mxu2 %v1248_v35  ;;  %v8557_v35 = vld [vmem:[%s10460_s1 + $0xfb0] sm:$0xff]  ;;  %v8555_v46 = vld [vmem:[%s10460_s1 + $0xfa0] sm:$0xff] }
 0x1c4   :  { %5552 = vmatpush.bf16.msra.mxu2 %v8526_v47  ;;  %5521 = vmatmul.bf16.vlgmr.msrb.gmra.mxu3 %v1249_v38  ;;  %v8548_v38 = vld [vmem:[%s10460_s1 + $0xf68] sm:$0xff]  ;;  %v8563_v47 = vld [vmem:[%s10460_s1 + $0xfe0] sm:$0xff]  ;;  %v8553_v61 = vld [vmem:[%s10460_s1 + $0xf90] sm:$0xff] }
 0x1c5   :  { %5565 = vmatpush.bf16.msra.mxu3 %v8534_v48 }
 0x1c6   :  { %5527 = vmatpush.bf16.msra.mxu0 %v8509_v49  ;;  %v5301_v5 = vpop.f32.mrf.mxu2  ;;  %v5277_v8 = vpop.f32.mrf.mxu0  ;;  %v8538_v49 = vld [vmem:[%s10460_s1 + $0xf18] sm:$0xff] }
 0x1c7   :  { %5540 = vmatpush.bf16.msra.mxu1 %v8517_v50  ;;  %v5302_v6 = vadd.f32 %v5301_v5, %v5289_v0  ;;  %v5314_v7 = vpop.f32.mrf.mxu3  ;;  %v5290_v12 = vpop.f32.mrf.mxu1  ;;  %v8546_v50 = vld [vmem:[%s10460_s1 + $0xf58] sm:$0xff]  ;;  %v8544_v0 = vld [vmem:[%s10460_s1 + $0xf48] sm:$0xff] }
 0x1c8   :  { %5553 = vmatpush.bf16.msra.mxu2 %v8525_v51  ;;  %v8554_v51 = vld [vmem:[%s10460_s1 + $0xf98] sm:$0xff]  ;;  %v8551_v12 = vld [vmem:[%s10460_s1 + $0xf80] sm:$0xff] }
 0x1c9   :  { %5566 = vmatpush.bf16.msra.mxu3 %v8533_v52  ;;  %v5315_v9 = vadd.f32 %v5314_v7, %v5302_v6  ;;  %v8562_v52 = vld [vmem:[%s10460_s1 + $0xfd8] sm:$0xff]  ;;  %v1257_v6 = vld [vmem:[#allocation1 + $0x2d] sm:$0xff] }
 0x1ca   :  { %5528 = vmatpush.bf16.msra.mxu0 %v8508_v53  ;;  %v1259_v7 = vld [vmem:[#allocation1 + $0x3f] sm:$0xff] }
 0x1cb   :  { %5541 = vmatpush.bf16.msra.mxu1 %v8516_v54 }
 0x1cc   :  { %5554 = vmatpush.bf16.msra.mxu2 %v8524_v55 }
 0x1cd   :  { %5567 = vmatpush.bf16.msra.mxu3 %v8532_v56 }
 0x1ce   :  { %5529 = vmatpush.bf16.msra.mxu0 %v8507_v59  ;;  %v5303_v19 = vpop.f32.mrf.mxu2  ;;  %v8545_v59 = vld [vmem:[%s10460_s1 + $0xf50] sm:$0xff] }
 0x1cf   :  { %5542 = vmatpush.bf16.msra.mxu1 %v8515_v60  ;;  %v5316_v20 = vpop.f32.mrf.mxu3  ;;  %v8581_v19 = vld [vmem:[%s10460_s1 + $0x1070] sm:$0xff] }
 0x1d0   :  { %5555 = vmatpush.bf16.msra.mxu2 %v8523_v62  ;;  %v8561_v62 = vld [vmem:[%s10460_s1 + $0xfd0] sm:$0xff] }
 0x1d1   :  { %5568 = vmatpush.bf16.msra.mxu3 %v8531_v63  ;;  %v8536_v63 = vld [vmem:[%s10460_s1 + $0xf08] sm:$0xff]  ;;  %v8589_v20 = vld [vmem:[%s10460_s1 + $0x10b0] sm:$0xff] }
 0x1d2   :  { %5530 = vmatpush.bf16.msra.mxu0 %v8506_v1  ;;  %v8552_v1 = vld [vmem:[%s10460_s1 + $0xf88] sm:$0xff] }
 0x1d3   :  { %5543 = vmatpush.bf16.msra.mxu1 %v8514_v2  ;;  %v8560_v2 = vld [vmem:[%s10460_s1 + $0xfc8] sm:$0xff] }
 0x1d4   :  { %5556 = vmatpush.bf16.msra.mxu2 %v8522_v3  ;;  %v1256_v3 = vld [vmem:[#allocation1 + $0x24] sm:$0xff] }
 0x1d5   :  { %5569 = vmatpush.bf16.msra.mxu3 %v8530_v4  ;;  %v1258_v4 = vld [vmem:[#allocation1 + $0x36] sm:$0xff] }
 0x1d6   :  { %5531 = vmatpush.bf16.msra.mxu0 %v8505_v10  ;;  %v8535_v10 = vld [vmem:[%s10460_s1 + $0xf00] sm:$0xff] }
 0x1d7   :  { %5544 = vmatpush.bf16.msra.mxu1 %v8513_v11  ;;  %v8543_v11 = vld [vmem:[%s10460_s1 + $0xf40] sm:$0xff] }
 0x1d8   :  { %5557 = vmatpush.bf16.msra.mxu2 %v8521_v13  ;;  %v8559_v13 = vld [vmem:[%s10460_s1 + $0xfc0] sm:$0xff] }
 0x1d9   :  { %5570 = vmatpush.bf16.msra.mxu3 %v8529_v14  ;;  %v8574_v14 = vld [vmem:[%s10460_s1 + $0x1038] sm:$0xff] }
 0x1da   :  { %5532 = vmatpush.bf16.msra.mxu0 %v8504_v15  ;;  %v8582_v15 = vld [vmem:[%s10460_s1 + $0x1078] sm:$0xff] }
 0x1db   :  { %5545 = vmatpush.bf16.msra.mxu1 %v8512_v16  ;;  %v8590_v16 = vld [vmem:[%s10460_s1 + $0x10b8] sm:$0xff] }
 0x1dc   :  { %5558 = vmatpush.bf16.msra.mxu2 %v8520_v17  ;;  %v8598_v17 = vld [vmem:[%s10460_s1 + $0x10f8] sm:$0xff] }
 0x1dd   :  { %5571 = vmatpush.bf16.msra.mxu3 %v8528_v18  ;;  %v8573_v18 = vld [vmem:[%s10460_s1 + $0x1030] sm:$0xff] }
 0x1de   :  { %5533 = vmatpush.bf16.msra.mxu0 %v8503_v21  ;;  %v5327_v41 = vpop.f32.mrf.mxu0  ;;  %v8597_v21 = vld [vmem:[%s10460_s1 + $0x10f0] sm:$0xff] }
 0x1df   :  { %5546 = vmatpush.bf16.msra.mxu1 %v8511_v22  ;;  %v5328_v42 = vadd.f32 %v5327_v41, %v5315_v9  ;;  %v5340_v45 = vpop.f32.mrf.mxu1  ;;  %v23_v9 = vld [vmem:[%s10459_s0 + $0x40] sm:$0xff]  ;;  %v8572_v22 = vld [vmem:[%s10460_s1 + $0x1028] sm:$0xff] }
 0x1e0   :  { %5559 = vmatpush.bf16.msra.mxu2 %v8519_v23  ;;  %1261 = vst [vmem:[#allocation1] ss:$9 sm:$0xff] %v23_v9  ;;  %v8580_v23 = vld [vmem:[%s10460_s1 + $0x1068] sm:$0xff] }
 0x1e1   :  { %5572 = vmatpush.bf16.msra.mxu3 %v8527_v24  ;;  %5534 = vmatmul.bf16.vlgmr.msra.gmra.mxu0 %v1252_v29  ;;  %v5341_v48 = vadd.f32 %v5340_v45, %v5328_v42  ;;  %v8588_v24 = vld [vmem:[%s10460_s1 + $0x10a8] sm:$0xff]  ;;  %v8579_v29 = vld [vmem:[%s10460_s1 + $0x1060] sm:$0xff] }
 0x1e2   :  { %5578 = vmatpush.bf16.msrb.mxu0 %v8542_v25  ;;  %5547 = vmatmul.bf16.vlgmr.msra.gmra.mxu1 %v1253_v31  ;;  %v8596_v25 = vld [vmem:[%s10460_s1 + $0x10e8] sm:$0xff]  ;;  %v8587_v31 = vld [vmem:[%s10460_s1 + $0x10a0] sm:$0xff] }
 0x1e3   :  { %5591 = vmatpush.bf16.msrb.mxu1 %v8550_v26  ;;  %5560 = vmatmul.bf16.vlgmr.msra.gmra.mxu2 %v1254_v30  ;;  %v8628_v9 = vld [vmem:[%s10460_s1 + $0x11e8] sm:$0xff] }
 0x1e4   :  { %5604 = vmatpush.bf16.msrb.mxu2 %v8558_v27  ;;  %5573 = vmatmul.bf16.vlgmr.msra.gmra.mxu3 %v1255_v32  ;;  %v8595_v32 = vld [vmem:[%s10460_s1 + $0x10e0] sm:$0xff] }
 0x1e5   :  { %5617 = vmatpush.bf16.msrb.mxu3 %v8566_v28  ;;  %v8571_v28 = vld [vmem:[%s10460_s1 + $0x1020] sm:$0xff] }
 0x1e6   :  { %5579 = vmatpush.bf16.msrb.mxu0 %v8541_v33  ;;  %v5353_v53 = vpop.f32.mrf.mxu2  ;;  %v5329_v56 = vpop.f32.mrf.mxu0 }
 0x1e7   :  { %5592 = vmatpush.bf16.msrb.mxu1 %v8549_v34  ;;  %v5354_v54 = vadd.f32 %v5353_v53, %v5341_v48  ;;  %v5366_v55 = vpop.f32.mrf.mxu3  ;;  %v5342_v60 = vpop.f32.mrf.mxu1  ;;  %v8570_v34 = vld [vmem:[%s10460_s1 + $0x1018] sm:$0xff]  ;;  %v8568_v48 = vld [vmem:[%s10460_s1 + $0x1008] sm:$0xff]  ;;  %v8583_v56 = vld [vmem:[%s10460_s1 + $0x1080] sm:$0xff] }
 0x1e8   :  { %5605 = vmatpush.bf16.msrb.mxu2 %v8557_v35  ;;  %v8578_v35 = vld [vmem:[%s10460_s1 + $0x1058] sm:$0xff] }
 0x1e9   :  { %5618 = vmatpush.bf16.msrb.mxu3 %v8565_v36  ;;  %v10222_v57 = vadd.f32 %v5366_v55, %v5354_v54  ;;  %v8586_v36 = vld [vmem:[%s10460_s1 + $0x1098] sm:$0xff]  ;;  %v8567_v54 = vld [vmem:[%s10460_s1 + $0x1000] sm:$0xff] }
 0x1ea   :  { %5580 = vmatpush.bf16.msrb.mxu0 %v8540_v37  ;;  %v8594_v37 = vld [vmem:[%s10460_s1 + $0x10d8] sm:$0xff]  ;;  %v8575_v55 = vld [vmem:[%s10460_s1 + $0x1040] sm:$0xff] }
 0x1eb   :  { %5593 = vmatpush.bf16.msrb.mxu1 %v8548_v38  ;;  %v8622_v60 = vld [vmem:[%s10460_s1 + $0x11b8] sm:$0xff] }
 0x1ec   :  { %5606 = vmatpush.bf16.msrb.mxu2 %v8556_v39 }
 0x1ed   :  { %5619 = vmatpush.bf16.msrb.mxu3 %v8564_v40 }
 0x1ee   :  { %5581 = vmatpush.bf16.msrb.mxu0 %v8539_v43  ;;  %v5355_v5 = vpop.f32.mrf.mxu2  ;;  %v8569_v43 = vld [vmem:[%s10460_s1 + $0x1010] sm:$0xff] }
 0x1ef   :  { %5594 = vmatpush.bf16.msrb.mxu1 %v8547_v44  ;;  %v5368_v8 = vpop.f32.mrf.mxu3  ;;  %v8577_v44 = vld [vmem:[%s10460_s1 + $0x1050] sm:$0xff] }
 0x1f0   :  { %5607 = vmatpush.bf16.msrb.mxu2 %v8555_v46  ;;  %v8585_v46 = vld [vmem:[%s10460_s1 + $0x1090] sm:$0xff]  ;;  %v8620_v8 = vld [vmem:[%s10460_s1 + $0x11a8] sm:$0xff] }
 0x1f1   :  { %5620 = vmatpush.bf16.msrb.mxu3 %v8563_v47  ;;  %v8593_v47 = vld [vmem:[%s10460_s1 + $0x10d0] sm:$0xff] }
 0x1f2   :  { %5582 = vmatpush.bf16.msrb.mxu0 %v8538_v49  ;;  %v8576_v49 = vld [vmem:[%s10460_s1 + $0x1048] sm:$0xff]  ;;  %v8629_v5 = vld [vmem:[%s10460_s1 + $0x11f0] sm:$0xff] }
 0x1f3   :  { %5595 = vmatpush.bf16.msrb.mxu1 %v8546_v50  ;;  %v8584_v50 = vld [vmem:[%s10460_s1 + $0x1088] sm:$0xff] }
 0x1f4   :  { %5608 = vmatpush.bf16.msrb.mxu2 %v8554_v51  ;;  %v8592_v51 = vld [vmem:[%s10460_s1 + $0x10c8] sm:$0xff] }
 0x1f5   :  { %5621 = vmatpush.bf16.msrb.mxu3 %v8562_v52 }
 0x1f6   :  { %5583 = vmatpush.bf16.msrb.mxu0 %v8537_v58  ;;  %v8606_v58 = vld [vmem:[%s10460_s1 + $0x1138] sm:$0xff] }
 0x1f7   :  { %5596 = vmatpush.bf16.msrb.mxu1 %v8545_v59  ;;  %v8614_v59 = vld [vmem:[%s10460_s1 + $0x1178] sm:$0xff] }
 0x1f8   :  { %5609 = vmatpush.bf16.msrb.mxu2 %v8553_v61  ;;  %v8630_v61 = vld [vmem:[%s10460_s1 + $0x11f8] sm:$0xff] }
 0x1f9   :  { %5622 = vmatpush.bf16.msrb.mxu3 %v8561_v62  ;;  %v1262_v62 = vld [vmem:[#allocation1] sm:$0xff] }
 0x1fa   :  { %5584 = vmatpush.bf16.msrb.mxu0 %v8536_v63  ;;  %v1264_v63 = vld [vmem:[#allocation1 + $0x12] sm:$0xff] }
 0x1fb   :  { %5597 = vmatpush.bf16.msrb.mxu1 %v8544_v0  ;;  %v1263_v0 = vld [vmem:[#allocation1 + $0x9] sm:$0xff] }
 0x1fc   :  { %5610 = vmatpush.bf16.msrb.mxu2 %v8552_v1  ;;  %v1265_v1 = vld [vmem:[#allocation1 + $0x1b] sm:$0xff] }
 0x1fd   :  { %5623 = vmatpush.bf16.msrb.mxu3 %v8560_v2  ;;  %v8605_v2 = vld [vmem:[%s10460_s1 + $0x1130] sm:$0xff] }
 0x1fe   :  { %5585 = vmatpush.bf16.msrb.mxu0 %v8535_v10  ;;  %v5379_v26 = vpop.f32.mrf.mxu0 }
 0x1ff   :  { %5598 = vmatpush.bf16.msrb.mxu1 %v8543_v11  ;;  %v5380_v27 = vadd.f32 %v5379_v26, %v10222_v57  ;;  %v5392_v30 = vpop.f32.mrf.mxu1  ;;  %v8591_v57 = vld [vmem:[%s10460_s1 + $0x10c0] sm:$0xff] }
 0x200   :  { %5611 = vmatpush.bf16.msrb.mxu2 %v8551_v12  ;;  %v8603_v12 = vld [vmem:[%s10460_s1 + $0x1120] sm:$0xff] }
 0x201   :  { %5624 = vmatpush.bf16.msrb.mxu3 %v8559_v13  ;;  %5586 = vmatmul.bf16.vlgmr.msrb.gmra.mxu0 %v1256_v3  ;;  %v5393_v33 = vadd.f32 %v5392_v30, %v5380_v27  ;;  %v8613_v3 = vld [vmem:[%s10460_s1 + $0x1170] sm:$0xff]  ;;  %v8611_v13 = vld [vmem:[%s10460_s1 + $0x1160] sm:$0xff] }
 0x202   :  { %5630 = vmatpush.bf16.msra.mxu0 %v8574_v14  ;;  %5599 = vmatmul.bf16.vlgmr.msrb.gmra.mxu1 %v1257_v6  ;;  %v8604_v6 = vld [vmem:[%s10460_s1 + $0x1128] sm:$0xff]  ;;  %v8601_v27 = vld [vmem:[%s10460_s1 + $0x1110] sm:$0xff] }
 0x203   :  { %5643 = vmatpush.bf16.msra.mxu1 %v8582_v15  ;;  %5612 = vmatmul.bf16.vlgmr.msrb.gmra.mxu2 %v1258_v4  ;;  %v8621_v4 = vld [vmem:[%s10460_s1 + $0x11b0] sm:$0xff]  ;;  %v8619_v15 = vld [vmem:[%s10460_s1 + $0x11a0] sm:$0xff] }
 0x204   :  { %5656 = vmatpush.bf16.msra.mxu2 %v8590_v16  ;;  %5625 = vmatmul.bf16.vlgmr.msrb.gmra.mxu3 %v1259_v7  ;;  %v8612_v7 = vld [vmem:[%s10460_s1 + $0x1168] sm:$0xff]  ;;  %v8627_v16 = vld [vmem:[%s10460_s1 + $0x11e0] sm:$0xff]  ;;  %v8617_v30 = vld [vmem:[%s10460_s1 + $0x1190] sm:$0xff] }
 0x205   :  { %5669 = vmatpush.bf16.msra.mxu3 %v8598_v17 }
 0x206   :  { %5631 = vmatpush.bf16.msra.mxu0 %v8573_v18  ;;  %v5405_v38 = vpop.f32.mrf.mxu2  ;;  %v5381_v41 = vpop.f32.mrf.mxu0  ;;  %v8602_v18 = vld [vmem:[%s10460_s1 + $0x1118] sm:$0xff] }
 0x207   :  { %5644 = vmatpush.bf16.msra.mxu1 %v8581_v19  ;;  %v5406_v39 = vadd.f32 %v5405_v38, %v5393_v33  ;;  %v5418_v40 = vpop.f32.mrf.mxu3  ;;  %v5394_v45 = vpop.f32.mrf.mxu1  ;;  %v8610_v19 = vld [vmem:[%s10460_s1 + $0x1158] sm:$0xff]  ;;  %v8608_v33 = vld [vmem:[%s10460_s1 + $0x1148] sm:$0xff]  ;;  %v8599_v38 = vld [vmem:[%s10460_s1 + $0x1100] sm:$0xff] }
 0x208   :  { %5657 = vmatpush.bf16.msra.mxu2 %v8589_v20  ;;  %v8618_v20 = vld [vmem:[%s10460_s1 + $0x1198] sm:$0xff]  ;;  %v8623_v41 = vld [vmem:[%s10460_s1 + $0x11c0] sm:$0xff] }
 0x209   :  { %5670 = vmatpush.bf16.msra.mxu3 %v8597_v21  ;;  %v5419_v42 = vadd.f32 %v5418_v40, %v5406_v39  ;;  %v8626_v21 = vld [vmem:[%s10460_s1 + $0x11d8] sm:$0xff]  ;;  %v8607_v39 = vld [vmem:[%s10460_s1 + $0x1140] sm:$0xff] }
 0x20a   :  { %5632 = vmatpush.bf16.msra.mxu0 %v8572_v22  ;;  %v8615_v40 = vld [vmem:[%s10460_s1 + $0x1180] sm:$0xff] }
 0x20b   :  { %5645 = vmatpush.bf16.msra.mxu1 %v8580_v23  ;;  %v1269_v45 = vld [vmem:[#allocation1 + $0x3f] sm:$0xff] }
 0x20c   :  { %5658 = vmatpush.bf16.msra.mxu2 %v8588_v24 }
 0x20d   :  { %5671 = vmatpush.bf16.msra.mxu3 %v8596_v25 }
 0x20e   :  { %5633 = vmatpush.bf16.msra.mxu0 %v8571_v28  ;;  %v5407_v52 = vpop.f32.mrf.mxu2  ;;  %v8609_v28 = vld [vmem:[%s10460_s1 + $0x1150] sm:$0xff] }
 0x20f   :  { %5646 = vmatpush.bf16.msra.mxu1 %v8579_v29  ;;  %v5420_v53 = vpop.f32.mrf.mxu3 }
 0x210   :  { %5659 = vmatpush.bf16.msra.mxu2 %v8587_v31  ;;  %v8625_v31 = vld [vmem:[%s10460_s1 + $0x11d0] sm:$0xff] }
 0x211   :  { %5672 = vmatpush.bf16.msra.mxu3 %v8595_v32  ;;  %v8600_v32 = vld [vmem:[%s10460_s1 + $0x1108] sm:$0xff] }
 0x212   :  { %5634 = vmatpush.bf16.msra.mxu0 %v8570_v34  ;;  %v8616_v34 = vld [vmem:[%s10460_s1 + $0x1188] sm:$0xff] }
 0x213   :  { %5647 = vmatpush.bf16.msra.mxu1 %v8578_v35  ;;  %v8624_v35 = vld [vmem:[%s10460_s1 + $0x11c8] sm:$0xff]  ;;  %s8659_s1 = smov [#allocation2]  }
 0x214   :  { %5660 = vmatpush.bf16.msra.mxu2 %v8586_v36  ;;  %s5740_s16 = sshll.u32 %s8659_s1, 4  ;;  %s5741_s16 = int_to_ptr.vmem [resolvable:$true] %s5740_s16 }
 0x215   :  { %5673 = vmatpush.bf16.msra.mxu3 %v8594_v37 }
 0x216   :  { %5635 = vmatpush.bf16.msra.mxu0 %v8569_v43  ;;  %v1267_v43 = vld [vmem:[#allocation1 + $0x2d] sm:$0xff] }
 0x217   :  { %5648 = vmatpush.bf16.msra.mxu1 %v8577_v44  ;;  %v1268_v44 = vld [vmem:[#allocation1 + $0x36] sm:$0xff] }
 0x218   :  { %5661 = vmatpush.bf16.msra.mxu2 %v8585_v46 }
 0x219   :  { %5674 = vmatpush.bf16.msra.mxu3 %v8593_v47 }
 0x21a   :  { %5636 = vmatpush.bf16.msra.mxu0 %v8568_v48 }
 0x21b   :  { %5649 = vmatpush.bf16.msra.mxu1 %v8576_v49 }
 0x21c   :  { %5662 = vmatpush.bf16.msra.mxu2 %v8584_v50 }
 0x21d   :  { %5675 = vmatpush.bf16.msra.mxu3 %v8592_v51 }
 0x21e   :  { %5637 = vmatpush.bf16.msra.mxu0 %v8567_v54  ;;  %v5431_v10 = vpop.f32.mrf.mxu0 }
 0x21f   :  { %5650 = vmatpush.bf16.msra.mxu1 %v8575_v55  ;;  %v5432_v11 = vadd.f32 %v5431_v10, %v5419_v42  ;;  %v5444_v14 = vpop.f32.mrf.mxu1  ;;  %v1266_v42 = vld [vmem:[#allocation1 + $0x24] sm:$0xff] }
 0x220   :  { %5663 = vmatpush.bf16.msra.mxu2 %v8583_v56 }
 0x221   :  { %5676 = vmatpush.bf16.msra.mxu3 %v8591_v57  ;;  %5638 = vmatmul.bf16.vlgmr.msra.gmra.mxu0 %v1262_v62  ;;  %v5445_v17 = vadd.f32 %v5444_v14, %v5432_v11 }
 0x222   :  { %5682 = vmatpush.bf16.msrb.mxu0 %v8606_v58  ;;  %5651 = vmatmul.bf16.vlgmr.msra.gmra.mxu1 %v1263_v0 }
 0x223   :  { %5695 = vmatpush.bf16.msrb.mxu1 %v8614_v59  ;;  %5664 = vmatmul.bf16.vlgmr.msra.gmra.mxu2 %v1264_v63 }
 0x224   :  { %5708 = vmatpush.bf16.msrb.mxu2 %v8622_v60  ;;  %5677 = vmatmul.bf16.vlgmr.msra.gmra.mxu3 %v1265_v1 }
 0x225   :  { %5721 = vmatpush.bf16.msrb.mxu3 %v8630_v61 }
 0x226   :  { %5683 = vmatpush.bf16.msrb.mxu0 %v8605_v2  ;;  %v5457_v22 = vpop.f32.mrf.mxu2  ;;  %v5433_v25 = vpop.f32.mrf.mxu0 }
 0x227   :  { %5696 = vmatpush.bf16.msrb.mxu1 %v8613_v3  ;;  %v5458_v23 = vadd.f32 %v5457_v22, %v5445_v17  ;;  %v5470_v24 = vpop.f32.mrf.mxu3  ;;  %v5446_v29 = vpop.f32.mrf.mxu1 }
 0x228   :  { %5709 = vmatpush.bf16.msrb.mxu2 %v8621_v4 }
 0x229   :  { %5722 = vmatpush.bf16.msrb.mxu3 %v8629_v5  ;;  %v5471_v26 = vadd.f32 %v5470_v24, %v5458_v23 }
 0x22a   :  { %5684 = vmatpush.bf16.msrb.mxu0 %v8604_v6 }
 0x22b   :  { %5697 = vmatpush.bf16.msrb.mxu1 %v8612_v7 }
 0x22c   :  { %5710 = vmatpush.bf16.msrb.mxu2 %v8620_v8 }
 0x22d   :  { %5723 = vmatpush.bf16.msrb.mxu3 %v8628_v9 }
 0x22e   :  { %5685 = vmatpush.bf16.msrb.mxu0 %v8603_v12  ;;  %v5459_v36 = vpop.f32.mrf.mxu2 }
 0x22f   :  { %5698 = vmatpush.bf16.msrb.mxu1 %v8611_v13  ;;  %v5472_v37 = vpop.f32.mrf.mxu3 }
 0x230   :  { %5711 = vmatpush.bf16.msrb.mxu2 %v8619_v15 }
 0x231   :  { %5724 = vmatpush.bf16.msrb.mxu3 %v8627_v16 }
 0x232   :  { %5686 = vmatpush.bf16.msrb.mxu0 %v8602_v18 }
 0x233   :  { %5699 = vmatpush.bf16.msrb.mxu1 %v8610_v19 }
 0x234   :  { %5712 = vmatpush.bf16.msrb.mxu2 %v8618_v20 }
 0x235   :  { %5725 = vmatpush.bf16.msrb.mxu3 %v8626_v21 }
 0x236   :  { %5687 = vmatpush.bf16.msrb.mxu0 %v8601_v27 }
 0x237   :  { %5700 = vmatpush.bf16.msrb.mxu1 %v8609_v28 }
 0x238   :  { %5713 = vmatpush.bf16.msrb.mxu2 %v8617_v30 }
 0x239   :  { %5726 = vmatpush.bf16.msrb.mxu3 %v8625_v31 }
 0x23a   :  { %5688 = vmatpush.bf16.msrb.mxu0 %v8600_v32 }
 0x23b   :  { %5701 = vmatpush.bf16.msrb.mxu1 %v8608_v33 }
 0x23c   :  { %5714 = vmatpush.bf16.msrb.mxu2 %v8616_v34 }
 0x23d   :  { %5727 = vmatpush.bf16.msrb.mxu3 %v8624_v35 }
 0x23e   :  { %5689 = vmatpush.bf16.msrb.mxu0 %v8599_v38  ;;  %v5483_v46 = vpop.f32.mrf.mxu0 }
 0x23f   :  { %5702 = vmatpush.bf16.msrb.mxu1 %v8607_v39  ;;  %v5484_v47 = vadd.f32 %v5483_v46, %v5471_v26  ;;  %v5496_v48 = vpop.f32.mrf.mxu1 }
 0x240   :  { %5715 = vmatpush.bf16.msrb.mxu2 %v8615_v40 }
 0x241   :  { %5728 = vmatpush.bf16.msrb.mxu3 %v8623_v41  ;;  %5690 = vmatmul.bf16.vlgmr.msrb.gmra.mxu0 %v1266_v42  ;;  %v5497_v49 = vadd.f32 %v5496_v48, %v5484_v47 }
 0x242   :  { %5703 = vmatmul.bf16.vlgmr.msrb.gmra.mxu1 %v1267_v43 }
 0x243   :  { %5716 = vmatmul.bf16.vlgmr.msrb.gmra.mxu2 %v1268_v44 }
 0x244   :  { %5729 = vmatmul.bf16.vlgmr.msrb.gmra.mxu3 %v1269_v45 }
 0x246   :  { %v5509_v50 = vpop.f32.mrf.mxu2  ;;  %v5485_v53 = vpop.f32.mrf.mxu0 }
 0x247   :  { %v5510_v51 = vadd.f32 %v5509_v50, %v5497_v49  ;;  %v5522_v52 = vpop.f32.mrf.mxu3  ;;  %v5498_v55 = vpop.f32.mrf.mxu1 }
 0x249   :  { %v5523_v54 = vadd.f32 %v5522_v52, %v5510_v51 }
 0x24e   :  { %v5511_v56 = vpop.f32.mrf.mxu2 }
 0x24f   :  { %v5524_v57 = vpop.f32.mrf.mxu3 }
 0x25e   :  { %v5535_v58 = vpop.f32.mrf.mxu0 }
 0x25f   :  { %v5536_v59 = vadd.f32 %v5535_v58, %v5523_v54  ;;  %v5548_v60 = vpop.f32.mrf.mxu1 }
 0x261   :  { %v5549_v61 = vadd.f32 %v5548_v60, %v5536_v59 }
 0x266   :  { %v5561_v62 = vpop.f32.mrf.mxu2  ;;  %v5537_v1 = vpop.f32.mrf.mxu0 }
 0x267   :  { %v5562_v63 = vadd.f32 %v5561_v62, %v5549_v61  ;;  %v5574_v0 = vpop.f32.mrf.mxu3  ;;  %v5550_v3 = vpop.f32.mrf.mxu1 }
 0x269   :  { %v5575_v2 = vadd.f32 %v5574_v0, %v5562_v63 }
 0x26e   :  { %v5563_v4 = vpop.f32.mrf.mxu2 }
 0x26f   :  { %v5576_v5 = vpop.f32.mrf.mxu3 }
 0x27e   :  { %v5587_v6 = vpop.f32.mrf.mxu0 }
 0x27f   :  { %v5600_v7 = vpop.f32.mrf.mxu1  ;;  %v5588_v17 = vadd.f32 %v5587_v6, %v5575_v2 }
 0x281   :  { %v5601_v21 = vadd.f32 %v5600_v7, %v5588_v17 }
 0x286   :  { %v5613_v8 = vpop.f32.mrf.mxu2  ;;  %v5589_v10 = vpop.f32.mrf.mxu0 }
 0x287   :  { %v5626_v9 = vpop.f32.mrf.mxu3  ;;  %v5602_v11 = vpop.f32.mrf.mxu1  ;;  %v5614_v22 = vadd.f32 %v5613_v8, %v5601_v21 }
 0x289   :  { %v5627_v25 = vadd.f32 %v5626_v9, %v5614_v22 }
 0x28e   :  { %v5615_v12 = vpop.f32.mrf.mxu2 }
 0x28f   :  { %v5628_v13 = vpop.f32.mrf.mxu3 }
 0x29e   :  { %v5639_v14 = vpop.f32.mrf.mxu0 }
 0x29f   :  { %v5652_v15 = vpop.f32.mrf.mxu1  ;;  %v5640_v26 = vadd.f32 %v5639_v14, %v5627_v25 }
 0x2a1   :  { %v5653_v27 = vadd.f32 %v5652_v15, %v5640_v26 }
 0x2a6   :  { %v5665_v16 = vpop.f32.mrf.mxu2  ;;  %v5641_v19 = vpop.f32.mrf.mxu0 }
 0x2a7   :  { %v5678_v18 = vpop.f32.mrf.mxu3  ;;  %v5654_v20 = vpop.f32.mrf.mxu1  ;;  %v5666_v28 = vadd.f32 %v5665_v16, %v5653_v27 }
 0x2a9   :  { %v5679_v29 = vadd.f32 %v5678_v18, %v5666_v28 }
 0x2ae   :  { %v5667_v23 = vpop.f32.mrf.mxu2 }
 0x2af   :  { %v5680_v24 = vpop.f32.mrf.mxu3 }
 0x2be   :  { %v5691_v30 = vpop.f32.mrf.mxu0 }
 0x2bf   :  { %v5704_v31 = vpop.f32.mrf.mxu1  ;;  %v5692_v32 = vadd.f32 %v5691_v30, %v5679_v29 }
 0x2c1   :  { %v5705_v33 = vadd.f32 %v5704_v31, %v5692_v32 }
 0x2c6   :  { %v5717_v34 = vpop.f32.mrf.mxu2  ;;  %v5693_v37 = vpop.f32.mrf.mxu0 }
 0x2c7   :  { %v5730_v35 = vpop.f32.mrf.mxu3  ;;  %v5718_v36 = vadd.f32 %v5717_v34, %v5705_v33  ;;  %v5706_v38 = vpop.f32.mrf.mxu1 }
 0x2c9   :  { %v5731_v39 = vadd.f32 %v5730_v35, %v5718_v36 }
 0x2cb   :  { %5734 = vst [vmem:[#allocation2] sm:$0x3] %v5731_v39 }
 0x2cc   :  { %5745 = dma.vmem_to_hbm [thread:$0]  %s5741_s16, 32, %s5743_s18, [#allocation3]  }
 0x2ce   :  { %v5719_v40 = vpop.f32.mrf.mxu2 }
 0x2cf   :  { %v5732_v41 = vpop.f32.mrf.mxu3 }
 0x2d0   :  { %8657 = dma.done.wait [#allocation3], 32  }
 0x2d1   :  { %8658 = vsyncadd [#allocation3], 4294967264 }
 0x2d2   :  { %5750 = vsyncpa [#allocation3], 1 }

</bundles_post_ra>
